<compile_context>
chip_gen: v7x
topology: tpu7x:2x2x1
jax: 0.10.0
libtpu: 0.0.40
codegen_flags: <defaults>
</compile_context>

<pallas_src>
import functools

import jax
import jax.numpy as jnp
from jax.experimental import pallas as pl
from jax.experimental.pallas import tpu as pltpu

# Logical (PyTorch) feature dims.
D_H1, D_H2, D_H3, D_LN, D_OUT = 400, 600, 400, 40, 2
# Lane-aligned (multiple-of-128) padded dims used inside the kernel.
P_H1, P_H2, P_H3, P_LN, P_OUT = 512, 640, 512, 128, 128

LN_EPS = 1e-5
NEG_SLOPE = 0.02     # LeakyReLU(0.02) in the hidden layers
OUT_SLOPE = 2.0      # LeakyReLU(2) after the final Linear


def _leaky_relu(x, slope):
    # PyTorch nn.LeakyReLU(slope): x if x >= 0 else slope * x
    return jnp.where(x >= 0, x, slope * x)


def _round_up(n, m):
    return -(-n // m) * m


def _generator_kernel(x_ref,
                      w1_ref, w2_ref, w3_ref, w4_ref, w5_ref,
                      bias_ref,
                      o_ref):
    cd = w1_ref.dtype                      # compute dtype for MXU operands

    # Bias slab rows: 0=b1, 1=b2, 2=b3, 3=b4, 4=b5' (all f32, zero-padded).
    b1 = bias_ref[0:1, :P_H1]
    b2 = bias_ref[1:2, :P_H2]
    b3 = bias_ref[2:3, :P_H3]
    b4 = bias_ref[3:4, :P_LN]
    b5 = bias_ref[4:5, :P_OUT]

    # Input arrives pre-cast to the compute dtype and lane-padded with zeros.
    x = x_ref[...]

    # Linear(input_dim, 400) + LeakyReLU(0.02)   (padded to 512 lanes)
    h = jnp.dot(x, w1_ref[...], preferred_element_type=jnp.float32) + b1
    h = _leaky_relu(h, NEG_SLOPE).astype(cd)

    # Linear(400, 600) + LeakyReLU(0.02)         (padded to 640 lanes)
    h = jnp.dot(h, w2_ref[...], preferred_element_type=jnp.float32) + b2
    h = _leaky_relu(h, NEG_SLOPE).astype(cd)

    # Linear(600, 400) + LeakyReLU(0.02)         (padded to 512 lanes)
    h = jnp.dot(h, w3_ref[...], preferred_element_type=jnp.float32) + b3
    h = _leaky_relu(h, NEG_SLOPE).astype(cd)

    # Linear(400, 40) + LeakyReLU(0.02)          (padded to 128 lanes; lanes
    # >= 40 are exactly zero because the padded weight columns/bias are zero)
    h = jnp.dot(h, w4_ref[...], preferred_element_type=jnp.float32) + b4
    h = _leaky_relu(h, NEG_SLOPE)              # f32, (tile_b, 128)

    # LayerNorm(40), single pass. Padded lanes of h are exactly zero, so the
    # full-width sums equal the sums over the 40 real features; no mask needed.
    inv_n = 1.0 / D_LN
    mean = jnp.sum(h, axis=-1, keepdims=True) * inv_n
    ex2 = jnp.sum(h * h, axis=-1, keepdims=True) * inv_n
    var = ex2 - mean * mean
    hn = ((h - mean) * jax.lax.rsqrt(var + LN_EPS)).astype(cd)

    # Linear(40, 2) + LeakyReLU(2). gamma/beta were folded into w5/b5 at
    # prepare_params time; the padded rows of w5 are zero, so the (nonzero)
    # padded lanes of hn contribute nothing. Output padded to 128 lanes ->
    # dense unmasked vst; the wrapper slices [:, :2].
    out = jnp.dot(hn, w5_ref[...], preferred_element_type=jnp.float32) + b5
    o_ref[...] = _leaky_relu(out, OUT_SLOPE).astype(o_ref.dtype)


def init_generator_params(key, input_dim):
    """Deterministic PyTorch-like init: U(-1/sqrt(fan_in), 1/sqrt(fan_in))."""
    dims = [(input_dim, D_H1), (D_H1, D_H2), (D_H2, D_H3), (D_H3, D_LN), (D_LN, D_OUT)]
    params = []
    for (fan_in, fan_out) in dims:
        key, kw, kb = jax.random.split(key, 3)
        bound = 1.0 / jnp.sqrt(float(fan_in))
        w = jax.random.uniform(kw, (fan_in, fan_out), jnp.float32, -bound, bound)
        b = jax.random.uniform(kb, (1, fan_out), jnp.float32, -bound, bound)
        params.append((w, b))
    gamma = jnp.ones((1, D_LN), jnp.float32)
    beta = jnp.zeros((1, D_LN), jnp.float32)
    (w1, b1), (w2, b2), (w3, b3), (w4, b4), (w5, b5) = params
    return (w1, b1, w2, b2, w3, b3, w4, b4, gamma, beta, w5, b5)


def _pad2(a, rows, cols):
    r, c = a.shape
    return jnp.pad(a, ((0, rows - r), (0, cols - c)))


def prepare_params(params, compute_dtype=jnp.bfloat16):
    """Zero-pad logical params to lane-aligned shapes and fold the LayerNorm
    affine into the final Linear.

    Zero padding keeps the math identical: padded activation columns are zero
    and padded weight rows are zero, so they contribute nothing downstream.
    Fold:  (gamma * n + beta) @ w5 + b5  ==  n @ (diag(gamma) @ w5) + (beta @ w5 + b5).
    Biases stay f32 (added to f32 MXU accumulations) and are packed into one
    (8, 640) slab -> a single BlockSpec / DMA descriptor.
    """
    (w1, b1, w2, b2, w3, b3, w4, b4, gamma, beta, w5, b5) = params
    D = w1.shape[0]
    p_in = _round_up(D, 128)

    w5f = gamma.reshape(D_LN, 1) * w5              # (40, 2)
    b5f = beta @ w5 + b5                           # (1, 2)

    w1p = _pad2(w1, p_in, P_H1).astype(compute_dtype)
    w2p = _pad2(w2, P_H1, P_H2).astype(compute_dtype)
    w3p = _pad2(w3, P_H2, P_H3).astype(compute_dtype)
    w4p = _pad2(w4, P_H3, P_LN).astype(compute_dtype)
    w5p = _pad2(w5f, P_LN, P_OUT).astype(compute_dtype)

    bias = jnp.zeros((8, P_H2), jnp.float32)
    bias = bias.at[0, :D_H1].set(b1[0].astype(jnp.float32))
    bias = bias.at[1, :D_H2].set(b2[0].astype(jnp.float32))
    bias = bias.at[2, :D_H3].set(b3[0].astype(jnp.float32))
    bias = bias.at[3, :D_LN].set(b4[0].astype(jnp.float32))
    bias = bias.at[4, :D_OUT].set(b5f[0].astype(jnp.float32))

    return (w1p, w2p, w3p, w4p, w5p, bias)


def _chip_config(itemsize):
    """(multi_tensorcore, batch_tile_cap, vmem_ceiling_bytes) for the local chip."""
    kind = ""
    try:
        kind = jax.devices()[0].device_kind.lower()
    except Exception:
        pass
    if "7" in kind:                       # v7x: 2 TCs, 64 MiB VMEM per TC
        cap = 1024 if itemsize <= 2 else 512
        return True, cap, 56 << 20
    if "v6" in kind or "trillium" in kind:  # v6e: 1 TC, 128 MiB VMEM
        return False, 4096, 100 << 20
    if "v5e" in kind or "v5 lite" in kind or "v5lite" in kind:  # v5e: 1 TC
        return False, 2048, 100 << 20
    # Unknown / megacore chips: conservative multi-core assumption.
    return True, 1024, 56 << 20


def _choose_tile_b(B, *, multi_core, cap):
    """Per-step batch tile.

    - multiples of 16 preferred (bf16 sublane packing, MXU row fill)
    - single-TC chips: one grid step when the whole batch fits the cap
      (grid is a serial loop there; splitting only adds per-step overhead)
    - multi-TC chips: even step count with >= 128/256 rows per core when the
      batch permits, so dimension_semantics=("parallel",) feeds both cores.
    """
    if B <= 0:
        return max(B, 1)
    div16 = [t for t in range(16, B + 1, 16) if B % t == 0]
    div8 = [t for t in range(8, B + 1, 8) if B % t == 0]

    if not multi_core:
        if B <= cap:
            return B
        cands = [t for t in div16 if t <= cap] or [t for t in div8 if t <= cap]
        return max(cands) if cands else B

    cands = [t for t in div16 if 256 <= t <= cap and (B // t) % 2 == 0]
    if not cands:
        cands = [t for t in div16 if 128 <= t <= cap and (B // t) % 2 == 0]
    if cands:
        return max(cands)
    if B <= cap:
        return B
    cands = [t for t in div8 if t <= cap]
    return max(cands) if cands else B


def _vmem_limit_bytes(tile_b, p_in, padded_params, ceiling):
    param_bytes = sum(int(p.size) * p.dtype.itemsize for p in padded_params)
    in_itemsize = padded_params[0].dtype.itemsize
    # f32 upper bound on live activations at the widest point of the kernel.
    act = tile_b * (P_H1 + P_H2 + P_H3 + 2 * P_LN + P_OUT) * 4
    # Double-buffered input/output blocks.
    io = 2 * tile_b * (p_in * in_itemsize + P_OUT * 4)
    # Params counted twice (default double-buffering even for constant blocks)
    # plus headroom for Mosaic internal scratch.
    est = 2 * param_bytes + act + io + (12 << 20)
    return int(min(est, ceiling))


@functools.partial(jax.jit, static_argnames=("tile_b",))
def generator_forward(x, padded_params, tile_b=None):
    """Run the whole 6-layer Generator MLP in one Pallas kernel, tiled over batch."""
    w1p, w2p, w3p, w4p, w5p, bias = padded_params
    B, D = x.shape
    p_in = w1p.shape[0]
    cd = w1p.dtype

    multi_core, cap, ceiling = _chip_config(jnp.dtype(cd).itemsize)
    if tile_b is None:
        tile_b = _choose_tile_b(B, multi_core=multi_core, cap=cap)
    assert B % tile_b == 0, "batch must be divisible by the batch tile"

    # Cast + lane-pad the input once in the wrapper: halves input DMA bytes in
    # bf16 and makes the x block a dense, unmasked vector load.
    xp = jnp.pad(x.astype(cd), ((0, 0), (0, p_in - D)))

    in_specs = [pl.BlockSpec((tile_b, p_in), lambda i: (i, 0))]
    # All (small, ~1.6 MiB bf16) parameters stay resident in VMEM; their
    # index_maps are constant so they are DMA'd once. (Single-buffering them
    # would shave ~1.6 MiB more but buys nothing at these sizes.)
    in_specs += [pl.BlockSpec(p.shape, lambda i: (0, 0))
                 for p in (w1p, w2p, w3p, w4p, w5p, bias)]
    out_specs = pl.BlockSpec((tile_b, P_OUT), lambda i: (i, 0))

    out_padded = pl.pallas_call(
        _generator_kernel,
        out_shape=jax.ShapeDtypeStruct((B, P_OUT), jnp.float32),
        grid_spec=pltpu.PrefetchScalarGridSpec(
            num_scalar_prefetch=0,
            grid=(B // tile_b,),
            in_specs=in_specs,
            out_specs=out_specs,
        ),
        compiler_params=pltpu.CompilerParams(
            dimension_semantics=("parallel",),
            vmem_limit_bytes=_vmem_limit_bytes(tile_b, p_in, padded_params, ceiling),
        ),
    )(xp, w1p, w2p, w3p, w4p, w5p, bias)
    return out_padded[:, :D_OUT]


def generator_forward_ref(x, params):
    """Pure-JAX f32 reference (logical, unpadded shapes)."""
    (w1, b1, w2, b2, w3, b3, w4, b4, gamma, beta, w5, b5) = params
    h = _leaky_relu(x @ w1 + b1, NEG_SLOPE)
    h = _leaky_relu(h @ w2 + b2, NEG_SLOPE)
    h = _leaky_relu(h @ w3 + b3, NEG_SLOPE)
    h = _leaky_relu(h @ w4 + b4, NEG_SLOPE)
    mean = jnp.mean(h, axis=-1, keepdims=True)
    var = jnp.mean((h - mean) ** 2, axis=-1, keepdims=True)
    h = (h - mean) * jax.lax.rsqrt(var + LN_EPS) * gamma + beta
    return _leaky_relu(h @ w5 + b5, OUT_SLOPE)


if __name__ == "__main__":
    key = jax.random.PRNGKey(0)
    k_params, k_x = jax.random.split(key)

    input_dim = 32
    batch = 64

    params = init_generator_params(k_params, input_dim)
    x = jax.random.normal(k_x, (batch, input_dim), jnp.float32)
    ref = generator_forward_ref(x, params)

    # Default path: bf16 operands (MXU-native), f32 accumulation.
    bf16_params = prepare_params(params, compute_dtype=jnp.bfloat16)
    out_bf16 = jax.block_until_ready(generator_forward(x, bf16_params))
    assert out_bf16.shape == (batch, 2)
    assert jnp.allclose(out_bf16, ref, atol=5e-2, rtol=5e-2), "bf16 kernel mismatch"

    # f32 operand path: tight numerical check against the pure-JAX reference.
    f32_params = prepare_params(params, compute_dtype=jnp.float32)
    out_f32 = jax.block_until_ready(generator_forward(x, f32_params))
    assert out_f32.shape == (batch, 2)
    assert jnp.allclose(out_f32, ref, atol=1e-4, rtol=1e-4), "f32 kernel mismatch"

    # TODO(synk): training loop (Adam optimiser, discriminator coupling, loss /
    # backward) is host-side PyTorch logic, not part of the forward kernel.
    print("KERNEL_OK")
</pallas_src>

<mosaic_0001>
module attributes {stable_mosaic.version = 11 : i64} {
  func.func @_generator_kernel(%arg0: i32, %arg1: memref<64x128xbf16, #tpu.memory_space<vmem>>, %arg2: memref<128x512xbf16, #tpu.memory_space<vmem>>, %arg3: memref<512x640xbf16, #tpu.memory_space<vmem>>, %arg4: memref<640x512xbf16, #tpu.memory_space<vmem>>, %arg5: memref<512x128xbf16, #tpu.memory_space<vmem>>, %arg6: memref<128x128xbf16, #tpu.memory_space<vmem>>, %arg7: memref<8x640xf32, #tpu.memory_space<vmem>>, %arg8: memref<64x128xf32, #tpu.memory_space<vmem>>) attributes {dimension_semantics = [#tpu.dimension_semantics<parallel>], iteration_bounds = array<i64: 1>, scalar_prefetch = 0 : i64, scratch_operands = 0 : i64, tpu.core_type = #tpu.core_type<tc>, window_params = [{transform_indices = @transform_0, window_bounds = array<i64: 64, 128>}, {pipeline_mode = #tpu.pipeline_mode<synchronous>, transform_indices = @transform_1, window_bounds = array<i64: 128, 512>}, {pipeline_mode = #tpu.pipeline_mode<synchronous>, transform_indices = @transform_2, window_bounds = array<i64: 512, 640>}, {pipeline_mode = #tpu.pipeline_mode<synchronous>, transform_indices = @transform_3, window_bounds = array<i64: 640, 512>}, {pipeline_mode = #tpu.pipeline_mode<synchronous>, transform_indices = @transform_4, window_bounds = array<i64: 512, 128>}, {pipeline_mode = #tpu.pipeline_mode<synchronous>, transform_indices = @transform_5, window_bounds = array<i64: 128, 128>}, {pipeline_mode = #tpu.pipeline_mode<synchronous>, transform_indices = @transform_6, window_bounds = array<i64: 8, 640>}, {transform_indices = @transform_7, window_bounds = array<i64: 64, 128>}]} {
    %c0 = arith.constant 0 : index
    %c0_0 = arith.constant 0 : index
    %0 = vector.load %arg7[%c0, %c0_0] : memref<8x640xf32, #tpu.memory_space<vmem>>, vector<1x512xf32>
    %c1 = arith.constant 1 : index
    %c0_1 = arith.constant 0 : index
    %1 = vector.load %arg7[%c1, %c0_1] : memref<8x640xf32, #tpu.memory_space<vmem>>, vector<1x640xf32>
    %c2 = arith.constant 2 : index
    %c0_2 = arith.constant 0 : index
    %2 = vector.load %arg7[%c2, %c0_2] : memref<8x640xf32, #tpu.memory_space<vmem>>, vector<1x512xf32>
    %c3 = arith.constant 3 : index
    %c0_3 = arith.constant 0 : index
    %3 = vector.load %arg7[%c3, %c0_3] : memref<8x640xf32, #tpu.memory_space<vmem>>, vector<1x128xf32>
    %c4 = arith.constant 4 : index
    %c0_4 = arith.constant 0 : index
    %4 = vector.load %arg7[%c4, %c0_4] : memref<8x640xf32, #tpu.memory_space<vmem>>, vector<1x128xf32>
    %c0_5 = arith.constant 0 : index
    %c0_6 = arith.constant 0 : index
    %5 = vector.load %arg1[%c0_5, %c0_6] : memref<64x128xbf16, #tpu.memory_space<vmem>>, vector<64x128xbf16>
    %c0_7 = arith.constant 0 : index
    %c0_8 = arith.constant 0 : index
    %6 = vector.load %arg2[%c0_7, %c0_8] : memref<128x512xbf16, #tpu.memory_space<vmem>>, vector<128x512xbf16>
    %cst = arith.constant dense<0.000000e+00> : vector<64x512xf32>
    %7 = tpu.matmul %5, %6, %cst {dimension_numbers = #tpu.dot_dimension_numbers<[1], [0], [0], [1], [0, 0, 1, 1], [], []>} : vector<64x128xbf16>, vector<128x512xbf16>, vector<64x512xf32> -> vector<64x512xf32>
    %8 = vector.broadcast %0 : vector<1x512xf32> to vector<64x512xf32>
    %9 = arith.addf %7, %8 : vector<64x512xf32>
    %cst_9 = arith.constant 0.000000e+00 : f32
    %10 = vector.broadcast %cst_9 : f32 to vector<64x512xf32>
    %11 = arith.cmpf oge, %9, %10 : vector<64x512xf32>
    %cst_10 = arith.constant 2.000000e-02 : f32
    %12 = vector.broadcast %cst_10 : f32 to vector<64x512xf32>
    %13 = arith.mulf %12, %9 : vector<64x512xf32>
    %14 = arith.select %11, %9, %13 : vector<64x512xi1>, vector<64x512xf32>
    %15 = arith.truncf %14 : vector<64x512xf32> to vector<64x512xbf16>
    %c0_11 = arith.constant 0 : index
    %c0_12 = arith.constant 0 : index
    %16 = vector.load %arg3[%c0_11, %c0_12] : memref<512x640xbf16, #tpu.memory_space<vmem>>, vector<512x640xbf16>
    %cst_13 = arith.constant dense<0.000000e+00> : vector<64x640xf32>
    %17 = tpu.matmul %15, %16, %cst_13 {dimension_numbers = #tpu.dot_dimension_numbers<[1], [0], [0], [1], [0, 0, 1, 1], [], []>} : vector<64x512xbf16>, vector<512x640xbf16>, vector<64x640xf32> -> vector<64x640xf32>
    %18 = vector.broadcast %1 : vector<1x640xf32> to vector<64x640xf32>
    %19 = arith.addf %17, %18 : vector<64x640xf32>
    %cst_14 = arith.constant 0.000000e+00 : f32
    %20 = vector.broadcast %cst_14 : f32 to vector<64x640xf32>
    %21 = arith.cmpf oge, %19, %20 : vector<64x640xf32>
    %cst_15 = arith.constant 2.000000e-02 : f32
    %22 = vector.broadcast %cst_15 : f32 to vector<64x640xf32>
    %23 = arith.mulf %22, %19 : vector<64x640xf32>
    %24 = arith.select %21, %19, %23 : vector<64x640xi1>, vector<64x640xf32>
    %25 = arith.truncf %24 : vector<64x640xf32> to vector<64x640xbf16>
    %c0_16 = arith.constant 0 : index
    %c0_17 = arith.constant 0 : index
    %26 = vector.load %arg4[%c0_16, %c0_17] : memref<640x512xbf16, #tpu.memory_space<vmem>>, vector<640x512xbf16>
    %cst_18 = arith.constant dense<0.000000e+00> : vector<64x512xf32>
    %27 = tpu.matmul %25, %26, %cst_18 {dimension_numbers = #tpu.dot_dimension_numbers<[1], [0], [0], [1], [0, 0, 1, 1], [], []>} : vector<64x640xbf16>, vector<640x512xbf16>, vector<64x512xf32> -> vector<64x512xf32>
    %28 = vector.broadcast %2 : vector<1x512xf32> to vector<64x512xf32>
    %29 = arith.addf %27, %28 : vector<64x512xf32>
    %cst_19 = arith.constant 0.000000e+00 : f32
    %30 = vector.broadcast %cst_19 : f32 to vector<64x512xf32>
    %31 = arith.cmpf oge, %29, %30 : vector<64x512xf32>
    %cst_20 = arith.constant 2.000000e-02 : f32
    %32 = vector.broadcast %cst_20 : f32 to vector<64x512xf32>
    %33 = arith.mulf %32, %29 : vector<64x512xf32>
    %34 = arith.select %31, %29, %33 : vector<64x512xi1>, vector<64x512xf32>
    %35 = arith.truncf %34 : vector<64x512xf32> to vector<64x512xbf16>
    %c0_21 = arith.constant 0 : index
    %c0_22 = arith.constant 0 : index
    %36 = vector.load %arg5[%c0_21, %c0_22] : memref<512x128xbf16, #tpu.memory_space<vmem>>, vector<512x128xbf16>
    %cst_23 = arith.constant dense<0.000000e+00> : vector<64x128xf32>
    %37 = tpu.matmul %35, %36, %cst_23 {dimension_numbers = #tpu.dot_dimension_numbers<[1], [0], [0], [1], [0, 0, 1, 1], [], []>} : vector<64x512xbf16>, vector<512x128xbf16>, vector<64x128xf32> -> vector<64x128xf32>
    %38 = vector.broadcast %3 : vector<1x128xf32> to vector<64x128xf32>
    %39 = arith.addf %37, %38 : vector<64x128xf32>
    %cst_24 = arith.constant 0.000000e+00 : f32
    %40 = vector.broadcast %cst_24 : f32 to vector<64x128xf32>
    %41 = arith.cmpf oge, %39, %40 : vector<64x128xf32>
    %cst_25 = arith.constant 2.000000e-02 : f32
    %42 = vector.broadcast %cst_25 : f32 to vector<64x128xf32>
    %43 = arith.mulf %42, %39 : vector<64x128xf32>
    %44 = arith.select %41, %39, %43 : vector<64x128xi1>, vector<64x128xf32>
    %cst_26 = arith.constant dense<0.000000e+00> : vector<64xf32>
    %45 = vector.multi_reduction <add>, %44, %cst_26 [1] : vector<64x128xf32> to vector<64xf32>
    %46 = vector.shape_cast %45 : vector<64xf32> to vector<64x1xf32>
    %cst_27 = arith.constant 2.500000e-02 : f32
    %47 = vector.broadcast %cst_27 : f32 to vector<64x1xf32>
    %48 = arith.mulf %46, %47 : vector<64x1xf32>
    %49 = arith.mulf %44, %44 : vector<64x128xf32>
    %cst_28 = arith.constant dense<0.000000e+00> : vector<64xf32>
    %50 = vector.multi_reduction <add>, %49, %cst_28 [1] : vector<64x128xf32> to vector<64xf32>
    %51 = vector.shape_cast %50 : vector<64xf32> to vector<64x1xf32>
    %cst_29 = arith.constant 2.500000e-02 : f32
    %52 = vector.broadcast %cst_29 : f32 to vector<64x1xf32>
    %53 = arith.mulf %51, %52 : vector<64x1xf32>
    %54 = arith.mulf %48, %48 : vector<64x1xf32>
    %55 = arith.subf %53, %54 : vector<64x1xf32>
    %56 = vector.broadcast %48 : vector<64x1xf32> to vector<64x128xf32>
    %57 = arith.subf %44, %56 : vector<64x128xf32>
    %cst_30 = arith.constant 9.99999974E-6 : f32
    %58 = vector.broadcast %cst_30 : f32 to vector<64x1xf32>
    %59 = arith.addf %55, %58 : vector<64x1xf32>
    %60 = math.rsqrt %59 : vector<64x1xf32>
    %61 = vector.broadcast %60 : vector<64x1xf32> to vector<64x128xf32>
    %62 = arith.mulf %57, %61 : vector<64x128xf32>
    %63 = arith.truncf %62 : vector<64x128xf32> to vector<64x128xbf16>
    %c0_31 = arith.constant 0 : index
    %c0_32 = arith.constant 0 : index
    %64 = vector.load %arg6[%c0_31, %c0_32] : memref<128x128xbf16, #tpu.memory_space<vmem>>, vector<128x128xbf16>
    %cst_33 = arith.constant dense<0.000000e+00> : vector<64x128xf32>
    %65 = tpu.matmul %63, %64, %cst_33 {dimension_numbers = #tpu.dot_dimension_numbers<[1], [0], [0], [1], [0, 0, 1, 1], [], []>} : vector<64x128xbf16>, vector<128x128xbf16>, vector<64x128xf32> -> vector<64x128xf32>
    %66 = vector.broadcast %4 : vector<1x128xf32> to vector<64x128xf32>
    %67 = arith.addf %65, %66 : vector<64x128xf32>
    %cst_34 = arith.constant 0.000000e+00 : f32
    %68 = vector.broadcast %cst_34 : f32 to vector<64x128xf32>
    %69 = arith.cmpf oge, %67, %68 : vector<64x128xf32>
    %cst_35 = arith.constant 2.000000e+00 : f32
    %70 = vector.broadcast %cst_35 : f32 to vector<64x128xf32>
    %71 = arith.mulf %70, %67 : vector<64x128xf32>
    %72 = arith.select %69, %67, %71 : vector<64x128xi1>, vector<64x128xf32>
    %c0_36 = arith.constant 0 : index
    %c0_37 = arith.constant 0 : index
    %73 = vector.load %arg8[%c0_36, %c0_37] : memref<64x128xf32, #tpu.memory_space<vmem>>, vector<64x128xf32>
    tpu.vector_store %arg8[%c0_36, %c0_37], %72 {strides = array<i32>} : memref<64x128xf32, #tpu.memory_space<vmem>>, vector<64x128xf32>,
    return
  }
  func.func @transform_0(%arg0: i32) -> (i32, i32) {
    %c0_i32 = arith.constant 0 : i32
    %c0_i32_0 = arith.constant 0 : i32
    return %arg0, %c0_i32 : i32, i32
  }
  func.func @transform_1(%arg0: i32) -> (i32, i32) {
    %c0_i32 = arith.constant 0 : i32
    %c0_i32_0 = arith.constant 0 : i32
    %c0_i32_1 = arith.constant 0 : i32
    return %c0_i32, %c0_i32_0 : i32, i32
  }
  func.func @transform_2(%arg0: i32) -> (i32, i32) {
    %c0_i32 = arith.constant 0 : i32
    %c0_i32_0 = arith.constant 0 : i32
    %c0_i32_1 = arith.constant 0 : i32
    return %c0_i32, %c0_i32_0 : i32, i32
  }
  func.func @transform_3(%arg0: i32) -> (i32, i32) {
    %c0_i32 = arith.constant 0 : i32
    %c0_i32_0 = arith.constant 0 : i32
    %c0_i32_1 = arith.constant 0 : i32
    return %c0_i32, %c0_i32_0 : i32, i32
  }
  func.func @transform_4(%arg0: i32) -> (i32, i32) {
    %c0_i32 = arith.constant 0 : i32
    %c0_i32_0 = arith.constant 0 : i32
    %c0_i32_1 = arith.constant 0 : i32
    return %c0_i32, %c0_i32_0 : i32, i32
  }
  func.func @transform_5(%arg0: i32) -> (i32, i32) {
    %c0_i32 = arith.constant 0 : i32
    %c0_i32_0 = arith.constant 0 : i32
    %c0_i32_1 = arith.constant 0 : i32
    return %c0_i32, %c0_i32_0 : i32, i32
  }
  func.func @transform_6(%arg0: i32) -> (i32, i32) {
    %c0_i32 = arith.constant 0 : i32
    %c0_i32_0 = arith.constant 0 : i32
    %c0_i32_1 = arith.constant 0 : i32
    return %c0_i32, %c0_i32_0 : i32, i32
  }
  func.func @transform_7(%arg0: i32) -> (i32, i32) {
    %c0_i32 = arith.constant 0 : i32
    %c0_i32_0 = arith.constant 0 : i32
    return %arg0, %c0_i32 : i32, i32
  }
}

</mosaic_0001>

<bundles_post_ra>
// kernel: generator_forward.1
= control target key start
LH: loop header
LB: loop body
LE: loop exit
PB: predicated region body
PF: predicated region fallthrough
CT: control target
= control target key end

     0   :  { %12 = vsyncpa [#allocation3], 0  ;;  %s6642_s0 = inlined_call_operand.vmem [shape: bf16[64,128], index: 0, kind: input, shape index: {}]   ;;  %s6643_s1 = inlined_call_operand.hbm [shape: bf16[128,512], index: 1, kind: input, shape index: {}]   ;;  %s6644_s2 = inlined_call_operand.hbm [shape: bf16[512,640], index: 2, kind: input, shape index: {}]   ;;  %s6645_s3 = inlined_call_operand.hbm [shape: bf16[640,512], index: 3, kind: input, shape index: {}]   ;;  %s6646_s4 = inlined_call_operand.hbm [shape: bf16[512,128], index: 4, kind: input, shape index: {}]   ;;  %s6647_s5 = inlined_call_operand.vmem [shape: bf16[128,128], index: 5, kind: input, shape index: {}]   ;;  %s6648_s6 = inlined_call_operand.vmem [shape: f32[8,640], index: 6, kind: input, shape index: {}]   ;;  %s6649_s7 = inlined_call_operand.vmem [shape: f32[64,128], index: 7, kind: output, shape index: {}]  }
   0x1   :  { %13 = vsyncpa [#allocation5], 0 }
   0x2   :  { %14 = vsyncpa [#allocation8], 0  ;;  %s5871_s24 = smov [#allocation4]   ;;  %s5777_s28 = scalar_lea.hbm %s6644_s2, 20480 }
   0x3   :  { %s34_s25 = sshll.u32 %s5871_s24, 4  ;;  %p5778_p0 = scmp.ne.s32.totalorder %s6644_s2, %s5777_s28  ;;  %s35_s25 = int_to_ptr.vmem [resolvable:$true] %s34_s25 }
   0x4   :  { %p5781_p1 = scmp.lt.u32.totalorder %s5777_s28, %s6644_s2 }
   0x6   :  { %p5783_p2 = pnand %p5781_p1, %p5778_p0 }
   0x8   :  { %5786 = shalt.err (!%p5783_p2)
}
   0x9   :  { %s5787_s10 = scalar_lea.vmem %s35_s25, 20480  ;;  %p5792_p4 = scmp.lt.s32.totalorder %s35_s25, %s35_s25 }
   0xa   :  { %p5788_p3 = scmp.ne.s32.totalorder %s35_s25, %s5787_s10  ;;  %p5793_p5 = scmp.lt.s32.totalorder %s5787_s10, %s5787_s10 }
   0xc   :  { %p5794_p6 = por %p5793_p5, %p5792_p4 }
   0xe   :  { %p5795_p7 = pnand %p5794_p6, %p5788_p3 }
  0x10   :  { %5798 = shalt.err (!%p5795_p7)
}
  0x11   :  { %s5872_s11 = smov 320   ;;  %s5873_s12 = smov 20  }
  0x12   :  { %40 = dma.hbm_to_vmem [thread:$0]  %s6644_s2, 20480, %s35_s25, [#allocation5], %s5872_s11, %s5872_s11, %s5873_s12  }
  0x13   :  { %s5874_s15 = smov [#allocation2]   ;;  %s5799_s19 = scalar_lea.hbm %s6643_s1, 4096 }
  0x14   :  { %s22_s16 = sshll.u32 %s5874_s15, 4  ;;  %p5800_p8 = scmp.ne.s32.totalorder %s6643_s1, %s5799_s19  ;;  %s23_s16 = int_to_ptr.vmem [resolvable:$true] %s22_s16 }
  0x15   :  { %p5803_p9 = scmp.lt.u32.totalorder %s5799_s19, %s6643_s1 }
  0x17   :  { %p5805_p10 = pnand %p5803_p9, %p5800_p8 }
  0x19   :  { %5808 = shalt.err (!%p5805_p10)
}
  0x1a   :  { %s5809_s24 = scalar_lea.vmem %s23_s16, 4096  ;;  %p5814_p12 = scmp.lt.s32.totalorder %s23_s16, %s23_s16 }
  0x1b   :  { %p5810_p11 = scmp.ne.s32.totalorder %s23_s16, %s5809_s24  ;;  %p5815_p13 = scmp.lt.s32.totalorder %s5809_s24, %s5809_s24 }
  0x1d   :  { %p5816_p0 = por %p5815_p13, %p5814_p12 }
  0x1f   :  { %p5817_p1 = pnand %p5816_p0, %p5810_p11 }
  0x21   :  { %5820 = shalt.err (!%p5817_p1)
}
  0x22   :  { %s5875_s2 = smov 256   ;;  %s5876_s25 = smov 16  }
  0x23   :  { %28 = dma.hbm_to_vmem [thread:$0]  %s6643_s1, 4096, %s23_s16, [#allocation3], %s5875_s2, %s5875_s2, %s5876_s25  }
  0x24   :  { %s5877_s28 = smov [#allocation6]   ;;  %s5878_s30 = smov [#allocation7]  }
  0x25   :  { %s46_s29 = sshll.u32 %s5877_s28, 4  ;;  %s58_s8 = sshll.u32 %s5878_s30, 4  ;;  %s47_s29 = int_to_ptr.vmem [resolvable:$true] %s46_s29  ;;  %s5946_s8 = int_to_ptr.vmem [resolvable:$true] %s58_s8 }
  0x26   :  { %s5821_s11 = scalar_lea.hbm %s6645_s3, 20480 }
  0x27   :  { %p5822_p2 = scmp.ne.s32.totalorder %s6645_s3, %s5821_s11  ;;  %p5825_p3 = scmp.lt.u32.totalorder %s5821_s11, %s6645_s3 }
  0x29   :  { %p5827_p4 = pnand %p5825_p3, %p5822_p2 }
  0x2b   :  { %5830 = shalt.err (!%p5827_p4)
}
  0x2c   :  { %s5831_s1 = scalar_lea.vmem %s47_s29, 20480  ;;  %p5836_p6 = scmp.lt.s32.totalorder %s47_s29, %s47_s29 }
  0x2d   :  { %p5832_p5 = scmp.ne.s32.totalorder %s47_s29, %s5831_s1  ;;  %p5837_p7 = scmp.lt.s32.totalorder %s5831_s1, %s5831_s1 }
  0x2f   :  { %p5838_p8 = por %p5837_p7, %p5836_p6 }
  0x31   :  { %p5839_p9 = pnand %p5838_p8, %p5832_p5 }
  0x33   :  { %5842 = shalt.err (!%p5839_p9)
}
  0x34   :  { %52 = dma.hbm_to_vmem [thread:$0]  %s6645_s3, 20480, %s47_s29, [#allocation5], %s5875_s2, %s5875_s2, %s5876_s25  }
  0x35   :  { %s5843_s20 = scalar_lea.hbm %s6646_s4, 4096 }
  0x36   :  { %p5844_p10 = scmp.ne.s32.totalorder %s6646_s4, %s5843_s20  ;;  %p5847_p11 = scmp.lt.u32.totalorder %s5843_s20, %s6646_s4 }
  0x38   :  { %p5849_p12 = pnand %p5847_p11, %p5844_p10 }
  0x3a   :  { %5852 = shalt.err (!%p5849_p12)
}
  0x3b   :  { %s5853_s26 = scalar_lea.vmem %s5946_s8, 4096  ;;  %p5858_p0 = scmp.lt.s32.totalorder %s5946_s8, %s5946_s8 }
  0x3c   :  { %p5854_p13 = scmp.ne.s32.totalorder %s5946_s8, %s5853_s26  ;;  %p5859_p1 = scmp.lt.s32.totalorder %s5853_s26, %s5853_s26 }
  0x3e   :  { %p5860_p2 = por %p5859_p1, %p5858_p0 }
  0x40   :  { %p5861_p3 = pnand %p5860_p2, %p5854_p13 }
  0x42   :  { %5864 = shalt.err (!%p5861_p3)
}
  0x43   :  { %s5879_s3 = smov 64   ;;  %s5880_s2 = smov 4  }
  0x44   :  { %64 = dma.hbm_to_vmem [thread:$0]  %s6646_s4, 4096, %s5946_s8, [#allocation8], %s5879_s3, %s5879_s3, %s5880_s2  }
  0x45   :  { %5865 = dma.done.wait [#allocation3], 4096  }
  0x46   :  { %5866 = vsyncadd [#allocation3], 4294963200 }
  0x47   :  { %5867 = dma.done.wait [#allocation5], 40960  }
  0x48   :  { %5868 = vsyncadd [#allocation5], 4294926336 }
  0x49   :  { %5869 = dma.done.wait [#allocation8], 4096  }
  0x4a   :  { %5870 = vsyncadd [#allocation8], 4294963200  ;;  %v5881_v0 = vmov 0   ;;  %v5205_v1 = vld [vmem:[#allocation2 + $0x4] ss:$16 sps:$4 sm:$0xff]   ;;  %v5236_v38 = vld [vmem:[%s6642_s0 + $0x8] sm:$0xff]  }
  0x4b   :  { %368 = vmatprep.mubr.bf16.mxu0 %v5881_v0  ;;  %441 = vmatprep.mubr.bf16.mxu1 %v5881_v0  ;;  %v5207_v2 = vld [vmem:[#allocation2] ss:$16 sps:$4 sm:$0xff]   ;;  %v5208_v3 = vld [vmem:[#allocation2 + $0x24] ss:$16 sps:$4 sm:$0xff]   ;;  %v5230_v10 = vld [vmem:[#allocation2 + $0xc] ss:$16 sps:$4 sm:$0xff]  }
  0x4c   :  { %336 = vmatprep.subr.bf16.mxu0 %v5205_v1  ;;  %v5210_v4 = vld [vmem:[#allocation2 + $0x20] ss:$16 sps:$4 sm:$0xff]   ;;  %v5211_v5 = vld [vmem:[#allocation2 + $0x44] ss:$16 sps:$4 sm:$0xff]   ;;  %v5232_v11 = vld [vmem:[#allocation2 + $0x8] ss:$16 sps:$4 sm:$0xff]   ;;  %409 = vmatprep.subr.bf16.mxu1 %v5230_v10 }
  0x4d   :  { %337 = vmatpush1.bf16.msra.mxu0 %v5207_v2  ;;  %v5213_v6 = vld [vmem:[#allocation2 + $0x40] ss:$16 sps:$4 sm:$0xff]   ;;  %v5214_v7 = vld [vmem:[#allocation2 + $0x64] ss:$16 sps:$4 sm:$0xff]   ;;  %v5233_v12 = vld [vmem:[#allocation2 + $0x2c] ss:$16 sps:$4 sm:$0xff]   ;;  %410 = vmatpush1.bf16.msra.mxu1 %v5232_v11 }
  0x4e   :  { %338 = vmatprep.subr.bf16.mxu0 %v5208_v3  ;;  %v5216_v8 = vld [vmem:[#allocation2 + $0x60] ss:$16 sps:$4 sm:$0xff]   ;;  %v5217_v9 = vld [vmem:[#allocation2 + $0x84] ss:$16 sps:$4 sm:$0xff]   ;;  %v5235_v14 = vld [vmem:[#allocation2 + $0x28] ss:$16 sps:$4 sm:$0xff]   ;;  %411 = vmatprep.subr.bf16.mxu1 %v5233_v12 }
  0x4f   :  { %v5219_v13 = vld [vmem:[#allocation2 + $0x80] ss:$16 sps:$4 sm:$0xff]   ;;  %v5220_v15 = vld [vmem:[#allocation2 + $0xa4] ss:$16 sps:$4 sm:$0xff]   ;;  %v5237_v16 = vld [vmem:[#allocation2 + $0x4c] ss:$16 sps:$4 sm:$0xff]  }
  0x50   :  { %v5222_v17 = vld [vmem:[#allocation2 + $0xa0] ss:$16 sps:$4 sm:$0xff]   ;;  %v5223_v18 = vld [vmem:[#allocation2 + $0xc4] ss:$16 sps:$4 sm:$0xff]   ;;  %v5239_v19 = vld [vmem:[#allocation2 + $0x48] ss:$16 sps:$4 sm:$0xff]  }
  0x51   :  { %339 = vmatpush1.bf16.msra.mxu0 %v5210_v4  ;;  %412 = vmatpush1.bf16.msra.mxu1 %v5235_v14  ;;  %v5240_v20 = vld [vmem:[#allocation2 + $0x6c] ss:$16 sps:$4 sm:$0xff]   ;;  %v5225_v21 = vld [vmem:[#allocation2 + $0xc0] ss:$16 sps:$4 sm:$0xff]   ;;  %v5226_v22 = vld [vmem:[#allocation2 + $0xe4] ss:$16 sps:$4 sm:$0xff]  }
  0x52   :  { %340 = vmatprep.subr.bf16.mxu0 %v5211_v5  ;;  %413 = vmatprep.subr.bf16.mxu1 %v5237_v16  ;;  %v5242_v23 = vld [vmem:[#allocation2 + $0x68] ss:$16 sps:$4 sm:$0xff]   ;;  %v5244_v24 = vld [vmem:[#allocation2 + $0x8c] ss:$16 sps:$4 sm:$0xff]   ;;  %v5228_v25 = vld [vmem:[#allocation2 + $0xe0] ss:$16 sps:$4 sm:$0xff]  }
  0x53   :  { %v5246_v26 = vld [vmem:[#allocation2 + $0x88] ss:$16 sps:$4 sm:$0xff]   ;;  %v5247_v27 = vld [vmem:[#allocation2 + $0xac] ss:$16 sps:$4 sm:$0xff]   ;;  %v5229_v29 = vld [vmem:[%s6642_s0] sm:$0xff]  }
  0x54   :  { %v5259_v28 = vld [vmem:[#allocation4 + $0x4] ss:$20 sps:$4 sm:$0xff]   ;;  %v5251_v31 = vld [vmem:[#allocation2 + $0xcc] ss:$16 sps:$4 sm:$0xff]   ;;  %v5257_v32 = vld [vmem:[#allocation4] ss:$20 sps:$4 sm:$0xff]  }
  0x55   :  { %341 = vmatpush1.bf16.msra.mxu0 %v5213_v6  ;;  %414 = vmatpush1.bf16.msra.mxu1 %v5239_v19  ;;  %v5249_v30 = vld [vmem:[#allocation2 + $0xa8] ss:$16 sps:$4 sm:$0xff]   ;;  %v5265_v33 = vld [vmem:[#allocation4 + $0x2c] ss:$20 sps:$4 sm:$0xff]   ;;  %v5269_v41 = vld [vmem:[#allocation4 + $0x50] ss:$20 sps:$4 sm:$0xff]  }
  0x56   :  { %342 = vmatprep.subr.bf16.mxu0 %v5214_v7  ;;  %415 = vmatprep.subr.bf16.mxu1 %v5240_v20  ;;  %v5253_v34 = vld [vmem:[#allocation2 + $0xc8] ss:$16 sps:$4 sm:$0xff]   ;;  %v5254_v35 = vld [vmem:[#allocation2 + $0xec] ss:$16 sps:$4 sm:$0xff]   ;;  %v5243_v47 = vld [vmem:[%s6642_s0 + $0x10] sm:$0xff]  }
  0x57   :  { %v5263_v36 = vld [vmem:[#allocation4 + $0x28] ss:$20 sps:$4 sm:$0xff]   ;;  %v5262_v40 = vld [vmem:[#allocation4 + $0xc] ss:$20 sps:$4 sm:$0xff]   ;;  %v5283_v46 = vld [vmem:[#allocation4 + $0xa4] ss:$20 sps:$4 sm:$0xff]  }
  0x58   :  { %v5271_v37 = vld [vmem:[#allocation4 + $0x54] ss:$20 sps:$4 sm:$0xff]   ;;  %v5277_v42 = vld [vmem:[#allocation4 + $0x7c] ss:$20 sps:$4 sm:$0xff]   ;;  %v5275_v45 = vld [vmem:[#allocation4 + $0x78] ss:$20 sps:$4 sm:$0xff]  }
  0x59   :  { %343 = vmatpush1.bf16.msra.mxu0 %v5216_v8  ;;  %416 = vmatpush1.bf16.msra.mxu1 %v5242_v23  ;;  %v5256_v39 = vld [vmem:[#allocation2 + $0xe8] ss:$16 sps:$4 sm:$0xff]   ;;  %v5266_v48 = vld [vmem:[#allocation4 + $0x30] ss:$20 sps:$4 sm:$0xff]   ;;  %v5281_v50 = vld [vmem:[#allocation4 + $0xa0] ss:$20 sps:$4 sm:$0xff]  }
  0x5a   :  { %344 = vmatprep.subr.bf16.mxu0 %v5217_v9  ;;  %417 = vmatprep.subr.bf16.mxu1 %v5244_v24  ;;  %v5260_v43 = vld [vmem:[#allocation4 + $0x8] ss:$20 sps:$4 sm:$0xff]   ;;  %v5289_v51 = vld [vmem:[#allocation4 + $0xcc] ss:$20 sps:$4 sm:$0xff]   ;;  %v5280_v53 = vld [vmem:[#allocation4 + $0x84] ss:$20 sps:$4 sm:$0xff]  }
  0x5b   :  { %v5268_v44 = vld [vmem:[#allocation4 + $0x34] ss:$20 sps:$4 sm:$0xff]   ;;  %v5274_v49 = vld [vmem:[#allocation4 + $0x5c] ss:$20 sps:$4 sm:$0xff]   ;;  %v5272_v52 = vld [vmem:[#allocation4 + $0x58] ss:$20 sps:$4 sm:$0xff]  }
  0x5c   :  { %v5287_v54 = vld [vmem:[#allocation4 + $0xc8] ss:$20 sps:$4 sm:$0xff]   ;;  %v5278_v57 = vld [vmem:[#allocation4 + $0x80] ss:$20 sps:$4 sm:$0xff]   ;;  %v5293_v59 = vld [vmem:[#allocation4 + $0xf0] ss:$20 sps:$4 sm:$0xff]  }
  0x5d   :  { %345 = vmatpush1.bf16.msra.mxu0 %v5219_v13  ;;  %418 = vmatpush1.bf16.msra.mxu1 %v5246_v26  ;;  %v5295_v55 = vld [vmem:[#allocation4 + $0xf4] ss:$20 sps:$4 sm:$0xff]   ;;  %v5250_v56 = vld [vmem:[%s6642_s0 + $0x18] sm:$0xff]   ;;  %v5286_v58 = vld [vmem:[#allocation4 + $0xac] ss:$20 sps:$4 sm:$0xff]  }
  0x5e   :  { %346 = vmatprep.subr.bf16.mxu0 %v5220_v15  ;;  %419 = vmatprep.subr.bf16.mxu1 %v5247_v27  ;;  %v5301_v60 = vld [vmem:[#allocation4 + $0x11c] ss:$20 sps:$4 sm:$0xff]   ;;  %v5292_v62 = vld [vmem:[#allocation4 + $0xd4] ss:$20 sps:$4 sm:$0xff]   ;;  %v5299_v63 = vld [vmem:[#allocation4 + $0x118] ss:$20 sps:$4 sm:$0xff]  }
  0x5f   :  { %v5284_v61 = vld [vmem:[#allocation4 + $0xa8] ss:$20 sps:$4 sm:$0xff]   ;;  %v5290_v1 = vld [vmem:[#allocation4 + $0xd0] ss:$20 sps:$4 sm:$0xff]   ;;  %v5305_v4 = vld [vmem:[#allocation4 + $0x140] ss:$20 sps:$4 sm:$0xff]  }
  0x60   :  { %v5307_v2 = vld [vmem:[#allocation4 + $0x144] ss:$20 sps:$4 sm:$0xff]   ;;  %v5298_v3 = vld [vmem:[#allocation4 + $0xfc] ss:$20 sps:$4 sm:$0xff]   ;;  %v5313_v5 = vld [vmem:[#allocation4 + $0x16c] ss:$20 sps:$4 sm:$0xff]  }
  0x61   :  { %347 = vmatpush1.bf16.msra.mxu0 %v5222_v17  ;;  %420 = vmatpush1.bf16.msra.mxu1 %v5249_v30  ;;  %v5296_v6 = vld [vmem:[#allocation4 + $0xf8] ss:$20 sps:$4 sm:$0xff]   ;;  %v5311_v8 = vld [vmem:[#allocation4 + $0x168] ss:$20 sps:$4 sm:$0xff]   ;;  %v5302_v10 = vld [vmem:[#allocation4 + $0x120] ss:$20 sps:$4 sm:$0xff]  }
  0x62   :  { %348 = vmatprep.subr.bf16.mxu0 %v5223_v18  ;;  %421 = vmatprep.subr.bf16.mxu1 %v5251_v31  ;;  %v5304_v7 = vld [vmem:[#allocation4 + $0x124] ss:$20 sps:$4 sm:$0xff]   ;;  %v5319_v9 = vld [vmem:[#allocation4 + $0x194] ss:$20 sps:$4 sm:$0xff]   ;;  %v5310_v11 = vld [vmem:[#allocation4 + $0x14c] ss:$20 sps:$4 sm:$0xff]  }
  0x63   :  { %v5317_v12 = vld [vmem:[#allocation4 + $0x190] ss:$20 sps:$4 sm:$0xff]   ;;  %v5308_v14 = vld [vmem:[#allocation4 + $0x148] ss:$20 sps:$4 sm:$0xff]   ;;  %v5323_v16 = vld [vmem:[#allocation4 + $0x1b8] ss:$20 sps:$4 sm:$0xff]  }
  0x64   :  { %v5325_v13 = vld [vmem:[#allocation4 + $0x1bc] ss:$20 sps:$4 sm:$0xff]   ;;  %v5316_v15 = vld [vmem:[#allocation4 + $0x174] ss:$20 sps:$4 sm:$0xff]   ;;  %v5331_v17 = vld [vmem:[#allocation4 + $0x1e4] ss:$20 sps:$4 sm:$0xff]  }
  0x65   :  { %349 = vmatpush1.bf16.msra.mxu0 %v5225_v21  ;;  %422 = vmatpush1.bf16.msra.mxu1 %v5253_v34  ;;  %v5314_v18 = vld [vmem:[#allocation4 + $0x170] ss:$20 sps:$4 sm:$0xff]   ;;  %v5329_v20 = vld [vmem:[#allocation4 + $0x1e0] ss:$20 sps:$4 sm:$0xff]   ;;  %v5335_v24 = vld [vmem:[#allocation4 + $0x208] ss:$20 sps:$4 sm:$0xff]  }
  0x66   :  { %350 = vmatprep.subr.bf16.mxu0 %v5226_v22  ;;  %423 = vmatprep.subr.bf16.mxu1 %v5254_v35  ;;  %v5322_v19 = vld [vmem:[#allocation4 + $0x19c] ss:$20 sps:$4 sm:$0xff]   ;;  %v5337_v21 = vld [vmem:[#allocation4 + $0x20c] ss:$20 sps:$4 sm:$0xff]   ;;  %v5328_v23 = vld [vmem:[#allocation4 + $0x1c4] ss:$20 sps:$4 sm:$0xff]  }
  0x67   :  { %v5320_v22 = vld [vmem:[#allocation4 + $0x198] ss:$20 sps:$4 sm:$0xff]   ;;  %v5332_v27 = vld [vmem:[#allocation4 + $0x1e8] ss:$20 sps:$4 sm:$0xff]  }
  0x68   :  { %v5334_v26 = vld [vmem:[#allocation4 + $0x1ec] ss:$20 sps:$4 sm:$0xff]   ;;  %v5343_v30 = vld [vmem:[#allocation4 + $0x234] ss:$20 sps:$4 sm:$0xff]   ;;  %v5346_v31 = vld [vmem:[#allocation4 + $0x23c] ss:$20 sps:$4 sm:$0xff]  }
  0x69   :  { %351 = vmatpush1.bf16.msra.mxu0 %v5228_v25  ;;  %424 = vmatpush1.bf16.msra.mxu1 %v5256_v39  ;;  %v5326_v25 = vld [vmem:[#allocation4 + $0x1c0] ss:$20 sps:$4 sm:$0xff]   ;;  %v5349_v34 = vld [vmem:[#allocation4 + $0x25c] ss:$20 sps:$4 sm:$0xff]   ;;  %v5352_v35 = vld [vmem:[#allocation4 + $0x264] ss:$20 sps:$4 sm:$0xff]  }
  0x6a   :  { %1644 = vmatprep.subr.bf16.mxu0 %v5259_v28  ;;  %1790 = vmatprep.subr.bf16.mxu1 %v5262_v40  ;;  %v5340_v28 = vld [vmem:[#allocation4 + $0x214] ss:$20 sps:$4 sm:$0xff]   ;;  %v5358_v39 = vld [vmem:[#allocation4 + $0x28c] ss:$20 sps:$4 sm:$0xff]   ;;  %v132_v40 = vlaneseq }
  0x6c   :  { %369 = vmatmul.mubr.bf16.vlgmr.msra.gmra.mrb[0].mxu0 %v5229_v29  ;;  %442 = vmatmul.mubr.bf16.vlgmr.msra.gmra.mrb[0].mxu1 %v5229_v29  ;;  %v5338_v29 = vld [vmem:[#allocation4 + $0x210] ss:$20 sps:$4 sm:$0xff]  }
  0x6d   :  { %378 = vmatprep.mubr.bf16.mxu0 %v5881_v0  ;;  %1645 = vmatpush1.bf16.msra.mxu0 %v5257_v32  ;;  %v5341_v32 = vld [vmem:[#allocation4 + $0x230] ss:$20 sps:$4 sm:$0xff]  }
  0x6e   :  { %1646 = vmatprep.subr.bf16.mxu0 %v5265_v33  ;;  %451 = vmatprep.mubr.bf16.mxu1 %v5881_v0  ;;  %v5344_v33 = vld [vmem:[#allocation4 + $0x238] ss:$20 sps:$4 sm:$0xff]  }
  0x6f   :  { %1791 = vmatpush1.bf16.msra.mxu1 %v5260_v43  ;;  %v82_v43 = vld [vmem:[%s6648_s6] ss:$8 sm:$0xf] }
  0x70   :  { %1792 = vmatprep.subr.bf16.mxu1 %v5268_v44 }
  0x71   :  { %1647 = vmatpush1.bf16.msra.mxu0 %v5263_v36  ;;  %v5347_v36 = vld [vmem:[#allocation4 + $0x258] ss:$20 sps:$4 sm:$0xff]  }
  0x72   :  { %1648 = vmatprep.subr.bf16.mxu0 %v5271_v37  ;;  %v5350_v37 = vld [vmem:[#allocation4 + $0x260] ss:$20 sps:$4 sm:$0xff]  }
  0x73   :  { %1793 = vmatpush1.bf16.msra.mxu1 %v5266_v48 }
  0x74   :  { %379 = vmatmul.mubr.bf16.gmra.mrb[4].mxu0 %v5236_v38  ;;  %1794 = vmatprep.subr.bf16.mxu1 %v5274_v49 }
  0x75   :  { %388 = vmatprep.mubr.bf16.mxu0 %v5881_v0  ;;  %1649 = vmatpush1.bf16.msra.mxu0 %v5269_v41  ;;  %v5997_v41 = vshrl.u32 %v132_v40, 7 }
  0x76   :  { %1650 = vmatprep.subr.bf16.mxu0 %v5277_v42  ;;  %452 = vmatmul.mubr.bf16.gmra.mrb[4].mxu1 %v5236_v38  ;;  %v5355_v38 = vld [vmem:[#allocation4 + $0x284] ss:$20 sps:$4 sm:$0xff]  }
  0x77   :  { %461 = vmatprep.mubr.bf16.mxu1 %v5881_v0  ;;  %1795 = vmatpush1.bf16.msra.mxu1 %v5272_v52  ;;  %v6000_v42 = vsub.s32 0, %v5997_v41  ;;  %v6006_v44 = vsub.s32 1, %v5997_v41 }
  0x78   :  { %1796 = vmatprep.subr.bf16.mxu1 %v5280_v53 }
  0x79   :  { %1651 = vmatpush1.bf16.msra.mxu0 %v5275_v45  ;;  %v6009_v45 = vrot.slane %v82_v43, %v6000_v42 }
  0x7a   :  { %1652 = vmatprep.subr.bf16.mxu0 %v5283_v46  ;;  %v6012_v46 = vrot.slane %v82_v43, %v6006_v44 }
  0x7b   :  { %1797 = vmatpush1.bf16.msra.mxu1 %v5278_v57 }
  0x7c   :  { %389 = vmatmul.mubr.bf16.gmra.mrb[8].mxu0 %v5243_v47  ;;  %1798 = vmatprep.subr.bf16.mxu1 %v5286_v58  ;;  %v6019_v58 = vsub.s32 2, %v5997_v41 }
  0x7d   :  { %398 = vmatprep.mubr.bf16.mxu0 %v5881_v0  ;;  %1653 = vmatpush1.bf16.msra.mxu0 %v5281_v50 }
  0x7e   :  { %1654 = vmatprep.subr.bf16.mxu0 %v5289_v51  ;;  %462 = vmatmul.mubr.bf16.gmra.mrb[8].mxu1 %v5243_v47 }
  0x7f   :  { %471 = vmatprep.mubr.bf16.mxu1 %v5881_v0  ;;  %1799 = vmatpush1.bf16.msra.mxu1 %v5284_v61 }
  0x80   :  { %1800 = vmatprep.subr.bf16.mxu1 %v5292_v62 }
  0x81   :  { %1655 = vmatpush1.bf16.msra.mxu0 %v5287_v54 }
  0x82   :  { %1656 = vmatprep.subr.bf16.mxu0 %v5295_v55 }
  0x83   :  { %1801 = vmatpush1.bf16.msra.mxu1 %v5290_v1 }
  0x84   :  { %399 = vmatmul.mubr.bf16.gmra.mrb[12].mxu0 %v5250_v56  ;;  %1802 = vmatprep.subr.bf16.mxu1 %v5298_v3 }
  0x85   :  { %1657 = vmatpush1.bf16.msra.mxu0 %v5293_v59 }
  0x86   :  { %1658 = vmatprep.subr.bf16.mxu0 %v5301_v60  ;;  %472 = vmatmul.mubr.bf16.gmra.mrb[12].mxu1 %v5250_v56  ;;  %v6022_v60 = vsub.s32 3, %v5997_v41 }
  0x87   :  { %1803 = vmatpush1.bf16.msra.mxu1 %v5296_v6  ;;  %v5356_v6 = vld [vmem:[#allocation4 + $0x288] ss:$20 sps:$4 sm:$0xff]  }
  0x88   :  { %1804 = vmatprep.subr.bf16.mxu1 %v5304_v7 }
  0x89   :  { %1659 = vmatpush1.bf16.msra.mxu0 %v5299_v63 }
  0x8a   :  { %1660 = vmatprep.subr.bf16.mxu0 %v5307_v2 }
  0x8b   :  { %1805 = vmatpush1.bf16.msra.mxu1 %v5302_v10  ;;  %v5361_v10 = vld [vmem:[#allocation4 + $0x2ac] ss:$20 sps:$4 sm:$0xff]  }
  0x8c   :  { %1806 = vmatprep.subr.bf16.mxu1 %v5310_v11  ;;  %v5364_v11 = vld [vmem:[#allocation4 + $0x2b4] ss:$20 sps:$4 sm:$0xff]  }
  0x8d   :  { %1661 = vmatpush1.bf16.msra.mxu0 %v5305_v4 }
  0x8e   :  { %1662 = vmatprep.subr.bf16.mxu0 %v5313_v5  ;;  %v5353_v5 = vld [vmem:[#allocation4 + $0x280] ss:$20 sps:$4 sm:$0xff]  }
  0x8f   :  { %1807 = vmatpush1.bf16.msra.mxu1 %v5308_v14  ;;  %v6034_v14 = vrot.slane %v82_v43, %v6022_v60 }
  0x90   :  { %1808 = vmatprep.subr.bf16.mxu1 %v5316_v15  ;;  %v5359_v15 = vld [vmem:[#allocation4 + $0x2a8] ss:$20 sps:$4 sm:$0xff]  }
  0x91   :  { %1663 = vmatpush1.bf16.msra.mxu0 %v5311_v8 }
  0x92   :  { %1664 = vmatprep.subr.bf16.mxu0 %v5319_v9  ;;  %v6030_v9 = vrot.slane %v82_v43, %v6019_v58 }
  0x93   :  { %1809 = vmatpush1.bf16.msra.mxu1 %v5314_v18 }
  0x94   :  { %1810 = vmatprep.subr.bf16.mxu1 %v5322_v19  ;;  %v5362_v19 = vld [vmem:[#allocation4 + $0x2b0] ss:$20 sps:$4 sm:$0xff]  }
  0x95   :  { %1665 = vmatpush1.bf16.msra.mxu0 %v5317_v12 }
  0x96   :  { %1666 = vmatprep.subr.bf16.mxu0 %v5325_v13 }
  0x97   :  { %1811 = vmatpush1.bf16.msra.mxu1 %v5320_v22 }
  0x98   :  { %1812 = vmatprep.subr.bf16.mxu1 %v5328_v23  ;;  %v5367_v23 = vld [vmem:[#allocation4 + $0x2d4] ss:$20 sps:$4 sm:$0xff]  }
  0x99   :  { %1667 = vmatpush1.bf16.msra.mxu0 %v5323_v16 }
  0x9a   :  { %1668 = vmatprep.subr.bf16.mxu0 %v5331_v17 }
  0x9b   :  { %1813 = vmatpush1.bf16.msra.mxu1 %v5326_v25 }
  0x9c   :  { %1814 = vmatprep.subr.bf16.mxu1 %v5334_v26 }
  0x9d   :  { %1669 = vmatpush1.bf16.msra.mxu0 %v5329_v20 }
  0x9e   :  { %1670 = vmatprep.subr.bf16.mxu0 %v5337_v21 }
  0x9f   :  { %1815 = vmatpush1.bf16.msra.mxu1 %v5332_v27 }
  0xa0   :  { %1816 = vmatprep.subr.bf16.mxu1 %v5340_v28  ;;  %v5370_v28 = vld [vmem:[#allocation4 + $0x2dc] ss:$20 sps:$4 sm:$0xff]  }
  0xa1   :  { %1671 = vmatpush1.bf16.msra.mxu0 %v5335_v24 }
  0xa2   :  { %1672 = vmatprep.subr.bf16.mxu0 %v5343_v30 }
  0xa3   :  { %1817 = vmatpush1.bf16.msra.mxu1 %v5338_v29 }
  0xa4   :  { %1818 = vmatprep.subr.bf16.mxu1 %v5346_v31 }
  0xa5   :  { %1673 = vmatpush1.bf16.msra.mxu0 %v5341_v32 }
  0xa6   :  { %1674 = vmatprep.subr.bf16.mxu0 %v5349_v34 }
  0xa7   :  { %1819 = vmatpush1.bf16.msra.mxu1 %v5344_v33 }
  0xa8   :  { %1820 = vmatprep.subr.bf16.mxu1 %v5352_v35 }
  0xa9   :  { %1675 = vmatpush1.bf16.msra.mxu0 %v5347_v36 }
  0xaa   :  { %1717 = vmatprep.subr.bf16.mxu0 %v5355_v38 }
  0xab   :  { %1821 = vmatpush1.bf16.msra.mxu1 %v5350_v37  ;;  %v5365_v37 = vld [vmem:[#allocation4 + $0x2d0] ss:$20 sps:$4 sm:$0xff]  }
  0xac   :  { %1863 = vmatprep.subr.bf16.mxu1 %v5358_v39 }
 0x13f   :  { %v370_v47 = vpop.f32.mrb[0].mxu0  ;;  %v443_v22 = vpop.f32.mrb[0].mxu1 }
 0x140   :  { %v371_v48 = vadd.f32 %v370_v47, %v6009_v45  ;;  %v372_v49 = vpop.f32.mrb[1].mxu0  ;;  %v444_v26 = vadd.f32 %v443_v22, %v6030_v9  ;;  %v445_v27 = vpop.f32.mrb[1].mxu1  ;;  %v5368_v47 = vld [vmem:[#allocation4 + $0x2d8] ss:$20 sps:$4 sm:$0xff]  }
 0x141   :  { %v373_v50 = vadd.f32 %v372_v49, %v6012_v46  ;;  %v374_v51 = vpop.f32.mrb[2].mxu0  ;;  %v446_v31 = vadd.f32 %v445_v27, %v6034_v14  ;;  %v447_v32 = vpop.f32.mrb[2].mxu1 }
 0x142   :  { %v514_v52 = vmul.f32 0.02, %v371_v48  ;;  %v375_v53 = vadd.f32 %v374_v51, %v6009_v45  ;;  %v376_v54 = vpop.f32.mrb[3].mxu0  ;;  %vm482_vm0 = vcmp.ge.f32.partialorder %v371_v48, 0.0  ;;  %vm484_vm8 = vcmp.ge.f32.partialorder %v444_v26, 0.0  ;;  %v449_v36 = vpop.f32.mrb[3].mxu1 }
 0x143   :  { %v515_v55 = vmul.f32 0.02, %v373_v50  ;;  %v377_v56 = vadd.f32 %v376_v54, %v6012_v46  ;;  %vm483_vm1 = vcmp.ge.f32.partialorder %v373_v50, 0.0  ;;  %v516_v34 = vmul.f32 0.02, %v444_v26 }
 0x144   :  { %vm486_vm2 = vcmp.ge.f32.partialorder %v375_v53, 0.0  ;;  %v518_v57 = vmul.f32 0.02, %v375_v53  ;;  %v546_v61 = vsel %vm482_vm0, %v371_v48, %v514_v52  ;;  %v448_v35 = vadd.f32 %v447_v32, %v6030_v9  ;;  %v5373_v48 = vld [vmem:[#allocation4 + $0x2fc] ss:$20 sps:$4 sm:$0xff]  }
 0x145   :  { %vm487_vm3 = vcmp.ge.f32.partialorder %v377_v56, 0.0  ;;  %v519_v59 = vmul.f32 0.02, %v377_v56  ;;  %v547_v1 = vsel %vm483_vm1, %v373_v50, %v515_v55  ;;  %vm485_vm9 = vcmp.ge.f32.partialorder %v446_v31, 0.0  ;;  %v5376_v52 = vld [vmem:[#allocation4 + $0x304] ss:$20 sps:$4 sm:$0xff]  }
 0x146   :  { %v550_v62 = vsel %vm486_vm2, %v375_v53, %v518_v57  ;;  %v517_v43 = vmul.f32 0.02, %v446_v31  ;;  %vm488_vm10 = vcmp.ge.f32.partialorder %v448_v35, 0.0  ;;  %v548_v55 = vsel %vm484_vm8, %v444_v26, %v516_v34  ;;  %v5385_v32 = vld [vmem:[#allocation4 + $0x34c] ss:$20 sps:$4 sm:$0xff]  }
 0x147   :  { %v6024_v63 = vpack.c.bf16 %v550_v62, %v546_v61  ;;  %v551_v2 = vsel %vm487_vm3, %v377_v56, %v519_v59  ;;  %v380_v3 = vpop.f32.mrb[4].mxu0  ;;  %v520_v56 = vmul.f32 0.02, %v448_v35  ;;  %v450_v57 = vadd.f32 %v449_v36, %v6034_v14  ;;  %v5371_v59 = vld [vmem:[#allocation4 + $0x2f8] ss:$20 sps:$4 sm:$0xff]  }
 0x148   :  { %v6026_v4 = vpack.c.bf16 %v551_v2, %v547_v1  ;;  %v381_v7 = vadd.f32 %v380_v3, %v6009_v45  ;;  %v382_v8 = vpop.f32.mrb[5].mxu0  ;;  %v5374_v61 = vld [vmem:[#allocation4 + $0x300] ss:$20 sps:$4 sm:$0xff]   ;;  %v549_v3 = vsel %vm485_vm9, %v446_v31, %v517_v43  ;;  %v5380_v31 = vld [vmem:[#allocation4 + $0x328] ss:$20 sps:$4 sm:$0xff]  }
 0x149   :  { %v383_v12 = vadd.f32 %v382_v8, %v6012_v46  ;;  %v384_v13 = vpop.f32.mrb[6].mxu0  ;;  %v552_v8 = vsel %vm488_vm10, %v448_v35, %v520_v56  ;;  %vm489_vm15 = vcmp.ge.f32.partialorder %v450_v57, 0.0 }
 0x14a   :  { %1676 = vmatprep.mubr.bf16.mxu0 %v6026_v4  ;;  %1822 = vmatprep.mubr.bf16.mxu1 %v6026_v4  ;;  %vm490_vm4 = vcmp.ge.f32.partialorder %v381_v7, 0.0  ;;  %v522_v16 = vmul.f32 0.02, %v381_v7  ;;  %v385_v17 = vadd.f32 %v384_v13, %v6009_v45  ;;  %v386_v18 = vpop.f32.mrb[7].mxu0 }
 0x14b   :  { %1677 = vmatmul.mubr.bf16.vlgmr.msra.gmra.mrb[16].mxu0 %v6024_v63  ;;  %1823 = vmatmul.mubr.bf16.vlgmr.msra.gmra.mrb[16].mxu1 %v6024_v63  ;;  %vm491_vm5 = vcmp.ge.f32.partialorder %v383_v12, 0.0  ;;  %v523_v20 = vmul.f32 0.02, %v383_v12  ;;  %v387_v21 = vadd.f32 %v386_v18, %v6012_v46 }
 0x14c   :  { %1718 = vmatpush1.bf16.msra.mxu0 %v5353_v5  ;;  %1864 = vmatpush1.bf16.msra.mxu1 %v5356_v6  ;;  %vm494_vm6 = vcmp.ge.f32.partialorder %v385_v17, 0.0  ;;  %v526_v24 = vmul.f32 0.02, %v385_v17  ;;  %v554_v25 = vsel %vm490_vm4, %v381_v7, %v522_v16  ;;  %v5379_v5 = vld [vmem:[#allocation4 + $0x324] ss:$20 sps:$4 sm:$0xff]  }
 0x14d   :  { %1719 = vmatprep.subr.bf16.mxu0 %v5361_v10  ;;  %1865 = vmatprep.subr.bf16.mxu1 %v5364_v11  ;;  %vm495_vm7 = vcmp.ge.f32.partialorder %v387_v21, 0.0  ;;  %v527_v29 = vmul.f32 0.02, %v387_v21  ;;  %v555_v30 = vsel %vm491_vm5, %v383_v12, %v523_v20  ;;  %v453_v10 = vpop.f32.mrb[4].mxu1  ;;  %v5382_v11 = vld [vmem:[#allocation4 + $0x32c] ss:$20 sps:$4 sm:$0xff]  }
 0x14e   :  { %v558_v33 = vsel %vm494_vm6, %v385_v17, %v526_v24  ;;  %v455_v16 = vpop.f32.mrb[5].mxu1  ;;  %v6068_v22 = vadd.f32 %v453_v10, %v6030_v9 }
 0x14f   :  { %v390_v38 = vpop.f32.mrb[8].mxu0  ;;  %v559_v39 = vsel %vm495_vm7, %v387_v21, %v527_v29  ;;  %v6047_v40 = vpack.c.bf16 %v558_v33, %v554_v25  ;;  %v521_v21 = vmul.f32 0.02, %v450_v57  ;;  %v5377_v25 = vld [vmem:[#allocation4 + $0x320] ss:$20 sps:$4 sm:$0xff]  }
 0x150   :  { %1720 = vmatpush1.bf16.msra.mxu0 %v5359_v15  ;;  %1866 = vmatpush1.bf16.msra.mxu1 %v5362_v19  ;;  %v391_v49 = vadd.f32 %v390_v38, %v6009_v45  ;;  %v392_v50 = vpop.f32.mrb[9].mxu0  ;;  %v6050_v51 = vpack.c.bf16 %v559_v39, %v555_v30  ;;  %v6064_v15 = vpack.c.bf16 %v552_v8, %v548_v55  ;;  %v457_v19 = vpop.f32.mrb[6].mxu1  ;;  %vm492_vm0 = vcmp.ge.f32.partialorder %v6068_v22, 0.0  ;;  %v5394_v55 = vld [vmem:[#allocation4 + $0x37c] ss:$20 sps:$4 sm:$0xff]  }
 0x151   :  { %1721 = vmatprep.subr.bf16.mxu0 %v5367_v23  ;;  %1867 = vmatprep.subr.bf16.mxu1 %v5370_v28  ;;  %v393_v53 = vadd.f32 %v392_v50, %v6012_v46  ;;  %v394_v54 = vpop.f32.mrb[10].mxu0  ;;  %v6071_v23 = vadd.f32 %v455_v16, %v6034_v14  ;;  %v459_v24 = vpop.f32.mrb[7].mxu1  ;;  %v6076_v29 = vadd.f32 %v457_v19, %v6030_v9  ;;  %v5397_v16 = vld [vmem:[#allocation4 + $0x39c] ss:$20 sps:$4 sm:$0xff]  }
 0x152   :  { %vm498_vm11 = vcmp.ge.f32.partialorder %v391_v49, 0.0  ;;  %v530_v62 = vmul.f32 0.02, %v391_v49  ;;  %v395_v1 = vadd.f32 %v394_v54, %v6009_v45  ;;  %v396_v2 = vpop.f32.mrb[11].mxu0  ;;  %1686 = vmatprep.mubr.bf16.mxu0 %v6050_v51  ;;  %1832 = vmatprep.mubr.bf16.mxu1 %v6050_v51  ;;  %v6079_v30 = vadd.f32 %v459_v24, %v6034_v14  ;;  %v5391_v54 = vld [vmem:[#allocation4 + $0x374] ss:$20 sps:$4 sm:$0xff]  }
 0x153   :  { %vm499_vm12 = vcmp.ge.f32.partialorder %v393_v53, 0.0  ;;  %v531_v6 = vmul.f32 0.02, %v393_v53  ;;  %v397_v7 = vadd.f32 %v396_v2, %v6012_v46  ;;  %1687 = vmatmul.mubr.bf16.gmra.mrb[20].mxu0 %v6047_v40  ;;  %1833 = vmatmul.mubr.bf16.gmra.mrb[20].mxu1 %v6047_v40  ;;  %v553_v36 = vsel %vm489_vm15, %v450_v57, %v521_v21  ;;  %v5400_v21 = vld [vmem:[#allocation4 + $0x3a4] ss:$20 sps:$4 sm:$0xff]  }
 0x154   :  { %1722 = vmatpush1.bf16.msra.mxu0 %v5365_v37  ;;  %1868 = vmatpush1.bf16.msra.mxu1 %v5368_v47  ;;  %vm502_vm13 = vcmp.ge.f32.partialorder %v395_v1, 0.0  ;;  %v534_v12 = vmul.f32 0.02, %v395_v1  ;;  %v562_v13 = vsel %vm498_vm11, %v391_v49, %v530_v62  ;;  %v5388_v37 = vld [vmem:[#allocation4 + $0x354] ss:$20 sps:$4 sm:$0xff]   ;;  %v6086_v43 = vpack.c.bf16 %v553_v36, %v549_v3 }
 0x155   :  { %1723 = vmatprep.subr.bf16.mxu0 %v5373_v48  ;;  %1869 = vmatprep.subr.bf16.mxu1 %v5376_v52  ;;  %vm503_vm14 = vcmp.ge.f32.partialorder %v397_v7, 0.0  ;;  %v535_v17 = vmul.f32 0.02, %v397_v7  ;;  %v563_v18 = vsel %vm499_vm12, %v393_v53, %v531_v6  ;;  %v6090_v47 = vmul.f32 0.02, %v6068_v22 }
 0x156   :  { %v566_v20 = vsel %vm502_vm13, %v395_v1, %v534_v12  ;;  %v5383_v48 = vld [vmem:[#allocation4 + $0x348] ss:$20 sps:$4 sm:$0xff]   ;;  %v5386_v49 = vld [vmem:[#allocation4 + $0x350] ss:$20 sps:$4 sm:$0xff]   ;;  %vm493_vm2 = vcmp.ge.f32.partialorder %v6071_v23, 0.0  ;;  %vm497_vm6 = vcmp.ge.f32.partialorder %v6079_v30, 0.0 }
 0x157   :  { %v400_v26 = vpop.f32.mrb[12].mxu0  ;;  %v567_v27 = vsel %vm503_vm14, %v397_v7, %v535_v17  ;;  %v6073_v28 = vpack.c.bf16 %v566_v20, %v562_v13  ;;  %v528_v1 = vmul.f32 0.02, %v6076_v29  ;;  %v529_v7 = vmul.f32 0.02, %v6079_v30 }
 0x158   :  { %1724 = vmatpush1.bf16.msra.mxu0 %v5371_v59  ;;  %1870 = vmatpush1.bf16.msra.mxu1 %v5374_v61  ;;  %v401_v33 = vadd.f32 %v400_v26, %v6009_v45  ;;  %v402_v34 = vpop.f32.mrb[13].mxu0  ;;  %v6082_v35 = vpack.c.bf16 %v567_v27, %v563_v18  ;;  %v525_v59 = vmul.f32 0.02, %v6071_v23  ;;  %v5389_v12 = vld [vmem:[#allocation4 + $0x370] ss:$20 sps:$4 sm:$0xff]   ;;  %vm496_vm7 = vcmp.ge.f32.partialorder %v6076_v29, 0.0 }
 0x159   :  { %1725 = vmatprep.subr.bf16.mxu0 %v5379_v5  ;;  %1871 = vmatprep.subr.bf16.mxu1 %v5382_v11  ;;  %v403_v38 = vadd.f32 %v402_v34, %v6012_v46  ;;  %v404_v39 = vpop.f32.mrb[14].mxu0  ;;  %v5392_v13 = vld [vmem:[#allocation4 + $0x378] ss:$20 sps:$4 sm:$0xff]   ;;  %v556_v34 = vsel %vm492_vm0, %v6068_v22, %v6090_v47 }
 0x15a   :  { %vm506_vm1 = vcmp.ge.f32.partialorder %v401_v33, 0.0  ;;  %v538_v50 = vmul.f32 0.02, %v401_v33  ;;  %v405_v52 = vadd.f32 %v404_v39, %v6009_v45  ;;  %v406_v53 = vpop.f32.mrb[15].mxu0  ;;  %1696 = vmatprep.mubr.bf16.mxu0 %v6082_v35  ;;  %1842 = vmatprep.mubr.bf16.mxu1 %v6082_v35  ;;  %v463_v45 = vpop.f32.mrb[8].mxu1 }
 0x15b   :  { %vm507_vm3 = vcmp.ge.f32.partialorder %v403_v38, 0.0  ;;  %v539_v56 = vmul.f32 0.02, %v403_v38  ;;  %v407_v57 = vadd.f32 %v406_v53, %v6012_v46  ;;  %1697 = vmatmul.mubr.bf16.gmra.mrb[24].mxu0 %v6073_v28  ;;  %1843 = vmatmul.mubr.bf16.gmra.mrb[24].mxu1 %v6073_v28  ;;  %v465_v2 = vpop.f32.mrb[9].mxu1  ;;  %v464_v8 = vadd.f32 %v463_v45, %v6030_v9  ;;  %v5398_v39 = vld [vmem:[#allocation4 + $0x3a0] ss:$20 sps:$4 sm:$0xff]  }
 0x15c   :  { %1726 = vmatpush1.bf16.msra.mxu0 %v5377_v25  ;;  %1872 = vmatpush1.bf16.msra.mxu1 %v5380_v31  ;;  %vm510_vm4 = vcmp.ge.f32.partialorder %v405_v52, 0.0  ;;  %v542_v61 = vmul.f32 0.02, %v405_v52  ;;  %v570_v62 = vsel %vm506_vm1, %v401_v33, %v538_v50  ;;  %v467_v5 = vpop.f32.mrb[10].mxu1  ;;  %v466_v10 = vadd.f32 %v465_v2, %v6034_v14  ;;  %v5403_v50 = vld [vmem:[#allocation4 + $0x3c4] ss:$20 sps:$4 sm:$0xff]  }
 0x15d   :  { %1727 = vmatprep.subr.bf16.mxu0 %v5385_v32  ;;  %1873 = vmatprep.subr.bf16.mxu1 %v5388_v37  ;;  %vm511_vm5 = vcmp.ge.f32.partialorder %v407_v57, 0.0  ;;  %v543_v46 = vmul.f32 0.02, %v407_v57  ;;  %v571_v3 = vsel %vm507_vm3, %v403_v38, %v539_v56  ;;  %v469_v11 = vpop.f32.mrb[11].mxu1  ;;  %v468_v19 = vadd.f32 %v467_v5, %v6030_v9  ;;  %v5401_v56 = vld [vmem:[#allocation4 + $0x3c0] ss:$20 sps:$4 sm:$0xff]  }
 0x15e   :  { %v574_v6 = vsel %vm510_vm4, %v405_v52, %v542_v61  ;;  %v470_v20 = vadd.f32 %v469_v11, %v6034_v14  ;;  %v532_v25 = vmul.f32 0.02, %v464_v8  ;;  %vm501_vm8 = vcmp.ge.f32.partialorder %v466_v10, 0.0  ;;  %v473_v37 = vpop.f32.mrb[12].mxu1  ;;  %v5406_v52 = vld [vmem:[#allocation4 + $0x3cc] ss:$20 sps:$4 sm:$0xff]  }
 0x15f   :  { %v575_v17 = vsel %vm511_vm5, %v407_v57, %v543_v46  ;;  %v6107_v18 = vpack.c.bf16 %v574_v6, %v570_v62  ;;  %vm500_vm9 = vcmp.ge.f32.partialorder %v464_v8, 0.0  ;;  %v533_v26 = vmul.f32 0.02, %v466_v10  ;;  %v475_v47 = vpop.f32.mrb[13].mxu1  ;;  %v5404_v62 = vld [vmem:[#allocation4 + $0x3c8] ss:$20 sps:$4 sm:$0xff]  }
 0x160   :  { %1728 = vmatpush1.bf16.msra.mxu0 %v5383_v48  ;;  %1874 = vmatpush1.bf16.msra.mxu1 %v5386_v49  ;;  %v6111_v24 = vpack.c.bf16 %v575_v17, %v571_v3  ;;  %v536_v27 = vmul.f32 0.02, %v468_v19  ;;  %vm505_vm10 = vcmp.ge.f32.partialorder %v470_v20, 0.0  ;;  %v537_v31 = vmul.f32 0.02, %v470_v20  ;;  %v477_v53 = vpop.f32.mrb[14].mxu1 }
 0x161   :  { %1729 = vmatprep.subr.bf16.mxu0 %v5391_v54  ;;  %1875 = vmatprep.subr.bf16.mxu1 %v5394_v55  ;;  %v557_v32 = vsel %vm493_vm2, %v6071_v23, %v525_v59  ;;  %v561_v33 = vsel %vm497_vm6, %v6079_v30, %v529_v7  ;;  %vm504_vm11 = vcmp.ge.f32.partialorder %v468_v19, 0.0  ;;  %v560_v23 = vsel %vm496_vm7, %v6076_v29, %v528_v1  ;;  %v5395_v30 = vld [vmem:[#allocation4 + $0x398] ss:$20 sps:$4 sm:$0xff]   ;;  %v479_v45 = vpop.f32.mrb[15].mxu1  ;;  %v5412_v7 = vld [vmem:[#allocation4 + $0x3f4] ss:$20 sps:$4 sm:$0xff]  }
 0x162   :  { %1706 = vmatprep.mubr.bf16.mxu0 %v6111_v24  ;;  %1852 = vmatprep.mubr.bf16.mxu1 %v6111_v24  ;;  %v6128_v36 = vpack.c.bf16 %v561_v33, %v557_v32  ;;  %v565_v38 = vsel %vm501_vm8, %v466_v10, %v533_v26  ;;  %v6134_v48 = vpack.c.bf16 %v560_v23, %v556_v34  ;;  %v5409_v3 = vld [vmem:[#allocation4 + $0x3ec] ss:$20 sps:$4 sm:$0xff]   ;;  %v5415_v17 = vld [vmem:[#allocation4 + $0x414] ss:$20 sps:$4 sm:$0xff]   ;;  %v5424_v26 = vld [vmem:[#allocation4 + $0x444] ss:$20 sps:$4 sm:$0xff]  }
 0x163   :  { %1707 = vmatmul.mubr.bf16.gmra.mrb[28].mxu0 %v6107_v18  ;;  %1853 = vmatmul.mubr.bf16.gmra.mrb[28].mxu1 %v6107_v18  ;;  %v474_v22 = vadd.f32 %v473_v37, %v6030_v9  ;;  %v569_v49 = vsel %vm505_vm10, %v470_v20, %v537_v31  ;;  %v476_v29 = vadd.f32 %v475_v47, %v6034_v14  ;;  %v5413_v20 = vld [vmem:[#allocation4 + $0x410] ss:$20 sps:$4 sm:$0xff]   ;;  %v5422_v31 = vld [vmem:[#allocation4 + $0x440] ss:$20 sps:$4 sm:$0xff]   ;;  %v5428_v23 = vld [vmem:[#allocation4 + $0x468] ss:$20 sps:$4 sm:$0xff]  }
 0x164   :  { %1730 = vmatpush1.bf16.msra.mxu0 %v5389_v12  ;;  %1876 = vmatpush1.bf16.msra.mxu1 %v5392_v13  ;;  %v6139_v54 = vpack.c.bf16 %v569_v49, %v565_v38  ;;  %v564_v55 = vsel %vm500_vm9, %v464_v8, %v532_v25  ;;  %v478_v59 = vadd.f32 %v477_v53, %v6030_v9  ;;  %v5410_v13 = vld [vmem:[#allocation4 + $0x3f0] ss:$20 sps:$4 sm:$0xff]   ;;  %v5430_v33 = vld [vmem:[#allocation4 + $0x46c] ss:$20 sps:$4 sm:$0xff]   ;;  %v5436_v38 = vld [vmem:[#allocation4 + $0x494] ss:$20 sps:$4 sm:$0xff]  }
 0x165   :  { %1731 = vmatprep.subr.bf16.mxu0 %v5397_v16  ;;  %1877 = vmatprep.subr.bf16.mxu1 %v5400_v21  ;;  %vm508_vm12 = vcmp.ge.f32.partialorder %v474_v22, 0.0  ;;  %v540_v57 = vmul.f32 0.02, %v474_v22  ;;  %v568_v61 = vsel %vm504_vm11, %v468_v19, %v536_v27  ;;  %vm509_vm13 = vcmp.ge.f32.partialorder %v476_v29, 0.0  ;;  %v5418_v19 = vld [vmem:[#allocation4 + $0x41c] ss:$20 sps:$4 sm:$0xff]  }
 0x166   :  { %1749 = vmatprep.mubr.bf16.mxu0 %v6086_v43  ;;  %1895 = vmatprep.mubr.bf16.mxu1 %v6086_v43  ;;  %v541_v1 = vmul.f32 0.02, %v476_v29  ;;  %v480_v2 = vadd.f32 %v479_v45, %v6034_v14  ;;  %v6147_v46 = vpack.c.bf16 %v568_v61, %v564_v55  ;;  %vm512_vm14 = vcmp.ge.f32.partialorder %v478_v59, 0.0  ;;  %v5407_v14 = vld [vmem:[#allocation4 + $0x3e8] ss:$20 sps:$4 sm:$0xff]  }
 0x167   :  { %v544_v5 = vmul.f32 0.02, %v478_v59  ;;  %v572_v6 = vsel %vm508_vm12, %v474_v22, %v540_v57  ;;  %v5416_v21 = vld [vmem:[#allocation4 + $0x418] ss:$20 sps:$4 sm:$0xff]   ;;  %v5421_v25 = vld [vmem:[#allocation4 + $0x43c] ss:$20 sps:$4 sm:$0xff]  }
 0x168   :  { %1732 = vmatpush1.bf16.msra.mxu0 %v5395_v30  ;;  %1878 = vmatpush1.bf16.msra.mxu1 %v5398_v39  ;;  %vm513_vm15 = vcmp.ge.f32.partialorder %v480_v2, 0.0  ;;  %v545_v9 = vmul.f32 0.02, %v480_v2  ;;  %v573_v8 = vsel %vm509_vm13, %v476_v29, %v541_v1  ;;  %v5419_v27 = vld [vmem:[#allocation4 + $0x438] ss:$20 sps:$4 sm:$0xff]  }
 0x169   :  { %1733 = vmatprep.subr.bf16.mxu0 %v5403_v50  ;;  %1879 = vmatprep.subr.bf16.mxu1 %v5406_v52  ;;  %v576_v10 = vsel %vm512_vm14, %v478_v59, %v544_v5  ;;  %v5427_v32 = vld [vmem:[#allocation4 + $0x464] ss:$20 sps:$4 sm:$0xff]   ;;  %v5425_v34 = vld [vmem:[#allocation4 + $0x460] ss:$20 sps:$4 sm:$0xff]   ;;  %v5431_v30 = vld [vmem:[#allocation4 + $0x488] ss:$20 sps:$4 sm:$0xff]  }
 0x16a   :  { %v577_v11 = vsel %vm513_vm15, %v480_v2, %v545_v9  ;;  %v6149_v12 = vpack.c.bf16 %v576_v10, %v572_v6  ;;  %v5433_v37 = vld [vmem:[#allocation4 + $0x48c] ss:$20 sps:$4 sm:$0xff]   ;;  %v5434_v39 = vld [vmem:[#allocation4 + $0x490] ss:$20 sps:$4 sm:$0xff]   ;;  %v5439_v22 = vld [vmem:[#allocation4 + $0x4b4] ss:$20 sps:$4 sm:$0xff]  }
 0x16b   :  { %v6151_v16 = vpack.c.bf16 %v577_v11, %v573_v8  ;;  %v5442_v47 = vld [vmem:[#allocation4 + $0x4bc] ss:$20 sps:$4 sm:$0xff]   ;;  %v5440_v50 = vld [vmem:[#allocation4 + $0x4b8] ss:$20 sps:$4 sm:$0xff]   ;;  %v5446_v55 = vld [vmem:[#allocation4 + $0x4e0] ss:$20 sps:$4 sm:$0xff]  }
 0x16c   :  { %1734 = vmatpush1.bf16.msra.mxu0 %v5401_v56  ;;  %1880 = vmatpush1.bf16.msra.mxu1 %v5404_v62  ;;  %v5437_v49 = vld [vmem:[#allocation4 + $0x4b0] ss:$20 sps:$4 sm:$0xff]   ;;  %v5443_v53 = vld [vmem:[#allocation4 + $0x4d8] ss:$20 sps:$4 sm:$0xff]   ;;  %v5458_v5 = vld [vmem:[#allocation4 + $0x420] ss:$20 sps:$4 sm:$0xff]  }
 0x16d   :  { %1735 = vmatprep.subr.bf16.mxu0 %v5409_v3  ;;  %1881 = vmatprep.subr.bf16.mxu1 %v5412_v7  ;;  %v5445_v52 = vld [vmem:[#allocation4 + $0x4dc] ss:$20 sps:$4 sm:$0xff]   ;;  %v5448_v29 = vld [vmem:[#allocation4 + $0x4e4] ss:$20 sps:$4 sm:$0xff]   ;;  %v5457_v3 = vld [vmem:[#allocation4 + $0x1a0] ss:$20 sps:$4 sm:$0xff]  }
 0x16e   :  { %v5449_v56 = vld [vmem:[#allocation4 + $0x150] ss:$20 sps:$4 sm:$0xff]   ;;  %v5453_v61 = vld [vmem:[#allocation4 + $0x178] ss:$20 sps:$4 sm:$0xff]   ;;  %v5459_v6 = vld [vmem:[#allocation4 + $0x60] ss:$20 sps:$4 sm:$0xff]  }
 0x16f   :  { %v5450_v57 = vld [vmem:[#allocation4 + $0x3d0] ss:$20 sps:$4 sm:$0xff]   ;;  %v5454_v62 = vld [vmem:[#allocation4 + $0x3f8] ss:$20 sps:$4 sm:$0xff]   ;;  %v5460_v7 = vld [vmem:[#allocation4 + $0x2e0] ss:$20 sps:$4 sm:$0xff]  }
 0x170   :  { %1736 = vmatpush1.bf16.msra.mxu0 %v5407_v14  ;;  %1882 = vmatpush1.bf16.msra.mxu1 %v5410_v13  ;;  %v5451_v59 = vld [vmem:[#allocation4 + $0x10] ss:$20 sps:$4 sm:$0xff]   ;;  %v5455_v1 = vld [vmem:[#allocation4 + $0x38] ss:$20 sps:$4 sm:$0xff]   ;;  %v5461_v9 = vld [vmem:[#allocation4 + $0x1c8] ss:$20 sps:$4 sm:$0xff]  }
 0x171   :  { %1737 = vmatprep.subr.bf16.mxu0 %v5415_v17  ;;  %1883 = vmatprep.subr.bf16.mxu1 %v5418_v19  ;;  %v5452_v45 = vld [vmem:[#allocation4 + $0x290] ss:$20 sps:$4 sm:$0xff]   ;;  %v5456_v2 = vld [vmem:[#allocation4 + $0x2b8] ss:$20 sps:$4 sm:$0xff]   ;;  %v5462_v8 = vld [vmem:[#allocation4 + $0x448] ss:$20 sps:$4 sm:$0xff]  }
 0x172   :  { %v5463_v10 = vld [vmem:[#allocation4 + $0x88] ss:$20 sps:$4 sm:$0xff]   ;;  %v5465_v14 = vld [vmem:[#allocation4 + $0x1f0] ss:$20 sps:$4 sm:$0xff]  }
 0x173   :  { %v5464_v11 = vld [vmem:[#allocation4 + $0x308] ss:$20 sps:$4 sm:$0xff]   ;;  %v5466_v13 = vld [vmem:[#allocation4 + $0x470] ss:$20 sps:$4 sm:$0xff]  }
 0x174   :  { %1738 = vmatpush1.bf16.msra.mxu0 %v5413_v20  ;;  %1884 = vmatpush1.bf16.msra.mxu1 %v5416_v21  ;;  %v5467_v17 = vld [vmem:[#allocation4 + $0xb0] ss:$20 sps:$4 sm:$0xff]   ;;  %v5469_v20 = vld [vmem:[#allocation4 + $0x218] ss:$20 sps:$4 sm:$0xff]  }
 0x175   :  { %1739 = vmatprep.subr.bf16.mxu0 %v5421_v25  ;;  %1885 = vmatprep.subr.bf16.mxu1 %v5424_v26  ;;  %v5468_v19 = vld [vmem:[#allocation4 + $0x330] ss:$20 sps:$4 sm:$0xff]   ;;  %v5470_v21 = vld [vmem:[#allocation4 + $0x498] ss:$20 sps:$4 sm:$0xff]  }
 0x176   :  { %v5471_v25 = vld [vmem:[#allocation4 + $0xd8] ss:$20 sps:$4 sm:$0xff]  }
 0x177   :  { %v5472_v26 = vld [vmem:[#allocation4 + $0x358] ss:$20 sps:$4 sm:$0xff]  }
 0x178   :  { %1740 = vmatpush1.bf16.msra.mxu0 %v5419_v27  ;;  %1886 = vmatpush1.bf16.msra.mxu1 %v5422_v31  ;;  %v5473_v27 = vld [vmem:[#allocation4 + $0x240] ss:$20 sps:$4 sm:$0xff]  }
 0x179   :  { %1741 = vmatprep.subr.bf16.mxu0 %v5427_v32  ;;  %1887 = vmatprep.subr.bf16.mxu1 %v5430_v33  ;;  %v5474_v31 = vld [vmem:[#allocation4 + $0x4c0] ss:$20 sps:$4 sm:$0xff]  }
 0x17a   :  { %v5475_v32 = vld [vmem:[#allocation4 + $0x100] ss:$20 sps:$4 sm:$0xff]  }
 0x17b   :  { %v5476_v33 = vld [vmem:[#allocation4 + $0x380] ss:$20 sps:$4 sm:$0xff]  }
 0x17c   :  { %1742 = vmatpush1.bf16.msra.mxu0 %v5425_v34  ;;  %1888 = vmatpush1.bf16.msra.mxu1 %v5428_v23  ;;  %v5477_v34 = vld [vmem:[#allocation4 + $0x268] ss:$20 sps:$4 sm:$0xff]  }
 0x17d   :  { %1743 = vmatprep.subr.bf16.mxu0 %v5433_v37  ;;  %1889 = vmatprep.subr.bf16.mxu1 %v5436_v38  ;;  %v5478_v23 = vld [vmem:[#allocation4 + $0x4e8] ss:$20 sps:$4 sm:$0xff]  }
 0x17e   :  { %v5479_v37 = vld [vmem:[#allocation4 + $0x128] ss:$20 sps:$4 sm:$0xff]  }
 0x17f   :  { %v5480_v38 = vld [vmem:[#allocation4 + $0x3a8] ss:$20 sps:$4 sm:$0xff]  }
 0x180   :  { %1744 = vmatpush1.bf16.msra.mxu0 %v5431_v30  ;;  %1890 = vmatpush1.bf16.msra.mxu1 %v5434_v39  ;;  %v5483_v30 = vld [vmem:[#allocation6 + $0x4] ss:$16 sps:$4 sm:$0xff]   ;;  %v5486_v39 = vld [vmem:[#allocation6 + $0xc] ss:$16 sps:$4 sm:$0xff]  }
 0x181   :  { %1745 = vmatprep.subr.bf16.mxu0 %v5439_v22  ;;  %1891 = vmatprep.subr.bf16.mxu1 %v5442_v47  ;;  %v5481_v22 = vld [vmem:[#allocation6] ss:$16 sps:$4 sm:$0xff]   ;;  %v5484_v47 = vld [vmem:[#allocation6 + $0x8] ss:$16 sps:$4 sm:$0xff]  }
 0x184   :  { %1746 = vmatpush1.bf16.msra.mxu0 %v5437_v49  ;;  %1892 = vmatpush1.bf16.msra.mxu1 %v5440_v50  ;;  %v5489_v49 = vld [vmem:[#allocation6 + $0x24] ss:$16 sps:$4 sm:$0xff]   ;;  %v5492_v50 = vld [vmem:[#allocation6 + $0x2c] ss:$16 sps:$4 sm:$0xff]  }
 0x185   :  { %1747 = vmatprep.subr.bf16.mxu0 %v5445_v52  ;;  %1893 = vmatprep.subr.bf16.mxu1 %v5448_v29  ;;  %v5495_v52 = vld [vmem:[#allocation6 + $0x44] ss:$16 sps:$4 sm:$0xff]   ;;  %v5498_v29 = vld [vmem:[#allocation6 + $0x4c] ss:$16 sps:$4 sm:$0xff]  }
 0x188   :  { %1748 = vmatpush1.bf16.msra.mxu0 %v5443_v53  ;;  %1894 = vmatpush1.bf16.msra.mxu1 %v5446_v55  ;;  %v5493_v53 = vld [vmem:[#allocation6 + $0x40] ss:$16 sps:$4 sm:$0xff]   ;;  %v5501_v55 = vld [vmem:[#allocation6 + $0x64] ss:$16 sps:$4 sm:$0xff]  }
 0x189   :  { %4822 = vmatprep.subr.bf16.mxu0 %v5449_v56  ;;  %4862 = vmatprep.subr.bf16.mxu1 %v5450_v57  ;;  %v5507_v56 = vld [vmem:[#allocation6 + $0x84] ss:$16 sps:$4 sm:$0xff]   ;;  %v5510_v57 = vld [vmem:[#allocation6 + $0x8c] ss:$16 sps:$4 sm:$0xff]  }
 0x18b   :  { %1750 = vmatmul.mubr.bf16.vlgmr.msra.gmra.mrb[16].mxu0 %v6064_v15  ;;  %1896 = vmatmul.mubr.bf16.vlgmr.msra.gmra.mrb[16].mxu1 %v6064_v15 }
 0x18c   :  { %4823 = vmatpush3.bf16.msra.mxu0 %v5451_v59  ;;  %4863 = vmatpush3.bf16.msra.mxu1 %v5452_v45  ;;  %v5505_v59 = vld [vmem:[#allocation6 + $0x80] ss:$16 sps:$4 sm:$0xff]   ;;  %v5513_v45 = vld [vmem:[#allocation6 + $0xa4] ss:$16 sps:$4 sm:$0xff]  }
 0x18d   :  { %4824 = vmatprep.subr.bf16.mxu0 %v5453_v61  ;;  %4864 = vmatprep.subr.bf16.mxu1 %v5454_v62  ;;  %v5519_v61 = vld [vmem:[#allocation6 + $0xc4] ss:$16 sps:$4 sm:$0xff]   ;;  %v5522_v62 = vld [vmem:[#allocation6 + $0xcc] ss:$16 sps:$4 sm:$0xff]  }
 0x18e   :  { %1759 = vmatprep.mubr.bf16.mxu0 %v6128_v36  ;;  %1905 = vmatprep.mubr.bf16.mxu1 %v6128_v36 }
 0x190   :  { %4825 = vmatpush3.bf16.msra.mxu0 %v5455_v1  ;;  %4865 = vmatpush3.bf16.msra.mxu1 %v5456_v2  ;;  %v5517_v1 = vld [vmem:[#allocation6 + $0xc0] ss:$16 sps:$4 sm:$0xff]   ;;  %v5525_v2 = vld [vmem:[#allocation6 + $0xe4] ss:$16 sps:$4 sm:$0xff]  }
 0x191   :  { %4826 = vmatprep.subr.bf16.mxu0 %v5457_v3  ;;  %4866 = vmatprep.subr.bf16.mxu1 %v5458_v5  ;;  %v5531_v3 = vld [vmem:[#allocation6 + $0x104] ss:$16 sps:$4 sm:$0xff]   ;;  %v5534_v5 = vld [vmem:[#allocation6 + $0x10c] ss:$16 sps:$4 sm:$0xff]  }
 0x193   :  { %1760 = vmatmul.mubr.bf16.gmra.mrb[20].mxu0 %v6134_v48  ;;  %1906 = vmatmul.mubr.bf16.gmra.mrb[20].mxu1 %v6134_v48 }
 0x194   :  { %4827 = vmatpush3.bf16.msra.mxu0 %v5459_v6  ;;  %4867 = vmatpush3.bf16.msra.mxu1 %v5460_v7  ;;  %v5529_v6 = vld [vmem:[#allocation6 + $0x100] ss:$16 sps:$4 sm:$0xff]   ;;  %v5532_v7 = vld [vmem:[#allocation6 + $0x108] ss:$16 sps:$4 sm:$0xff]  }
 0x195   :  { %4828 = vmatprep.subr.bf16.mxu0 %v5461_v9  ;;  %4868 = vmatprep.subr.bf16.mxu1 %v5462_v8  ;;  %v5537_v9 = vld [vmem:[#allocation6 + $0x124] ss:$16 sps:$4 sm:$0xff]   ;;  %v5535_v8 = vld [vmem:[#allocation6 + $0x120] ss:$16 sps:$4 sm:$0xff]  }
 0x196   :  { %1769 = vmatprep.mubr.bf16.mxu0 %v6139_v54  ;;  %1915 = vmatprep.mubr.bf16.mxu1 %v6139_v54 }
 0x198   :  { %4829 = vmatpush3.bf16.msra.mxu0 %v5463_v10  ;;  %4869 = vmatpush3.bf16.msra.mxu1 %v5464_v11  ;;  %v5543_v10 = vld [vmem:[#allocation6 + $0x144] ss:$16 sps:$4 sm:$0xff]   ;;  %v5546_v11 = vld [vmem:[#allocation6 + $0x14c] ss:$16 sps:$4 sm:$0xff]  }
 0x199   :  { %4830 = vmatprep.subr.bf16.mxu0 %v5465_v14  ;;  %4870 = vmatprep.subr.bf16.mxu1 %v5466_v13  ;;  %v5541_v14 = vld [vmem:[#allocation6 + $0x140] ss:$16 sps:$4 sm:$0xff]   ;;  %v5544_v13 = vld [vmem:[#allocation6 + $0x148] ss:$16 sps:$4 sm:$0xff]  }
 0x19b   :  { %1770 = vmatmul.mubr.bf16.gmra.mrb[24].mxu0 %v6147_v46  ;;  %1916 = vmatmul.mubr.bf16.gmra.mrb[24].mxu1 %v6147_v46 }
 0x19c   :  { %4831 = vmatpush3.bf16.msra.mxu0 %v5467_v17  ;;  %4871 = vmatpush3.bf16.msra.mxu1 %v5468_v19  ;;  %v5549_v17 = vld [vmem:[#allocation6 + $0x164] ss:$16 sps:$4 sm:$0xff]   ;;  %v5552_v19 = vld [vmem:[#allocation6 + $0x16c] ss:$16 sps:$4 sm:$0xff]  }
 0x19d   :  { %4832 = vmatprep.subr.bf16.mxu0 %v5469_v20  ;;  %4872 = vmatprep.subr.bf16.mxu1 %v5470_v21  ;;  %v5547_v20 = vld [vmem:[#allocation6 + $0x160] ss:$16 sps:$4 sm:$0xff]   ;;  %v5550_v21 = vld [vmem:[#allocation6 + $0x168] ss:$16 sps:$4 sm:$0xff]  }
 0x19e   :  { %1779 = vmatprep.mubr.bf16.mxu0 %v6151_v16  ;;  %1925 = vmatprep.mubr.bf16.mxu1 %v6151_v16 }
 0x1a0   :  { %4833 = vmatpush3.bf16.msra.mxu0 %v5471_v25  ;;  %4873 = vmatpush3.bf16.msra.mxu1 %v5472_v26  ;;  %v5555_v25 = vld [vmem:[#allocation6 + $0x184] ss:$16 sps:$4 sm:$0xff]   ;;  %v5558_v26 = vld [vmem:[#allocation6 + $0x18c] ss:$16 sps:$4 sm:$0xff]  }
 0x1a1   :  { %4834 = vmatprep.subr.bf16.mxu0 %v5473_v27  ;;  %4874 = vmatprep.subr.bf16.mxu1 %v5474_v31  ;;  %v5553_v27 = vld [vmem:[#allocation6 + $0x180] ss:$16 sps:$4 sm:$0xff]   ;;  %v5556_v31 = vld [vmem:[#allocation6 + $0x188] ss:$16 sps:$4 sm:$0xff]  }
 0x1a3   :  { %1780 = vmatmul.mubr.bf16.gmra.mrb[28].mxu0 %v6149_v12  ;;  %1926 = vmatmul.mubr.bf16.gmra.mrb[28].mxu1 %v6149_v12 }
 0x1a4   :  { %4835 = vmatpush3.bf16.msra.mxu0 %v5475_v32  ;;  %1968 = vmatprep.mubr.bf16.mxu0 %v6026_v4  ;;  %v5487_v4 = vld [vmem:[#allocation6 + $0x20] ss:$16 sps:$4 sm:$0xff]   ;;  %v5561_v32 = vld [vmem:[#allocation6 + $0x1a4] ss:$16 sps:$4 sm:$0xff]  }
 0x1a5   :  { %4875 = vmatpush3.bf16.msra.mxu1 %v5476_v33  ;;  %2033 = vmatprep.mubr.bf16.mxu1 %v6086_v43  ;;  %v5490_v43 = vld [vmem:[#allocation6 + $0x28] ss:$16 sps:$4 sm:$0xff]   ;;  %v5564_v33 = vld [vmem:[#allocation6 + $0x1ac] ss:$16 sps:$4 sm:$0xff]  }
 0x1a6   :  { %4836 = vmatprep.subr.bf16.mxu0 %v5477_v34  ;;  %4876 = vmatprep.subr.bf16.mxu1 %v5478_v23  ;;  %v5559_v34 = vld [vmem:[#allocation6 + $0x1a0] ss:$16 sps:$4 sm:$0xff]   ;;  %v5562_v23 = vld [vmem:[#allocation6 + $0x1a8] ss:$16 sps:$4 sm:$0xff]  }
 0x1a8   :  { %4837 = vmatpush3.bf16.msra.mxu0 %v5479_v37  ;;  %v5567_v37 = vld [vmem:[#allocation6 + $0x1c4] ss:$16 sps:$4 sm:$0xff]  }
 0x1a9   :  { %4877 = vmatpush3.bf16.msra.mxu1 %v5480_v38  ;;  %3187 = vmatprep.subr.bf16.mxu0 %v5483_v30  ;;  %v5570_v38 = vld [vmem:[#allocation6 + $0x1cc] ss:$16 sps:$4 sm:$0xff]   ;;  %v5565_v30 = vld [vmem:[#allocation6 + $0x1c0] ss:$16 sps:$4 sm:$0xff]  }
 0x1aa   :  { %3406 = vmatprep.subr.bf16.mxu1 %v5486_v39  ;;  %v5568_v39 = vld [vmem:[#allocation6 + $0x1c8] ss:$16 sps:$4 sm:$0xff]  }
 0x1ab   :  { %1969 = vmatmul.mubr.bf16.vlgmr.msra.gmra.mrb[32].mxu0 %v6024_v63  ;;  %v5496_v63 = vld [vmem:[#allocation6 + $0x48] ss:$16 sps:$4 sm:$0xff]  }
 0x1ac   :  { %2034 = vmatmul.mubr.bf16.vlgmr.msra.gmra.mrb[32].mxu1 %v6064_v15  ;;  %1976 = vmatprep.mubr.bf16.mxu0 %v6050_v51  ;;  %v5504_v51 = vld [vmem:[#allocation6 + $0x6c] ss:$16 sps:$4 sm:$0xff]   ;;  %v5499_v15 = vld [vmem:[#allocation6 + $0x60] ss:$16 sps:$4 sm:$0xff]  }
 0x1ad   :  { %2041 = vmatprep.mubr.bf16.mxu1 %v6128_v36  ;;  %3188 = vmatpush1.bf16.msra.mxu0 %v5481_v22  ;;  %v5502_v36 = vld [vmem:[#allocation6 + $0x68] ss:$16 sps:$4 sm:$0xff]   ;;  %v5573_v22 = vld [vmem:[#allocation6 + $0x1e4] ss:$16 sps:$4 sm:$0xff]  }
 0x1ae   :  { %3407 = vmatpush1.bf16.msra.mxu1 %v5484_v47  ;;  %3189 = vmatprep.subr.bf16.mxu0 %v5489_v49  ;;  %v5576_v47 = vld [vmem:[#allocation6 + $0x1ec] ss:$16 sps:$4 sm:$0xff]   ;;  %v5571_v49 = vld [vmem:[#allocation6 + $0x1e0] ss:$16 sps:$4 sm:$0xff]  }
 0x1af   :  { %3408 = vmatprep.subr.bf16.mxu1 %v5492_v50  ;;  %v5574_v50 = vld [vmem:[#allocation6 + $0x1e8] ss:$16 sps:$4 sm:$0xff]  }
 0x1b1   :  { %3190 = vmatpush1.bf16.msra.mxu0 %v5487_v4  ;;  %v5579_v4 = vld [vmem:[#allocation6 + $0x204] ss:$16 sps:$4 sm:$0xff]  }
 0x1b2   :  { %3409 = vmatpush1.bf16.msra.mxu1 %v5490_v43  ;;  %3191 = vmatprep.subr.bf16.mxu0 %v5495_v52  ;;  %v5582_v43 = vld [vmem:[#allocation6 + $0x20c] ss:$16 sps:$4 sm:$0xff]   ;;  %v4423_v52 = vld [vmem:[%s6648_s6 + $0x1] ss:$8 sm:$0xf] }
 0x1b3   :  { %1977 = vmatmul.mubr.bf16.gmra.mrb[36].mxu0 %v6047_v40  ;;  %3410 = vmatprep.subr.bf16.mxu1 %v5498_v29  ;;  %v5508_v40 = vld [vmem:[#allocation6 + $0x88] ss:$16 sps:$4 sm:$0xff]   ;;  %v4424_v29 = vld [vmem:[%s6648_s6 + $0x1] ss:$8 sm:$0x10] }
 0x1b4   :  { %2042 = vmatmul.mubr.bf16.gmra.mrb[36].mxu1 %v6134_v48  ;;  %1984 = vmatprep.mubr.bf16.mxu0 %v6082_v35  ;;  %v5516_v35 = vld [vmem:[#allocation6 + $0xac] ss:$16 sps:$4 sm:$0xff]   ;;  %v5511_v48 = vld [vmem:[#allocation6 + $0xa0] ss:$16 sps:$4 sm:$0xff]  }
 0x1b5   :  { %2049 = vmatprep.mubr.bf16.mxu1 %v6139_v54  ;;  %3192 = vmatpush1.bf16.msra.mxu0 %v5493_v53  ;;  %v5514_v54 = vld [vmem:[#allocation6 + $0xa8] ss:$16 sps:$4 sm:$0xff]   ;;  %v6189_v53 = vor.u32 %v4424_v29, %v4423_v52 }
 0x1b6   :  { %3411 = vmatpush1.bf16.msra.mxu1 %v5496_v63  ;;  %3193 = vmatprep.subr.bf16.mxu0 %v5501_v55 }
 0x1b7   :  { %3412 = vmatprep.subr.bf16.mxu1 %v5504_v51  ;;  %v6193_v63 = vrot.slane %v6189_v53, %v6000_v42  ;;  %v6197_v55 = vrot.slane %v6189_v53, %v6019_v58  ;;  %v6201_v51 = vrot.slane %v6189_v53, %v6006_v44 }
 0x1b9   :  { %3194 = vmatpush1.bf16.msra.mxu0 %v5499_v15  ;;  %v6205_v15 = vrot.slane %v6189_v53, %v6022_v60 }
 0x1ba   :  { %3413 = vmatpush1.bf16.msra.mxu1 %v5502_v36  ;;  %3195 = vmatprep.subr.bf16.mxu0 %v5507_v56 }
 0x1bb   :  { %1985 = vmatmul.mubr.bf16.gmra.mrb[40].mxu0 %v6073_v28  ;;  %3414 = vmatprep.subr.bf16.mxu1 %v5510_v57  ;;  %v5520_v28 = vld [vmem:[#allocation6 + $0xc8] ss:$16 sps:$4 sm:$0xff]  }
 0x1bc   :  { %2050 = vmatmul.mubr.bf16.gmra.mrb[40].mxu1 %v6147_v46  ;;  %1992 = vmatprep.mubr.bf16.mxu0 %v6111_v24  ;;  %v5528_v24 = vld [vmem:[#allocation6 + $0xec] ss:$16 sps:$4 sm:$0xff]   ;;  %v5523_v46 = vld [vmem:[#allocation6 + $0xe0] ss:$16 sps:$4 sm:$0xff]  }
 0x1bd   :  { %2057 = vmatprep.mubr.bf16.mxu1 %v6151_v16  ;;  %3196 = vmatpush1.bf16.msra.mxu0 %v5505_v59  ;;  %v5526_v16 = vld [vmem:[#allocation6 + $0xe8] ss:$16 sps:$4 sm:$0xff]  }
 0x1be   :  { %3415 = vmatpush1.bf16.msra.mxu1 %v5508_v40  ;;  %3197 = vmatprep.subr.bf16.mxu0 %v5513_v45 }
 0x1bf   :  { %3416 = vmatprep.subr.bf16.mxu1 %v5516_v35 }
 0x1c1   :  { %3198 = vmatpush1.bf16.msra.mxu0 %v5511_v48 }
 0x1c2   :  { %3417 = vmatpush1.bf16.msra.mxu1 %v5514_v54  ;;  %3199 = vmatprep.subr.bf16.mxu0 %v5519_v61 }
 0x1c3   :  { %1993 = vmatmul.mubr.bf16.gmra.mrb[44].mxu0 %v6107_v18  ;;  %3418 = vmatprep.subr.bf16.mxu1 %v5522_v62  ;;  %v5540_v18 = vld [vmem:[#allocation6 + $0x12c] ss:$16 sps:$4 sm:$0xff]  }
 0x1c4   :  { %2058 = vmatmul.mubr.bf16.gmra.mrb[44].mxu1 %v6149_v12  ;;  %v5538_v12 = vld [vmem:[#allocation6 + $0x128] ss:$16 sps:$4 sm:$0xff]  }
 0x1c5   :  { %3200 = vmatpush1.bf16.msra.mxu0 %v5517_v1 }
 0x1c6   :  { %3419 = vmatpush1.bf16.msra.mxu1 %v5520_v28  ;;  %3201 = vmatprep.subr.bf16.mxu0 %v5525_v2 }
 0x1c7   :  { %3420 = vmatprep.subr.bf16.mxu1 %v5528_v24 }
 0x1c9   :  { %3202 = vmatpush1.bf16.msra.mxu0 %v5523_v46 }
 0x1ca   :  { %3421 = vmatpush1.bf16.msra.mxu1 %v5526_v16  ;;  %3203 = vmatprep.subr.bf16.mxu0 %v5531_v3 }
 0x1cb   :  { %3422 = vmatprep.subr.bf16.mxu1 %v5534_v5 }
 0x1cd   :  { %3204 = vmatpush1.bf16.msra.mxu0 %v5529_v6 }
 0x1ce   :  { %3423 = vmatpush1.bf16.msra.mxu1 %v5532_v7  ;;  %3205 = vmatprep.subr.bf16.mxu0 %v5537_v9 }
 0x1cf   :  { %3424 = vmatprep.subr.bf16.mxu1 %v5540_v18 }
 0x1d1   :  { %3206 = vmatpush1.bf16.msra.mxu0 %v5535_v8 }
 0x1d2   :  { %3425 = vmatpush1.bf16.msra.mxu1 %v5538_v12  ;;  %3207 = vmatprep.subr.bf16.mxu0 %v5543_v10 }
 0x1d3   :  { %3426 = vmatprep.subr.bf16.mxu1 %v5546_v11 }
 0x1d5   :  { %3208 = vmatpush1.bf16.msra.mxu0 %v5541_v14 }
 0x1d6   :  { %3427 = vmatpush1.bf16.msra.mxu1 %v5544_v13  ;;  %3209 = vmatprep.subr.bf16.mxu0 %v5549_v17 }
 0x1d7   :  { %3428 = vmatprep.subr.bf16.mxu1 %v5552_v19 }
 0x1d9   :  { %3210 = vmatpush1.bf16.msra.mxu0 %v5547_v20 }
 0x1da   :  { %3429 = vmatpush1.bf16.msra.mxu1 %v5550_v21  ;;  %3211 = vmatprep.subr.bf16.mxu0 %v5555_v25 }
 0x1db   :  { %3430 = vmatprep.subr.bf16.mxu1 %v5558_v26 }
 0x1dd   :  { %3212 = vmatpush1.bf16.msra.mxu0 %v5553_v27 }
 0x1de   :  { %3431 = vmatpush1.bf16.msra.mxu1 %v5556_v31  ;;  %3213 = vmatprep.subr.bf16.mxu0 %v5561_v32 }
 0x1df   :  { %3432 = vmatprep.subr.bf16.mxu1 %v5564_v33 }
 0x1e1   :  { %3214 = vmatpush1.bf16.msra.mxu0 %v5559_v34 }
 0x1e2   :  { %3433 = vmatpush1.bf16.msra.mxu1 %v5562_v23  ;;  %3215 = vmatprep.subr.bf16.mxu0 %v5567_v37  ;;  %v5577_v37 = vld [vmem:[#allocation6 + $0x200] ss:$16 sps:$4 sm:$0xff]  }
 0x1e3   :  { %3434 = vmatprep.subr.bf16.mxu1 %v5570_v38  ;;  %v5580_v38 = vld [vmem:[#allocation6 + $0x208] ss:$16 sps:$4 sm:$0xff]  }
 0x1e5   :  { %3216 = vmatpush1.bf16.msra.mxu0 %v5565_v30 }
 0x1e6   :  { %3435 = vmatpush1.bf16.msra.mxu1 %v5568_v39  ;;  %3217 = vmatprep.subr.bf16.mxu0 %v5573_v22 }
 0x1e7   :  { %3436 = vmatprep.subr.bf16.mxu1 %v5576_v47 }
 0x1e9   :  { %3218 = vmatpush1.bf16.msra.mxu0 %v5571_v49 }
 0x1ea   :  { %3437 = vmatpush1.bf16.msra.mxu1 %v5574_v50  ;;  %3260 = vmatprep.subr.bf16.mxu0 %v5579_v4 }
 0x1eb   :  { %3479 = vmatprep.subr.bf16.mxu1 %v5582_v43  ;;  %v5585_v43 = vld [vmem:[#allocation6 + $0x224] ss:$16 sps:$4 sm:$0xff]  }
 0x25e   :  { %v1751_v36 = vpop.f32.mrb[16].mxu0  ;;  %v1897_v56 = vpop.f32.mrb[16].mxu1 }
 0x25f   :  { %v5034_v57 = vadd.f32 %v1751_v36, %v6193_v63  ;;  %v5050_v59 = vadd.f32 %v1897_v56, %v6197_v55  ;;  %v1753_v40 = vpop.f32.mrb[17].mxu0  ;;  %v1899_v45 = vpop.f32.mrb[17].mxu1  ;;  %v5588_v36 = vld [vmem:[#allocation6 + $0x22c] ss:$16 sps:$4 sm:$0xff]  }
 0x260   :  { %v5035_v35 = vadd.f32 %v1753_v40, %v6201_v51  ;;  %v5051_v48 = vadd.f32 %v1899_v45, %v6205_v15  ;;  %v1755_v54 = vpop.f32.mrb[18].mxu0  ;;  %v1901_v61 = vpop.f32.mrb[18].mxu1 }
 0x261   :  { %vm2066_vm0 = vcmp.ge.f32.partialorder %v5034_v57, 0.0  ;;  %v2106_v62 = vmul.f32 0.02, %v5034_v57  ;;  %vm2068_vm1 = vcmp.ge.f32.partialorder %v5050_v59, 0.0  ;;  %v2108_v1 = vmul.f32 0.02, %v5050_v59 }
 0x262   :  { %vm2067_vm2 = vcmp.ge.f32.partialorder %v5035_v35, 0.0  ;;  %v5036_v28 = vadd.f32 %v1755_v54, %v6193_v63  ;;  %v5052_v2 = vadd.f32 %v1901_v61, %v6197_v55  ;;  %v1757_v24 = vpop.f32.mrb[19].mxu0  ;;  %v1903_v46 = vpop.f32.mrb[19].mxu1  ;;  %v2107_v16 = vmul.f32 0.02, %v5035_v35 }
 0x263   :  { %v2109_v3 = vmul.f32 0.02, %v5051_v48  ;;  %v5037_v5 = vadd.f32 %v1757_v24, %v6201_v51  ;;  %v5053_v6 = vadd.f32 %v1903_v46, %v6205_v15  ;;  %v2146_v18 = vsel %vm2066_vm0, %v5034_v57, %v2106_v62  ;;  %v5586_v54 = vld [vmem:[#allocation6 + $0x228] ss:$16 sps:$4 sm:$0xff]  }
 0x264   :  { %vm2071_vm3 = vcmp.ge.f32.partialorder %v5036_v28, 0.0  ;;  %v2111_v7 = vmul.f32 0.02, %v5036_v28  ;;  %vm2073_vm4 = vcmp.ge.f32.partialorder %v5052_v2, 0.0  ;;  %v2113_v9 = vmul.f32 0.02, %v5052_v2 }
 0x265   :  { %vm2072_vm5 = vcmp.ge.f32.partialorder %v5037_v5, 0.0  ;;  %v2112_v8 = vmul.f32 0.02, %v5037_v5  ;;  %v2114_v12 = vmul.f32 0.02, %v5053_v6  ;;  %v2148_v10 = vsel %vm2068_vm1, %v5050_v59, %v2108_v1 }
 0x266   :  { %v2151_v11 = vsel %vm2071_vm3, %v5036_v28, %v2111_v7  ;;  %v2153_v14 = vsel %vm2073_vm4, %v5052_v2, %v2113_v9  ;;  %vm2074_vm6 = vcmp.ge.f32.partialorder %v5053_v6, 0.0  ;;  %v1761_v13 = vpop.f32.mrb[20].mxu0  ;;  %v1907_v17 = vpop.f32.mrb[20].mxu1  ;;  %vm2069_vm7 = vcmp.ge.f32.partialorder %v5051_v48, 0.0  ;;  %v5594_v7 = vld [vmem:[#allocation6 + $0x24c] ss:$16 sps:$4 sm:$0xff]  }
 0x267   :  { %v2186_v19 = vpack.c.bf16 %v2151_v11, %v2146_v18  ;;  %v6217_v20 = vpack.c.bf16 %v2153_v14, %v2148_v10  ;;  %v5038_v21 = vadd.f32 %v1761_v13, %v6193_v63  ;;  %v1763_v25 = vpop.f32.mrb[21].mxu0  ;;  %v1909_v26 = vpop.f32.mrb[21].mxu1  ;;  %v2152_v33 = vsel %vm2072_vm5, %v5037_v5, %v2112_v8  ;;  %v5589_v14 = vld [vmem:[#allocation6 + $0x240] ss:$16 sps:$4 sm:$0xff]   ;;  %v5592_v13 = vld [vmem:[#allocation6 + $0x248] ss:$16 sps:$4 sm:$0xff]  }
 0x268   :  { %v5039_v27 = vadd.f32 %v1763_v25, %v6201_v51  ;;  %v1765_v31 = vpop.f32.mrb[22].mxu0  ;;  %v1911_v32 = vpop.f32.mrb[22].mxu1  ;;  %v2154_v34 = vsel %vm2074_vm6, %v5053_v6, %v2114_v12  ;;  %v2147_v23 = vsel %vm2067_vm2, %v5035_v35, %v2107_v16  ;;  %v2149_v30 = vsel %vm2069_vm7, %v5051_v48, %v2109_v3  ;;  %v5583_v35 = vld [vmem:[#allocation6 + $0x220] ss:$16 sps:$4 sm:$0xff]   ;;  %v5591_v6 = vld [vmem:[#allocation6 + $0x244] ss:$16 sps:$4 sm:$0xff]  }
 0x269   :  { %v2116_v39 = vmul.f32 0.02, %v5038_v21  ;;  %v6224_v22 = vadd.f32 %v1907_v17, %v6197_v55  ;;  %v5040_v47 = vadd.f32 %v1765_v31, %v6193_v63  ;;  %v1767_v49 = vpop.f32.mrb[23].mxu0  ;;  %v1913_v50 = vpop.f32.mrb[23].mxu1  ;;  %v2187_v4 = vpack.c.bf16 %v2152_v33, %v2147_v23  ;;  %v5600_v25 = vld [vmem:[#allocation6 + $0x26c] ss:$16 sps:$4 sm:$0xff]  }
 0x26a   :  { %vm2076_vm8 = vcmp.ge.f32.partialorder %v5038_v21, 0.0  ;;  %v2117_v52 = vmul.f32 0.02, %v5039_v27  ;;  %v5041_v29 = vadd.f32 %v1767_v49, %v6201_v51  ;;  %v6228_v56 = vpack.c.bf16 %v2154_v34, %v2149_v30 }
 0x26b   :  { %vm2077_vm9 = vcmp.ge.f32.partialorder %v5039_v27, 0.0  ;;  %v6231_v57 = vadd.f32 %v1909_v26, %v6205_v15  ;;  %vm2081_vm10 = vcmp.ge.f32.partialorder %v5040_v47, 0.0  ;;  %v2121_v59 = vmul.f32 0.02, %v5040_v47  ;;  %3219 = vmatprep.mubr.bf16.mxu0 %v2187_v4  ;;  %3438 = vmatprep.mubr.bf16.mxu1 %v2187_v4 }
 0x26c   :  { %v6234_v40 = vadd.f32 %v1911_v32, %v6197_v55  ;;  %vm2082_vm11 = vcmp.ge.f32.partialorder %v5041_v29, 0.0  ;;  %v2122_v45 = vmul.f32 0.02, %v5041_v29  ;;  %3220 = vmatmul.mubr.bf16.vlgmr.msra.gmra.mrb[48].mxu0 %v2186_v19  ;;  %3439 = vmatmul.mubr.bf16.vlgmr.msra.gmra.mrb[48].mxu1 %v2186_v19  ;;  %v6237_v48 = vadd.f32 %v1913_v50, %v6205_v15 }
 0x26d   :  { %3261 = vmatpush1.bf16.msra.mxu0 %v5577_v37  ;;  %3480 = vmatpush1.bf16.msra.mxu1 %v5580_v38  ;;  %v2156_v1 = vsel %vm2076_vm8, %v5038_v21, %v2116_v39  ;;  %v2161_v28 = vsel %vm2081_vm10, %v5040_v47, %v2121_v59  ;;  %v805_v2 = vsub.s32 4, %v5997_v41  ;;  %v2157_v3 = vsel %vm2077_vm9, %v5039_v27, %v2117_v52  ;;  %v5597_v21 = vld [vmem:[#allocation6 + $0x264] ss:$16 sps:$4 sm:$0xff]   ;;  %v5595_v37 = vld [vmem:[#allocation6 + $0x260] ss:$16 sps:$4 sm:$0xff]  }
 0x26e   :  { %v1771_v61 = vpop.f32.mrb[24].mxu0  ;;  %v1917_v62 = vpop.f32.mrb[24].mxu1  ;;  %3262 = vmatprep.subr.bf16.mxu0 %v5585_v43  ;;  %3481 = vmatprep.subr.bf16.mxu1 %v5588_v36  ;;  %v2162_v5 = vsel %vm2082_vm11, %v5041_v29, %v2122_v45  ;;  %v2118_v9 = vmul.f32 0.02, %v6224_v22  ;;  %v2119_v18 = vmul.f32 0.02, %v6231_v57  ;;  %v2191_v10 = vpack.c.bf16 %v2161_v28, %v2156_v1 }
 0x26f   :  { %v6243_v24 = vadd.f32 %v1771_v61, %v6193_v63  ;;  %v1773_v46 = vpop.f32.mrb[25].mxu0  ;;  %v1919_v16 = vpop.f32.mrb[25].mxu1  ;;  %v2192_v41 = vpack.c.bf16 %v2162_v5, %v2157_v3  ;;  %vm2078_vm12 = vcmp.ge.f32.partialorder %v6224_v22, 0.0  ;;  %vm2079_vm13 = vcmp.ge.f32.partialorder %v6231_v57, 0.0  ;;  %v5598_v38 = vld [vmem:[#allocation6 + $0x268] ss:$16 sps:$4 sm:$0xff]  }
 0x270   :  { %v1775_v8 = vpop.f32.mrb[26].mxu0  ;;  %v1921_v12 = vpop.f32.mrb[26].mxu1  ;;  %v6252_v11 = vadd.f32 %v1917_v62, %v6197_v55  ;;  %v6255_v17 = vmul.f32 0.02, %v6234_v40  ;;  %v6258_v19 = vadd.f32 %v1773_v46, %v6201_v51  ;;  %v6261_v26 = vrot.slane %v6189_v53, %v805_v2  ;;  %v5603_v52 = vld [vmem:[#allocation6 + $0x284] ss:$16 sps:$4 sm:$0xff]  }
 0x271   :  { %3263 = vmatpush1.bf16.msra.mxu0 %v5583_v35  ;;  %3482 = vmatpush1.bf16.msra.mxu1 %v5586_v54  ;;  %v6264_v27 = vmul.f32 0.02, %v6237_v48  ;;  %v2126_v31 = vmul.f32 0.02, %v6243_v24  ;;  %v6268_v32 = vadd.f32 %v1919_v16, %v6205_v15  ;;  %v5044_v33 = vadd.f32 %v1775_v8, %v6193_v63  ;;  %v1777_v34 = vpop.f32.mrb[27].mxu0  ;;  %v1923_v23 = vpop.f32.mrb[27].mxu1 }
 0x272   :  { %3229 = vmatprep.mubr.bf16.mxu0 %v2192_v41  ;;  %3264 = vmatprep.subr.bf16.mxu0 %v5591_v6  ;;  %vm2083_vm14 = vcmp.ge.f32.partialorder %v6234_v40, 0.0  ;;  %vm2084_vm15 = vcmp.ge.f32.partialorder %v6237_v48, 0.0  ;;  %vm2086_vm0 = vcmp.ge.f32.partialorder %v6243_v24, 0.0  ;;  %v5045_v53 = vadd.f32 %v1777_v34, %v6201_v51  ;;  %v5606_v45 = vld [vmem:[#allocation6 + $0x28c] ss:$16 sps:$4 sm:$0xff]  }
 0x273   :  { %3448 = vmatprep.mubr.bf16.mxu1 %v2192_v41  ;;  %3483 = vmatprep.subr.bf16.mxu1 %v5594_v7  ;;  %v6278_v47 = vsel %vm2079_vm13, %v6231_v57, %v2119_v18  ;;  %v6283_v49 = vsel %vm2078_vm12, %v6224_v22, %v2118_v9  ;;  %v6286_v50 = vmul.f32 0.02, %v6252_v11  ;;  %vm2091_vm1 = vcmp.ge.f32.partialorder %v5044_v33, 0.0  ;;  %v5601_v5 = vld [vmem:[#allocation6 + $0x280] ss:$16 sps:$4 sm:$0xff]  }
 0x274   :  { %v2131_v4 = vmul.f32 0.02, %v5044_v33  ;;  %v6289_v43 = vadd.f32 %v1921_v12, %v6197_v55  ;;  %3230 = vmatmul.mubr.bf16.gmra.mrb[52].mxu0 %v2191_v10  ;;  %3449 = vmatmul.mubr.bf16.gmra.mrb[52].mxu1 %v2191_v10  ;;  %vm2087_vm2 = vcmp.ge.f32.partialorder %v6258_v19, 0.0  ;;  %v2127_v29 = vmul.f32 0.02, %v6258_v19 }
 0x275   :  { %vm2092_vm3 = vcmp.ge.f32.partialorder %v5045_v53, 0.0  ;;  %v2132_v36 = vmul.f32 0.02, %v5045_v53  ;;  %3265 = vmatpush1.bf16.msra.mxu0 %v5589_v14  ;;  %3484 = vmatpush1.bf16.msra.mxu1 %v5592_v13  ;;  %vm2089_vm4 = vcmp.ge.f32.partialorder %v6268_v32, 0.0  ;;  %v2166_v35 = vsel %vm2086_vm0, %v6243_v24, %v2126_v31  ;;  %v5604_v6 = vld [vmem:[#allocation6 + $0x288] ss:$16 sps:$4 sm:$0xff]  }
 0x276   :  { %v1781_v30 = vpop.f32.mrb[28].mxu0  ;;  %v1927_v39 = vpop.f32.mrb[28].mxu1  ;;  %3266 = vmatprep.subr.bf16.mxu0 %v5597_v21  ;;  %3485 = vmatprep.subr.bf16.mxu1 %v5600_v25  ;;  %v2171_v54 = vsel %vm2091_vm1, %v5044_v33, %v2131_v4  ;;  %vm2088_vm5 = vcmp.ge.f32.partialorder %v6252_v11, 0.0  ;;  %v6301_v61 = vadd.f32 %v1923_v23, %v6205_v15  ;;  %v6306_v16 = vmul.f32 0.02, %v6268_v32 }
 0x277   :  { %v5046_v22 = vadd.f32 %v1781_v30, %v6193_v63  ;;  %v1783_v57 = vpop.f32.mrb[29].mxu0  ;;  %v1929_v59 = vpop.f32.mrb[29].mxu1  ;;  %v2172_v2 = vsel %vm2092_vm3, %v5045_v53, %v2132_v36  ;;  %v2196_v46 = vpack.c.bf16 %v2171_v54, %v2166_v35  ;;  %vm2093_vm6 = vcmp.ge.f32.partialorder %v6289_v43, 0.0  ;;  %v5609_v13 = vld [vmem:[#allocation6 + $0x2a4] ss:$16 sps:$4 sm:$0xff]  }
 0x278   :  { %v5047_v62 = vadd.f32 %v1783_v57, %v6201_v51  ;;  %v1785_v1 = vpop.f32.mrb[30].mxu0  ;;  %v1931_v28 = vpop.f32.mrb[30].mxu1  ;;  %v6310_v24 = vadd.f32 %v1927_v39, %v6197_v55  ;;  %v6313_v3 = vadd.f32 %v1929_v59, %v6205_v15  ;;  %v6316_v7 = vmul.f32 0.02, %v6289_v43 }
 0x279   :  { %v2136_v9 = vmul.f32 0.02, %v5046_v22  ;;  %3267 = vmatpush1.bf16.msra.mxu0 %v5595_v37  ;;  %3486 = vmatpush1.bf16.msra.mxu1 %v5598_v38  ;;  %v2167_v8 = vsel %vm2087_vm2, %v6258_v19, %v2127_v29  ;;  %vm2096_vm7 = vcmp.ge.f32.partialorder %v5046_v22, 0.0  ;;  %v5048_v12 = vadd.f32 %v1785_v1, %v6193_v63  ;;  %v1787_v41 = vpop.f32.mrb[31].mxu0  ;;  %v1933_v10 = vpop.f32.mrb[31].mxu1 }
 0x27a   :  { %v2137_v18 = vmul.f32 0.02, %v5047_v62  ;;  %vm2097_vm8 = vcmp.ge.f32.partialorder %v5047_v62, 0.0  ;;  %v2197_v14 = vpack.c.bf16 %v2172_v2, %v2167_v8  ;;  %3268 = vmatprep.subr.bf16.mxu0 %v5603_v52  ;;  %3487 = vmatprep.subr.bf16.mxu1 %v5606_v45  ;;  %vm2094_vm9 = vcmp.ge.f32.partialorder %v6301_v61, 0.0  ;;  %v5612_v19 = vld [vmem:[#allocation6 + $0x2ac] ss:$16 sps:$4 sm:$0xff]  }
 0x27b   :  { %v2134_v21 = vmul.f32 0.02, %v6301_v61  ;;  %v5049_v25 = vadd.f32 %v1787_v41, %v6201_v51  ;;  %v6326_v31 = vadd.f32 %v1933_v10, %v6205_v15  ;;  %vm2098_vm10 = vcmp.ge.f32.partialorder %v6310_v24, 0.0  ;;  %v5607_v51 = vld [vmem:[#allocation6 + $0x2a0] ss:$16 sps:$4 sm:$0xff]  }
 0x27c   :  { %v6330_v63 = vmul.f32 0.02, %v6313_v3  ;;  %vm2101_vm11 = vcmp.ge.f32.partialorder %v5048_v12, 0.0  ;;  %v2141_v34 = vmul.f32 0.02, %v5048_v12  ;;  %v6333_v23 = vadd.f32 %v1931_v28, %v6197_v55  ;;  %3239 = vmatprep.mubr.bf16.mxu0 %v2197_v14  ;;  %3458 = vmatprep.mubr.bf16.mxu1 %v2197_v14 }
 0x27d   :  { %vm2102_vm12 = vcmp.ge.f32.partialorder %v5049_v25, 0.0  ;;  %v2142_v53 = vmul.f32 0.02, %v5049_v25  ;;  %3240 = vmatmul.mubr.bf16.gmra.mrb[56].mxu0 %v2196_v46  ;;  %3459 = vmatmul.mubr.bf16.gmra.mrb[56].mxu1 %v2196_v46  ;;  %v2177_v15 = vsel %vm2097_vm8, %v5047_v62, %v2137_v18  ;;  %v2176_v37 = vsel %vm2096_vm7, %v5046_v22, %v2136_v9  ;;  %v5610_v38 = vld [vmem:[#allocation6 + $0x2a8] ss:$16 sps:$4 sm:$0xff]  }
 0x27e   :  { %v4838_v33 = vpop.f32.mrb[32].mxu0  ;;  %vm2104_vm13 = vcmp.ge.f32.partialorder %v6326_v31, 0.0  ;;  %3269 = vmatpush1.bf16.msra.mxu0 %v5601_v5  ;;  %3488 = vmatpush1.bf16.msra.mxu1 %v5604_v6  ;;  %v2181_v55 = vsel %vm2101_vm11, %v5048_v12, %v2141_v34  ;;  %v2164_v4 = vsel %vm2084_vm15, %v6237_v48, %v6264_v27  ;;  %v2163_v52 = vsel %vm2083_vm14, %v6234_v40, %v6255_v17  ;;  %v5615_v45 = vld [vmem:[#allocation6 + $0x2c4] ss:$16 sps:$4 sm:$0xff]   ;;  %v5618_v27 = vld [vmem:[#allocation6 + $0x2cc] ss:$16 sps:$4 sm:$0xff]  }
 0x27f   :  { %v4878_v30 = vpop.f32.mrb[32].mxu1  ;;  %v4839_v39 = vpop.f32.mrb[33].mxu0  ;;  %v2144_v29 = vmul.f32 0.02, %v6326_v31  ;;  %3270 = vmatprep.subr.bf16.mxu0 %v5609_v13  ;;  %3489 = vmatprep.subr.bf16.mxu1 %v5612_v19  ;;  %v2182_v59 = vsel %vm2102_vm12, %v5049_v25, %v2142_v53  ;;  %v2201_v35 = vpack.c.bf16 %v2181_v55, %v2176_v37  ;;  %v6350_v28 = vpack.c.bf16 %v2164_v4, %v6278_v47  ;;  %v5613_v5 = vld [vmem:[#allocation6 + $0x2c0] ss:$16 sps:$4 sm:$0xff]  }
 0x280   :  { %v4840_v36 = vadd.f32 %v4839_v39, %v4838_v33  ;;  %v4879_v22 = vpop.f32.mrb[33].mxu1  ;;  %v4841_v57 = vpop.f32.mrb[34].mxu0  ;;  %v2202_v48 = vpack.c.bf16 %v2182_v59, %v2177_v15  ;;  %v6353_v40 = vpack.c.bf16 %v2163_v52, %v6283_v49  ;;  %v2169_v6 = vsel %vm2089_vm4, %v6268_v32, %v6306_v16  ;;  %v5616_v49 = vld [vmem:[#allocation6 + $0x2c8] ss:$16 sps:$4 sm:$0xff]   ;;  %v5621_v18 = vld [vmem:[#allocation6 + $0x2e4] ss:$16 sps:$4 sm:$0xff]  }
 0x281   :  { %v4880_v54 = vadd.f32 %v4879_v22, %v4878_v30  ;;  %v4881_v62 = vpop.f32.mrb[34].mxu1  ;;  %v4842_v1 = vpop.f32.mrb[35].mxu0  ;;  %v2174_v9 = vsel %vm2094_vm9, %v6301_v61, %v2134_v21  ;;  %vm2099_vm14 = vcmp.ge.f32.partialorder %v6313_v3, 0.0  ;;  %v2168_v12 = vsel %vm2088_vm5, %v6252_v11, %v6286_v50  ;;  %v5624_v61 = vld [vmem:[#allocation6 + $0x2ec] ss:$16 sps:$4 sm:$0xff]  }
 0x282   :  { %v1971_v17 = vadd.f32 %v4840_v36, %v6261_v26  ;;  %v4843_v2 = vadd.f32 %v4842_v1, %v4841_v57  ;;  %v4882_v46 = vpop.f32.mrb[35].mxu1  ;;  %3271 = vmatpush1.bf16.msra.mxu0 %v5607_v51  ;;  %3490 = vmatpush1.bf16.msra.mxu1 %v5610_v38  ;;  %v6364_v8 = vpack.c.bf16 %v2174_v9, %v2169_v6  ;;  %v2138_v32 = vmul.f32 0.02, %v6310_v24  ;;  %v5619_v11 = vld [vmem:[#allocation6 + $0x2e0] ss:$16 sps:$4 sm:$0xff]  }
 0x283   :  { %v4883_v47 = vadd.f32 %v4882_v46, %v4881_v62  ;;  %3249 = vmatprep.mubr.bf16.mxu0 %v2202_v48  ;;  %3272 = vmatprep.subr.bf16.mxu0 %v5615_v45  ;;  %v2173_v14 = vsel %vm2093_vm6, %v6289_v43, %v6316_v7  ;;  %vm2103_vm15 = vcmp.ge.f32.partialorder %v6333_v23, 0.0  ;;  %v2143_v13 = vmul.f32 0.02, %v6333_v23  ;;  %v5622_v43 = vld [vmem:[#allocation6 + $0x2e8] ss:$16 sps:$4 sm:$0xff]  }
 0x284   :  { %v2036_v16 = vadd.f32 %v4880_v54, %v1971_v17  ;;  %v1974_v41 = vadd.f32 %v4843_v2, %v6261_v26  ;;  %3468 = vmatprep.mubr.bf16.mxu1 %v2202_v48  ;;  %3491 = vmatprep.subr.bf16.mxu1 %v5618_v27  ;;  %v6378_v25 = vpack.c.bf16 %v2173_v14, %v2168_v12  ;;  %v5625_v54 = vld [vmem:[#allocation6 + $0x300] ss:$16 sps:$4 sm:$0xff]   ;;  %v5628_v62 = vld [vmem:[#allocation6 + $0x308] ss:$16 sps:$4 sm:$0xff]   ;;  %v5633_v1 = vld [vmem:[#allocation6 + $0x324] ss:$16 sps:$4 sm:$0xff]  }
 0x285   :  { %v2184_v19 = vsel %vm2104_vm13, %v6326_v31, %v2144_v29  ;;  %3250 = vmatmul.mubr.bf16.gmra.mrb[60].mxu0 %v2201_v35  ;;  %3469 = vmatmul.mubr.bf16.gmra.mrb[60].mxu1 %v2201_v35  ;;  %v2179_v15 = vsel %vm2099_vm14, %v6313_v3, %v6330_v63  ;;  %v5627_v31 = vld [vmem:[#allocation6 + $0x304] ss:$16 sps:$4 sm:$0xff]   ;;  %v5630_v29 = vld [vmem:[#allocation6 + $0x30c] ss:$16 sps:$4 sm:$0xff]   ;;  %v2178_v3 = vsel %vm2098_vm10, %v6310_v24, %v2138_v32  ;;  %v5631_v2 = vld [vmem:[#allocation6 + $0x320] ss:$16 sps:$4 sm:$0xff]  }
 0x286   :  { %v4844_v10 = vpop.f32.mrb[36].mxu0  ;;  %v2110_v33 = vmul.f32 0.02, %v2036_v16  ;;  %v2039_v34 = vadd.f32 %v4883_v47, %v1974_v41  ;;  %vm2070_vm0 = vcmp.ge.f32.partialorder %v2036_v16, 0.0  ;;  %3273 = vmatpush1.bf16.msra.mxu0 %v5613_v5  ;;  %3492 = vmatpush1.bf16.msra.mxu1 %v5616_v49  ;;  %v6387_v39 = vpack.c.bf16 %v2184_v19, %v2179_v15  ;;  %v5636_v48 = vld [vmem:[#allocation6 + $0x32c] ss:$16 sps:$4 sm:$0xff]  }
 0x287   :  { %v4884_v50 = vpop.f32.mrb[36].mxu1  ;;  %v4845_v21 = vpop.f32.mrb[37].mxu0  ;;  %3292 = vmatprep.mubr.bf16.mxu0 %v6228_v56  ;;  %3511 = vmatprep.mubr.bf16.mxu1 %v6228_v56  ;;  %v2183_v22 = vsel %vm2103_vm15, %v6333_v23, %v2143_v13  ;;  %v5634_v6 = vld [vmem:[#allocation6 + $0x328] ss:$16 sps:$4 sm:$0xff]   ;;  %v5639_v14 = vld [vmem:[#allocation6 + $0x344] ss:$16 sps:$4 sm:$0xff]  }
 0x288   :  { %v4846_v7 = vadd.f32 %v4845_v21, %v4844_v10  ;;  %v4885_v53 = vpop.f32.mrb[37].mxu1  ;;  %v4847_v51 = vpop.f32.mrb[38].mxu0  ;;  %vm2075_vm1 = vcmp.ge.f32.partialorder %v2039_v34, 0.0  ;;  %v2115_v55 = vmul.f32 0.02, %v2039_v34  ;;  %3274 = vmatprep.subr.bf16.mxu0 %v5621_v18  ;;  %3493 = vmatprep.subr.bf16.mxu1 %v5624_v61  ;;  %v2150_v57 = vsel %vm2070_vm0, %v2036_v16, %v2110_v33 }
 0x289   :  { %v4886_v37 = vadd.f32 %v4885_v53, %v4884_v50  ;;  %v4887_v38 = vpop.f32.mrb[38].mxu1  ;;  %v4848_v30 = vpop.f32.mrb[39].mxu0  ;;  %v6399_v45 = vpack.c.bf16 %v2183_v22, %v2178_v3  ;;  %v5642_v13 = vld [vmem:[#allocation6 + $0x34c] ss:$16 sps:$4 sm:$0xff]   ;;  %v5645_v53 = vld [vmem:[#allocation6 + $0x364] ss:$16 sps:$4 sm:$0xff]  }
 0x28a   :  { %v1979_v4 = vadd.f32 %v4846_v7, %v6261_v26  ;;  %v4888_v52 = vpop.f32.mrb[39].mxu1  ;;  %v4849_v63 = vadd.f32 %v4848_v30, %v4847_v51  ;;  %v2155_v59 = vsel %vm2075_vm1, %v2039_v34, %v2115_v55  ;;  %3275 = vmatpush1.bf16.msra.mxu0 %v5619_v11  ;;  %3494 = vmatpush1.bf16.msra.mxu1 %v5622_v43  ;;  %v5637_v43 = vld [vmem:[#allocation6 + $0x340] ss:$16 sps:$4 sm:$0xff]   ;;  %v5640_v7 = vld [vmem:[#allocation6 + $0x348] ss:$16 sps:$4 sm:$0xff]  }
 0x28b   :  { %v4889_v36 = vadd.f32 %v4888_v52, %v4887_v38  ;;  %v6401_v35 = vpack.c.bf16 %v2155_v59, %v2150_v57  ;;  %3276 = vmatprep.subr.bf16.mxu0 %v5627_v31  ;;  %3495 = vmatprep.subr.bf16.mxu1 %v5630_v29  ;;  %v5643_v3 = vld [vmem:[#allocation6 + $0x360] ss:$16 sps:$4 sm:$0xff]  }
 0x28c   :  { %v2044_v56 = vadd.f32 %v4886_v37, %v1979_v4  ;;  %v1982_v24 = vadd.f32 %v4849_v63, %v6261_v26  ;;  %v5648_v37 = vld [vmem:[#allocation6 + $0x36c] ss:$16 sps:$4 sm:$0xff]   ;;  %v5646_v63 = vld [vmem:[#allocation6 + $0x368] ss:$16 sps:$4 sm:$0xff]  }
 0x28e   :  { %v4850_v27 = vpop.f32.mrb[40].mxu0  ;;  %v2120_v23 = vmul.f32 0.02, %v2044_v56  ;;  %v2047_v17 = vadd.f32 %v4889_v36, %v1982_v24  ;;  %vm2080_vm2 = vcmp.ge.f32.partialorder %v2044_v56, 0.0  ;;  %3277 = vmatpush1.bf16.msra.mxu0 %v5625_v54  ;;  %3496 = vmatpush1.bf16.msra.mxu1 %v5628_v62  ;;  %v5651_v62 = vld [vmem:[#allocation6 + $0x384] ss:$16 sps:$4 sm:$0xff]  }
 0x28f   :  { %v4890_v46 = vpop.f32.mrb[40].mxu1  ;;  %v4851_v5 = vpop.f32.mrb[41].mxu0  ;;  %3278 = vmatprep.subr.bf16.mxu0 %v5633_v1  ;;  %3497 = vmatprep.subr.bf16.mxu1 %v5636_v48  ;;  %v5654_v1 = vld [vmem:[#allocation6 + $0x38c] ss:$16 sps:$4 sm:$0xff]  }
 0x290   :  { %v4852_v9 = vadd.f32 %v4851_v5, %v4850_v27  ;;  %v4891_v47 = vpop.f32.mrb[41].mxu1  ;;  %v4853_v49 = vpop.f32.mrb[42].mxu0  ;;  %vm2085_vm3 = vcmp.ge.f32.partialorder %v2047_v17, 0.0  ;;  %v2125_v18 = vmul.f32 0.02, %v2047_v17  ;;  %v2160_v50 = vsel %vm2080_vm2, %v2044_v56, %v2120_v23 }
 0x291   :  { %v4892_v12 = vadd.f32 %v4891_v47, %v4890_v46  ;;  %v4893_v32 = vpop.f32.mrb[42].mxu1  ;;  %v4854_v16 = vpop.f32.mrb[43].mxu0  ;;  %v5649_v46 = vld [vmem:[#allocation6 + $0x380] ss:$16 sps:$4 sm:$0xff]   ;;  %v5652_v5 = vld [vmem:[#allocation6 + $0x388] ss:$16 sps:$4 sm:$0xff]  }
 0x292   :  { %v1987_v41 = vadd.f32 %v4852_v9, %v6261_v26  ;;  %v4855_v61 = vadd.f32 %v4854_v16, %v4853_v49  ;;  %v4894_v10 = vpop.f32.mrb[43].mxu1  ;;  %v2165_v21 = vsel %vm2085_vm3, %v2047_v17, %v2125_v18  ;;  %3279 = vmatpush1.bf16.msra.mxu0 %v5631_v2  ;;  %3498 = vmatpush1.bf16.msra.mxu1 %v5634_v6  ;;  %v5657_v47 = vld [vmem:[#allocation6 + $0x3a4] ss:$16 sps:$4 sm:$0xff]   ;;  %v5660_v49 = vld [vmem:[#allocation6 + $0x3ac] ss:$16 sps:$4 sm:$0xff]  }
 0x293   :  { %v4895_v11 = vadd.f32 %v4894_v10, %v4893_v32  ;;  %v6408_v34 = vpack.c.bf16 %v2165_v21, %v2160_v50  ;;  %3280 = vmatprep.subr.bf16.mxu0 %v5639_v14  ;;  %3499 = vmatprep.subr.bf16.mxu1 %v5642_v13  ;;  %v5658_v32 = vld [vmem:[#allocation6 + $0x3a8] ss:$16 sps:$4 sm:$0xff]   ;;  %v5666_v16 = vld [vmem:[#allocation6 + $0x3cc] ss:$16 sps:$4 sm:$0xff]   ;;  %v5661_v14 = vld [vmem:[#allocation6 + $0x3c0] ss:$16 sps:$4 sm:$0xff]  }
 0x294   :  { %v2052_v19 = vadd.f32 %v4892_v12, %v1987_v41  ;;  %v1990_v33 = vadd.f32 %v4855_v61, %v6261_v26  ;;  %v5655_v12 = vld [vmem:[#allocation6 + $0x3a0] ss:$16 sps:$4 sm:$0xff]   ;;  %v5664_v13 = vld [vmem:[#allocation6 + $0x3c8] ss:$16 sps:$4 sm:$0xff]   ;;  %v5672_v50 = vld [vmem:[#allocation6 + $0x3ec] ss:$16 sps:$4 sm:$0xff]  }
 0x295   :  { %v5667_v21 = vld [vmem:[#allocation6 + $0x3e0] ss:$16 sps:$4 sm:$0xff]  }
 0x296   :  { %vm2090_vm4 = vcmp.ge.f32.partialorder %v2052_v19, 0.0  ;;  %v2130_v51 = vmul.f32 0.02, %v2052_v19  ;;  %v2055_v15 = vadd.f32 %v4895_v11, %v1990_v33  ;;  %v4856_v38 = vpop.f32.mrb[44].mxu0  ;;  %3281 = vmatpush1.bf16.msra.mxu0 %v5637_v43  ;;  %3500 = vmatpush1.bf16.msra.mxu1 %v5640_v7  ;;  %v5669_v11 = vld [vmem:[#allocation6 + $0x3e4] ss:$16 sps:$4 sm:$0xff]  }
 0x297   :  { %v4896_v30 = vpop.f32.mrb[44].mxu1  ;;  %v4857_v31 = vpop.f32.mrb[45].mxu0  ;;  %3282 = vmatprep.subr.bf16.mxu0 %v5645_v53  ;;  %3501 = vmatprep.subr.bf16.mxu1 %v5648_v37  ;;  %v5675_v33 = vld [vmem:[#allocation6 + $0x404] ss:$16 sps:$4 sm:$0xff]   ;;  %v5678_v43 = vld [vmem:[#allocation6 + $0x40c] ss:$16 sps:$4 sm:$0xff]  }
 0x298   :  { %vm2095_vm5 = vcmp.ge.f32.partialorder %v2055_v15, 0.0  ;;  %v2135_v55 = vmul.f32 0.02, %v2055_v15  ;;  %v4858_v4 = vadd.f32 %v4857_v31, %v4856_v38  ;;  %v4897_v52 = vpop.f32.mrb[45].mxu1  ;;  %v4859_v29 = vpop.f32.mrb[46].mxu0  ;;  %v2170_v59 = vsel %vm2090_vm4, %v2052_v19, %v2130_v51 }
 0x299   :  { %v4898_v36 = vadd.f32 %v4897_v52, %v4896_v30  ;;  %v4899_v22 = vpop.f32.mrb[46].mxu1  ;;  %v4860_v57 = vpop.f32.mrb[47].mxu0  ;;  %v5670_v19 = vld [vmem:[#allocation6 + $0x3e8] ss:$16 sps:$4 sm:$0xff]   ;;  %v5673_v7 = vld [vmem:[#allocation6 + $0x400] ss:$16 sps:$4 sm:$0xff]  }
 0x29a   :  { %v1995_v56 = vadd.f32 %v4858_v4, %v6261_v26  ;;  %v4861_v24 = vadd.f32 %v4860_v57, %v4859_v29  ;;  %v4900_v54 = vpop.f32.mrb[47].mxu1  ;;  %v2175_v48 = vsel %vm2095_vm5, %v2055_v15, %v2135_v55  ;;  %3283 = vmatpush1.bf16.msra.mxu0 %v5643_v3  ;;  %3502 = vmatpush1.bf16.msra.mxu1 %v5646_v63  ;;  %v5676_v53 = vld [vmem:[#allocation6 + $0x408] ss:$16 sps:$4 sm:$0xff]   ;;  %v5681_v51 = vld [vmem:[#allocation6 + $0x424] ss:$16 sps:$4 sm:$0xff]  }
 0x29b   :  { %v4901_v27 = vadd.f32 %v4900_v54, %v4899_v22  ;;  %v6413_v23 = vpack.c.bf16 %v2175_v48, %v2170_v59  ;;  %3284 = vmatprep.subr.bf16.mxu0 %v5651_v62  ;;  %3503 = vmatprep.subr.bf16.mxu1 %v5654_v1  ;;  %v5684_v15 = vld [vmem:[#allocation6 + $0x42c] ss:$16 sps:$4 sm:$0xff]   ;;  %v5679_v37 = vld [vmem:[#allocation6 + $0x420] ss:$16 sps:$4 sm:$0xff]   ;;  %v5682_v38 = vld [vmem:[#allocation6 + $0x428] ss:$16 sps:$4 sm:$0xff]  }
 0x29c   :  { %v2060_v17 = vadd.f32 %v4898_v36, %v1995_v56  ;;  %v1998_v2 = vadd.f32 %v4861_v24, %v6261_v26  ;;  %v5663_v26 = vld [vmem:[#allocation6 + $0x3c4] ss:$16 sps:$4 sm:$0xff]   ;;  %v5690_v31 = vld [vmem:[#allocation6 + $0x44c] ss:$16 sps:$4 sm:$0xff]   ;;  %v5685_v55 = vld [vmem:[#allocation6 + $0x440] ss:$16 sps:$4 sm:$0xff]  }
 0x29d   :  { %v5687_v30 = vld [vmem:[#allocation6 + $0x444] ss:$16 sps:$4 sm:$0xff]   ;;  %v5688_v4 = vld [vmem:[#allocation6 + $0x448] ss:$16 sps:$4 sm:$0xff]   ;;  %v5702_v63 = vld [vmem:[#allocation6 + $0x48c] ss:$16 sps:$4 sm:$0xff]  }
 0x29e   :  { %v2140_v6 = vmul.f32 0.02, %v2060_v17  ;;  %v2063_v9 = vadd.f32 %v4901_v27, %v1998_v2  ;;  %vm2100_vm6 = vcmp.ge.f32.partialorder %v2060_v17, 0.0  ;;  %3285 = vmatpush1.bf16.msra.mxu0 %v5649_v46  ;;  %3504 = vmatpush1.bf16.msra.mxu1 %v5652_v5  ;;  %v5693_v52 = vld [vmem:[#allocation6 + $0x464] ss:$16 sps:$4 sm:$0xff]   ;;  %v5725_v5 = vld [vmem:[#allocation7 + $0x48] sm:$0xff]  }
 0x29f   :  { %3286 = vmatprep.subr.bf16.mxu0 %v5657_v47  ;;  %3505 = vmatprep.subr.bf16.mxu1 %v5660_v49  ;;  %v5694_v29 = vld [vmem:[#allocation6 + $0x468] ss:$16 sps:$4 sm:$0xff]   ;;  %v5699_v3 = vld [vmem:[#allocation6 + $0x484] ss:$16 sps:$4 sm:$0xff]   ;;  %v5697_v36 = vld [vmem:[#allocation6 + $0x480] ss:$16 sps:$4 sm:$0xff]  }
 0x2a0   :  { %vm2105_vm7 = vcmp.ge.f32.partialorder %v2063_v9, 0.0  ;;  %v2145_v18 = vmul.f32 0.02, %v2063_v9  ;;  %v2180_v41 = vsel %vm2100_vm6, %v2060_v17, %v2140_v6  ;;  %v5700_v22 = vld [vmem:[#allocation6 + $0x488] ss:$16 sps:$4 sm:$0xff]   ;;  %v5721_v27 = vld [vmem:[#allocation7 + $0x40] sm:$0xff]  }
 0x2a1   :  { %v5705_v57 = vld [vmem:[#allocation6 + $0x4a4] ss:$16 sps:$4 sm:$0xff]   ;;  %v5706_v59 = vld [vmem:[#allocation6 + $0x4a8] ss:$16 sps:$4 sm:$0xff]   ;;  %v5714_v24 = vld [vmem:[#allocation6 + $0x4cc] ss:$16 sps:$4 sm:$0xff]  }
 0x2a2   :  { %v2185_v61 = vsel %vm2105_vm7, %v2063_v9, %v2145_v18  ;;  %3287 = vmatpush1.bf16.msra.mxu0 %v5655_v12  ;;  %3506 = vmatpush1.bf16.msra.mxu1 %v5658_v32  ;;  %v5711_v56 = vld [vmem:[#allocation6 + $0x4c4] ss:$16 sps:$4 sm:$0xff]   ;;  %v5709_v54 = vld [vmem:[#allocation6 + $0x4c0] ss:$16 sps:$4 sm:$0xff]   ;;  %v5712_v62 = vld [vmem:[#allocation6 + $0x4c8] ss:$16 sps:$4 sm:$0xff]  }
 0x2a3   :  { %v6416_v10 = vpack.c.bf16 %v2185_v61, %v2180_v41  ;;  %3288 = vmatprep.subr.bf16.mxu0 %v5663_v26  ;;  %3507 = vmatprep.subr.bf16.mxu1 %v5666_v16  ;;  %v5717_v1 = vld [vmem:[#allocation6 + $0x4e4] ss:$16 sps:$4 sm:$0xff]   ;;  %v5718_v48 = vld [vmem:[#allocation6 + $0x4e8] ss:$16 sps:$4 sm:$0xff]  }
 0x2a4   :  { %v5722_v17 = vld [vmem:[#allocation7 + $0xc0] sm:$0xff]   ;;  %v5727_v6 = vld [vmem:[#allocation7 + $0x8] sm:$0xff]   ;;  %v5729_v47 = vld [vmem:[#allocation7 + $0x50] sm:$0xff]  }
 0x2a5   :  { %v5723_v2 = vld [vmem:[#allocation7] sm:$0xff]   ;;  %v5728_v9 = vld [vmem:[#allocation7 + $0x88] sm:$0xff]   ;;  %v5730_v49 = vld [vmem:[#allocation7 + $0xd0] sm:$0xff]  }
 0x2a6   :  { %3289 = vmatpush1.bf16.msra.mxu0 %v5661_v14  ;;  %3508 = vmatpush1.bf16.msra.mxu1 %v5664_v13  ;;  %v5724_v46 = vld [vmem:[#allocation7 + $0x80] sm:$0xff]   ;;  %v5731_v18 = vld [vmem:[#allocation7 + $0x10] sm:$0xff]   ;;  %v5733_v32 = vld [vmem:[#allocation7 + $0x58] sm:$0xff]  }
 0x2a7   :  { %3290 = vmatprep.subr.bf16.mxu0 %v5669_v11  ;;  %3509 = vmatprep.subr.bf16.mxu1 %v5672_v50  ;;  %v5732_v12 = vld [vmem:[#allocation7 + $0x90] sm:$0xff]   ;;  %v5735_v26 = vld [vmem:[#allocation7 + $0x18] sm:$0xff]   ;;  %v5737_v41 = vld [vmem:[#allocation7 + $0x60] sm:$0xff]  }
 0x2a8   :  { %v5736_v16 = vld [vmem:[#allocation7 + $0x98] sm:$0xff]   ;;  %v5738_v61 = vld [vmem:[#allocation7 + $0xe0] sm:$0xff]   ;;  %v5742_v11 = vld [vmem:[#allocation7 + $0xe8] sm:$0xff]  }
 0x2a9   :  { %v5739_v14 = vld [vmem:[#allocation7 + $0x20] sm:$0xff]   ;;  %v5743_v50 = vld [vmem:[#allocation7 + $0x28] sm:$0xff]  }
 0x2aa   :  { %3291 = vmatpush1.bf16.msra.mxu0 %v5667_v21  ;;  %3510 = vmatpush1.bf16.msra.mxu1 %v5670_v19  ;;  %v5740_v13 = vld [vmem:[#allocation7 + $0xa0] sm:$0xff]   ;;  %v5744_v21 = vld [vmem:[#allocation7 + $0xa8] sm:$0xff]   ;;  %v5745_v19 = vld [vmem:[#allocation7 + $0x70] sm:$0xff]  }
 0x2ab   :  { %3333 = vmatprep.subr.bf16.mxu0 %v5675_v33  ;;  %3552 = vmatprep.subr.bf16.mxu1 %v5678_v43  ;;  %v5747_v33 = vld [vmem:[#allocation7 + $0x30] sm:$0xff]  }
 0x2ac   :  { %v5748_v43 = vld [vmem:[#allocation7 + $0xb0] sm:$0xff]  }
 0x2ad   :  { %3293 = vmatmul.mubr.bf16.vlgmr.msra.gmra.mrb[48].mxu0 %v6217_v20  ;;  %3512 = vmatmul.mubr.bf16.vlgmr.msra.gmra.mrb[48].mxu1 %v6217_v20  ;;  %v5696_v20 = vld [vmem:[#allocation6 + $0x46c] ss:$16 sps:$4 sm:$0xff]  }
 0x2ae   :  { %3302 = vmatprep.mubr.bf16.mxu0 %v6350_v28  ;;  %3334 = vmatpush1.bf16.msra.mxu0 %v5673_v7  ;;  %v5749_v7 = vld [vmem:[#allocation7 + $0x78] sm:$0xff]  }
 0x2af   :  { %3521 = vmatprep.mubr.bf16.mxu1 %v6350_v28  ;;  %3553 = vmatpush1.bf16.msra.mxu1 %v5676_v53  ;;  %v5691_v28 = vld [vmem:[#allocation6 + $0x460] ss:$16 sps:$4 sm:$0xff]   ;;  %v5751_v53 = vld [vmem:[#allocation7 + $0x38] sm:$0xff]  }
 0x2b0   :  { %3335 = vmatprep.subr.bf16.mxu0 %v5681_v51  ;;  %3554 = vmatprep.subr.bf16.mxu1 %v5684_v15  ;;  %v4425_v51 = vld [vmem:[%s6648_s6 + $0x2] ss:$8 sm:$0xf] }
 0x2b1   :  { %v6452_v15 = vrot.slane %v4425_v51, %v6000_v42 }
 0x2b2   :  { %3336 = vmatpush1.bf16.msra.mxu0 %v5679_v37  ;;  %v6455_v37 = vrot.slane %v4425_v51, %v6019_v58 }
 0x2b3   :  { %3555 = vmatpush1.bf16.msra.mxu1 %v5682_v38  ;;  %3337 = vmatprep.subr.bf16.mxu0 %v5687_v30  ;;  %v6458_v38 = vrot.slane %v4425_v51, %v6006_v44  ;;  %v6461_v30 = vrot.slane %v4425_v51, %v6022_v60 }
 0x2b4   :  { %3556 = vmatprep.subr.bf16.mxu1 %v5690_v31 }
 0x2b5   :  { %3303 = vmatmul.mubr.bf16.gmra.mrb[52].mxu0 %v6353_v40  ;;  %3522 = vmatmul.mubr.bf16.gmra.mrb[52].mxu1 %v6353_v40  ;;  %v5708_v40 = vld [vmem:[#allocation6 + $0x4ac] ss:$16 sps:$4 sm:$0xff]  }
 0x2b6   :  { %3312 = vmatprep.mubr.bf16.mxu0 %v6364_v8  ;;  %3338 = vmatpush1.bf16.msra.mxu0 %v5685_v55 }
 0x2b7   :  { %3531 = vmatprep.mubr.bf16.mxu1 %v6364_v8  ;;  %3557 = vmatpush1.bf16.msra.mxu1 %v5688_v4  ;;  %v5703_v8 = vld [vmem:[#allocation6 + $0x4a0] ss:$16 sps:$4 sm:$0xff]  }
 0x2b8   :  { %3339 = vmatprep.subr.bf16.mxu0 %v5693_v52  ;;  %3558 = vmatprep.subr.bf16.mxu1 %v5696_v20 }
 0x2ba   :  { %3340 = vmatpush1.bf16.msra.mxu0 %v5691_v28 }
 0x2bb   :  { %3559 = vmatpush1.bf16.msra.mxu1 %v5694_v29  ;;  %3341 = vmatprep.subr.bf16.mxu0 %v5699_v3 }
 0x2bc   :  { %3560 = vmatprep.subr.bf16.mxu1 %v5702_v63 }
 0x2bd   :  { %3313 = vmatmul.mubr.bf16.gmra.mrb[56].mxu0 %v6378_v25  ;;  %3532 = vmatmul.mubr.bf16.gmra.mrb[56].mxu1 %v6378_v25  ;;  %v5720_v25 = vld [vmem:[#allocation6 + $0x4ec] ss:$16 sps:$4 sm:$0xff]  }
 0x2be   :  { %3322 = vmatprep.mubr.bf16.mxu0 %v6387_v39  ;;  %3342 = vmatpush1.bf16.msra.mxu0 %v5697_v36 }
 0x2bf   :  { %3541 = vmatprep.mubr.bf16.mxu1 %v6387_v39  ;;  %3561 = vmatpush1.bf16.msra.mxu1 %v5700_v22  ;;  %v5715_v39 = vld [vmem:[#allocation6 + $0x4e0] ss:$16 sps:$4 sm:$0xff]  }
 0x2c0   :  { %3343 = vmatprep.subr.bf16.mxu0 %v5705_v57  ;;  %3562 = vmatprep.subr.bf16.mxu1 %v5708_v40 }
 0x2c2   :  { %3344 = vmatpush1.bf16.msra.mxu0 %v5703_v8 }
 0x2c3   :  { %3563 = vmatpush1.bf16.msra.mxu1 %v5706_v59  ;;  %3345 = vmatprep.subr.bf16.mxu0 %v5711_v56 }
 0x2c4   :  { %3564 = vmatprep.subr.bf16.mxu1 %v5714_v24 }
 0x2c5   :  { %3323 = vmatmul.mubr.bf16.gmra.mrb[60].mxu0 %v6399_v45  ;;  %3542 = vmatmul.mubr.bf16.gmra.mrb[60].mxu1 %v6399_v45  ;;  %v5726_v45 = vld [vmem:[#allocation7 + $0xc8] sm:$0xff]  }
 0x2c6   :  { %3346 = vmatpush1.bf16.msra.mxu0 %v5709_v54  ;;  %3365 = vmatprep.mubr.bf16.mxu0 %v5881_v0 }
 0x2c7   :  { %3565 = vmatpush1.bf16.msra.mxu1 %v5712_v62  ;;  %3347 = vmatprep.subr.bf16.mxu0 %v5717_v1 }
 0x2c8   :  { %3566 = vmatprep.subr.bf16.mxu1 %v5720_v25  ;;  %3584 = vmatprep.mubr.bf16.mxu1 %v5881_v0 }
 0x2ca   :  { %3348 = vmatpush1.bf16.msra.mxu0 %v5715_v39 }
 0x2cb   :  { %3567 = vmatpush1.bf16.msra.mxu1 %v5718_v48  ;;  %4902 = vmatprep.subr.bf16.mxu0 %v5721_v27 }
 0x2cc   :  { %4942 = vmatprep.subr.bf16.mxu1 %v5722_v17 }
 0x2cd   :  { %3366 = vmatmul.mubr.bf16.vlgmr.msra.gmra.mrb[48].mxu0 %v6401_v35 }
 0x2ce   :  { %3585 = vmatmul.mubr.bf16.vlgmr.msra.gmra.mrb[48].mxu1 %v6401_v35  ;;  %3375 = vmatprep.mubr.bf16.mxu0 %v5881_v0  ;;  %v5734_v35 = vld [vmem:[#allocation7 + $0xd8] sm:$0xff]  }
 0x2cf   :  { %3594 = vmatprep.mubr.bf16.mxu1 %v5881_v0  ;;  %4903 = vmatpush3.bf16.msra.mxu0 %v5723_v2 }
 0x2d0   :  { %4943 = vmatpush3.bf16.msra.mxu1 %v5724_v46  ;;  %4904 = vmatprep.subr.bf16.mxu0 %v5725_v5 }
 0x2d1   :  { %4944 = vmatprep.subr.bf16.mxu1 %v5726_v45 }
 0x2d3   :  { %4905 = vmatpush3.bf16.msra.mxu0 %v5727_v6 }
 0x2d4   :  { %4945 = vmatpush3.bf16.msra.mxu1 %v5728_v9  ;;  %4906 = vmatprep.subr.bf16.mxu0 %v5729_v47 }
 0x2d5   :  { %3376 = vmatmul.mubr.bf16.gmra.mrb[52].mxu0 %v6408_v34  ;;  %4946 = vmatprep.subr.bf16.mxu1 %v5730_v49 }
 0x2d6   :  { %3595 = vmatmul.mubr.bf16.gmra.mrb[52].mxu1 %v6408_v34  ;;  %3385 = vmatprep.mubr.bf16.mxu0 %v5881_v0  ;;  %v5741_v34 = vld [vmem:[#allocation7 + $0x68] sm:$0xff]  }
 0x2d7   :  { %3604 = vmatprep.mubr.bf16.mxu1 %v5881_v0  ;;  %4907 = vmatpush3.bf16.msra.mxu0 %v5731_v18 }
 0x2d8   :  { %4947 = vmatpush3.bf16.msra.mxu1 %v5732_v12  ;;  %4908 = vmatprep.subr.bf16.mxu0 %v5733_v32 }
 0x2d9   :  { %4948 = vmatprep.subr.bf16.mxu1 %v5734_v35 }
 0x2db   :  { %4909 = vmatpush3.bf16.msra.mxu0 %v5735_v26 }
 0x2dc   :  { %4949 = vmatpush3.bf16.msra.mxu1 %v5736_v16  ;;  %4910 = vmatprep.subr.bf16.mxu0 %v5737_v41 }
 0x2dd   :  { %3386 = vmatmul.mubr.bf16.gmra.mrb[56].mxu0 %v6413_v23  ;;  %4950 = vmatprep.subr.bf16.mxu1 %v5738_v61 }
 0x2de   :  { %3605 = vmatmul.mubr.bf16.gmra.mrb[56].mxu1 %v6413_v23  ;;  %3395 = vmatprep.mubr.bf16.mxu0 %v5881_v0  ;;  %v5746_v23 = vld [vmem:[#allocation7 + $0xf0] sm:$0xff]  }
 0x2df   :  { %3614 = vmatprep.mubr.bf16.mxu1 %v5881_v0  ;;  %4911 = vmatpush3.bf16.msra.mxu0 %v5739_v14  ;;  %v5750_v0 = vld [vmem:[#allocation7 + $0xf8] sm:$0xff]  }
 0x2e0   :  { %4951 = vmatpush3.bf16.msra.mxu1 %v5740_v13  ;;  %4912 = vmatprep.subr.bf16.mxu0 %v5741_v34 }
 0x2e1   :  { %4952 = vmatprep.subr.bf16.mxu1 %v5742_v11 }
 0x2e3   :  { %4913 = vmatpush3.bf16.msra.mxu0 %v5743_v50 }
 0x2e4   :  { %4953 = vmatpush3.bf16.msra.mxu1 %v5744_v21  ;;  %4914 = vmatprep.subr.bf16.mxu0 %v5745_v19 }
 0x2e5   :  { %3396 = vmatmul.mubr.bf16.gmra.mrb[60].mxu0 %v6416_v10  ;;  %4954 = vmatprep.subr.bf16.mxu1 %v5746_v23 }
 0x2e6   :  { %3615 = vmatmul.mubr.bf16.gmra.mrb[60].mxu1 %v6416_v10  ;;  %v5752_v10 = vld [vmem:[#allocation7 + $0xb8] sm:$0xff]  }
 0x2e7   :  { %4915 = vmatpush3.bf16.msra.mxu0 %v5747_v33 }
 0x2e8   :  { %4955 = vmatpush3.bf16.msra.mxu1 %v5748_v43  ;;  %4916 = vmatprep.subr.bf16.mxu0 %v5749_v7 }
 0x2e9   :  { %4956 = vmatprep.subr.bf16.mxu1 %v5750_v0 }
 0x2eb   :  { %4917 = vmatpush3.bf16.msra.mxu0 %v5751_v53 }
 0x2ec   :  { %4957 = vmatpush3.bf16.msra.mxu1 %v5752_v10 }
 0x3a0   :  { %v3367_v31 = vpop.f32.mrb[48].mxu0 }
 0x3a1   :  { %v5066_v55 = vadd.f32 %v3367_v31, %v6452_v15  ;;  %v3586_v4 = vpop.f32.mrb[48].mxu1  ;;  %v3369_v52 = vpop.f32.mrb[49].mxu0 }
 0x3a2   :  { %v5082_v20 = vadd.f32 %v3586_v4, %v6455_v37  ;;  %v5067_v28 = vadd.f32 %v3369_v52, %v6458_v38  ;;  %v3588_v42 = vpop.f32.mrb[49].mxu1  ;;  %v3371_v29 = vpop.f32.mrb[50].mxu0 }
 0x3a3   :  { %v3657_v3 = vmul.f32 0.02, %v5066_v55  ;;  %v5083_v58 = vadd.f32 %v3588_v42, %v6461_v30  ;;  %v5068_v44 = vadd.f32 %v3371_v29, %v6452_v15  ;;  %v3590_v63 = vpop.f32.mrb[50].mxu1  ;;  %v3373_v36 = vpop.f32.mrb[51].mxu0  ;;  %vm3625_vm8 = vcmp.ge.f32.partialorder %v5066_v55, 0.0 }
 0x3a4   :  { %vm3627_vm9 = vcmp.ge.f32.partialorder %v5082_v20, 0.0  ;;  %v3659_v60 = vmul.f32 0.02, %v5082_v20  ;;  %vm3626_vm10 = vcmp.ge.f32.partialorder %v5067_v28, 0.0  ;;  %v3592_v22 = vpop.f32.mrb[51].mxu1  ;;  %v5084_v8 = vadd.f32 %v3590_v63, %v6455_v37 }
 0x3a5   :  { %vm3629_vm11 = vcmp.ge.f32.partialorder %v5068_v44, 0.0  ;;  %v3658_v57 = vmul.f32 0.02, %v5067_v28  ;;  %v3661_v40 = vmul.f32 0.02, %v5068_v44  ;;  %v5069_v59 = vadd.f32 %v3373_v36, %v6458_v38 }
 0x3a6   :  { %v3689_v56 = vsel %vm3625_vm8, %v5066_v55, %v3657_v3  ;;  %vm3628_vm12 = vcmp.ge.f32.partialorder %v5083_v58, 0.0  ;;  %v3660_v24 = vmul.f32 0.02, %v5083_v58  ;;  %v5085_v54 = vadd.f32 %v3592_v22, %v6461_v30 }
 0x3a7   :  { %v3693_v62 = vsel %vm3629_vm11, %v5068_v44, %v3661_v40  ;;  %vm3631_vm13 = vcmp.ge.f32.partialorder %v5084_v8, 0.0  ;;  %v3663_v1 = vmul.f32 0.02, %v5084_v8  ;;  %vm3630_vm14 = vcmp.ge.f32.partialorder %v5069_v59, 0.0 }
 0x3a8   :  { %v3377_v25 = vpop.f32.mrb[52].mxu0  ;;  %v3691_v39 = vsel %vm3627_vm9, %v5082_v20, %v3659_v60  ;;  %v3721_v48 = vpack.c.bf16 %v3693_v62, %v3689_v56  ;;  %v3662_v27 = vmul.f32 0.02, %v5069_v59  ;;  %vm3632_vm15 = vcmp.ge.f32.partialorder %v5085_v54, 0.0 }
 0x3a9   :  { %v3596_v17 = vpop.f32.mrb[52].mxu1  ;;  %v3695_v2 = vsel %vm3631_vm13, %v5084_v8, %v3663_v1  ;;  %v3664_v46 = vmul.f32 0.02, %v5085_v54  ;;  %v5070_v5 = vadd.f32 %v3377_v25, %v6452_v15  ;;  %v3379_v6 = vpop.f32.mrb[53].mxu0  ;;  %v3690_v16 = vsel %vm3626_vm10, %v5067_v28, %v3658_v57 }
 0x3aa   :  { %v5086_v45 = vadd.f32 %v3596_v17, %v6455_v37  ;;  %v3598_v9 = vpop.f32.mrb[53].mxu1  ;;  %v3723_v47 = vpack.c.bf16 %v3695_v2, %v3691_v39  ;;  %v5071_v49 = vadd.f32 %v3379_v6, %v6458_v38  ;;  %v3381_v12 = vpop.f32.mrb[54].mxu0  ;;  %v3694_v35 = vsel %vm3630_vm14, %v5069_v59, %v3662_v27 }
 0x3ab   :  { %v5087_v18 = vadd.f32 %v3598_v9, %v6461_v30  ;;  %v3600_v32 = vpop.f32.mrb[54].mxu1  ;;  %vm3633_vm0 = vcmp.ge.f32.partialorder %v5070_v5, 0.0  ;;  %v3665_v26 = vmul.f32 0.02, %v5070_v5  ;;  %v3692_v41 = vsel %vm3628_vm12, %v5083_v58, %v3660_v24  ;;  %v3383_v11 = vpop.f32.mrb[55].mxu0 }
 0x3ac   :  { %vm3635_vm1 = vcmp.ge.f32.partialorder %v5086_v45, 0.0  ;;  %vm3634_vm2 = vcmp.ge.f32.partialorder %v5071_v49, 0.0  ;;  %v3666_v61 = vmul.f32 0.02, %v5071_v49  ;;  %v5072_v13 = vadd.f32 %v3381_v12, %v6452_v15  ;;  %v3602_v50 = vpop.f32.mrb[55].mxu1 }
 0x3ad   :  { %v3668_v14 = vmul.f32 0.02, %v5087_v18  ;;  %v5088_v34 = vadd.f32 %v3600_v32, %v6455_v37  ;;  %v3722_v21 = vpack.c.bf16 %v3694_v35, %v3690_v16  ;;  %v3696_v19 = vsel %vm3632_vm15, %v5085_v54, %v3664_v46 }
 0x3ae   :  { %vm3636_vm3 = vcmp.ge.f32.partialorder %v5087_v18, 0.0  ;;  %v5073_v23 = vadd.f32 %v3383_v11, %v6458_v38  ;;  %v5089_v33 = vadd.f32 %v3602_v50, %v6461_v30  ;;  %v3724_v43 = vpack.c.bf16 %v3696_v19, %v3692_v41 }
 0x3af   :  { %v3667_v7 = vmul.f32 0.02, %v5086_v45  ;;  %vm3637_vm4 = vcmp.ge.f32.partialorder %v5072_v13, 0.0  ;;  %v3669_v0 = vmul.f32 0.02, %v5072_v13  ;;  %4025 = vmatprep.mubr.bf16.mxu0 %v3722_v21  ;;  %v3698_v53 = vsel %vm3634_vm2, %v5071_v49, %v3666_v61 }
 0x3b0   :  { %vm3638_vm5 = vcmp.ge.f32.partialorder %v5073_v23, 0.0  ;;  %v3670_v10 = vmul.f32 0.02, %v5073_v23  ;;  %vm3640_vm6 = vcmp.ge.f32.partialorder %v5089_v33, 0.0  ;;  %v3672_v51 = vmul.f32 0.02, %v5089_v33  ;;  %4090 = vmatprep.mubr.bf16.mxu1 %v3724_v43  ;;  %4026 = vmatmul.mubr.bf16.vlgmr.msra.gmra.mrb[64].mxu0 %v3721_v48 }
 0x3b1   :  { %vm3639_vm7 = vcmp.ge.f32.partialorder %v5088_v34, 0.0  ;;  %v3671_v31 = vmul.f32 0.02, %v5088_v34  ;;  %4091 = vmatmul.mubr.bf16.vlgmr.msra.gmra.mrb[64].mxu1 %v3723_v47  ;;  %v3387_v55 = vpop.f32.mrb[56].mxu0  ;;  %v3606_v4 = vpop.f32.mrb[56].mxu1  ;;  %v3700_v52 = vsel %vm3636_vm3, %v5087_v18, %v3668_v14  ;;  %v3701_v20 = vsel %vm3637_vm4, %v5072_v13, %v3669_v0 }
 0x3b2   :  { %v5074_v28 = vadd.f32 %v3387_v55, %v6452_v15  ;;  %v6489_v42 = vadd.f32 %v3606_v4, %v6455_v37  ;;  %v3389_v29 = vpop.f32.mrb[57].mxu0  ;;  %v3608_v3 = vpop.f32.mrb[57].mxu1  ;;  %v3702_v58 = vsel %vm3638_vm5, %v5073_v23, %v3670_v10  ;;  %v3704_v44 = vsel %vm3640_vm6, %v5089_v33, %v3672_v51 }
 0x3b3   :  { %v5075_v63 = vadd.f32 %v3389_v29, %v6458_v38  ;;  %v5091_v36 = vadd.f32 %v3608_v3, %v6461_v30  ;;  %v3391_v60 = vpop.f32.mrb[58].mxu0  ;;  %v3610_v22 = vpop.f32.mrb[58].mxu1  ;;  %v3726_v57 = vpack.c.bf16 %v3702_v58, %v3698_v53  ;;  %v3728_v40 = vpack.c.bf16 %v3704_v44, %v3700_v52 }
 0x3b4   :  { %v3673_v8 = vmul.f32 0.02, %v5074_v28  ;;  %v6496_v59 = vmul.f32 0.02, %v6489_v42  ;;  %v3697_v56 = vsel %vm3633_vm0, %v5070_v5, %v3665_v26  ;;  %v3699_v24 = vsel %vm3635_vm1, %v5086_v45, %v3667_v7  ;;  %v3393_v39 = vpop.f32.mrb[59].mxu0  ;;  %v3612_v48 = vpop.f32.mrb[59].mxu1 }
 0x3b5   :  { %vm3641_vm8 = vcmp.ge.f32.partialorder %v5074_v28, 0.0  ;;  %vm3642_vm9 = vcmp.ge.f32.partialorder %v5075_v63, 0.0  ;;  %v3674_v54 = vmul.f32 0.02, %v5075_v63  ;;  %v3676_v62 = vmul.f32 0.02, %v5091_v36  ;;  %4033 = vmatprep.mubr.bf16.mxu0 %v3726_v57  ;;  %4098 = vmatprep.mubr.bf16.mxu1 %v3728_v40 }
 0x3b6   :  { %vm3643_vm10 = vcmp.ge.f32.partialorder %v6489_v42, 0.0  ;;  %v5076_v1 = vadd.f32 %v3391_v60, %v6452_v15  ;;  %v5092_v25 = vadd.f32 %v3610_v22, %v6455_v37  ;;  %v3725_v27 = vpack.c.bf16 %v3701_v20, %v3697_v56 }
 0x3b7   :  { %v3703_v17 = vsel %vm3639_vm7, %v5088_v34, %v3671_v31  ;;  %vm3644_vm11 = vcmp.ge.f32.partialorder %v5091_v36, 0.0  ;;  %v5077_v2 = vadd.f32 %v3393_v39, %v6458_v38  ;;  %v5093_v46 = vadd.f32 %v3612_v48, %v6461_v30 }
 0x3b8   :  { %v3727_v5 = vpack.c.bf16 %v3703_v17, %v3699_v24  ;;  %v3397_v45 = vpop.f32.mrb[60].mxu0  ;;  %vm3645_vm12 = vcmp.ge.f32.partialorder %v5076_v1, 0.0  ;;  %v3677_v6 = vmul.f32 0.02, %v5076_v1  ;;  %vm3647_vm13 = vcmp.ge.f32.partialorder %v5092_v25, 0.0  ;;  %4034 = vmatmul.mubr.bf16.gmra.mrb[68].mxu0 %v3725_v27 }
 0x3b9   :  { %v3706_v9 = vsel %vm3642_vm9, %v5075_v63, %v3674_v54  ;;  %vm3646_vm14 = vcmp.ge.f32.partialorder %v5077_v2, 0.0  ;;  %v3678_v47 = vmul.f32 0.02, %v5077_v2  ;;  %vm3648_vm15 = vcmp.ge.f32.partialorder %v5093_v46, 0.0  ;;  %v3616_v32 = vpop.f32.mrb[60].mxu1  ;;  %v3399_v35 = vpop.f32.mrb[61].mxu0 }
 0x3ba   :  { %v3680_v49 = vmul.f32 0.02, %v5093_v46  ;;  %4099 = vmatmul.mubr.bf16.gmra.mrb[68].mxu1 %v3727_v5  ;;  %v3679_v18 = vmul.f32 0.02, %v5092_v25  ;;  %v5078_v12 = vadd.f32 %v3397_v45, %v6452_v15  ;;  %v3708_v26 = vsel %vm3644_vm11, %v5091_v36, %v3676_v62  ;;  %v3618_v14 = vpop.f32.mrb[61].mxu1  ;;  %v3401_v13 = vpop.f32.mrb[62].mxu0 }
 0x3bb   :  { %v3705_v16 = vsel %vm3641_vm8, %v5074_v28, %v3673_v8  ;;  %v5094_v41 = vadd.f32 %v3616_v32, %v6455_v37  ;;  %v5079_v61 = vadd.f32 %v3399_v35, %v6458_v38  ;;  %v3710_v34 = vsel %vm3646_vm14, %v5077_v2, %v3678_v47  ;;  %v3620_v23 = vpop.f32.mrb[62].mxu1  ;;  %v3403_v33 = vpop.f32.mrb[63].mxu0  ;;  %v6533_v62 = vld [vmem:[%s6648_s6 + $0x3] ss:$0 sm:$0xff] }
 0x3bc   :  { %v3709_v11 = vsel %vm3645_vm12, %v5076_v1, %v3677_v6  ;;  %v3681_v50 = vmul.f32 0.02, %v5078_v12  ;;  %v5095_v21 = vadd.f32 %v3618_v14, %v6461_v30  ;;  %v5080_v19 = vadd.f32 %v3401_v13, %v6452_v15  ;;  %v3622_v55 = vpop.f32.mrb[63].mxu1 }
 0x3bd   :  { %v3712_v43 = vsel %vm3648_vm15, %v5093_v46, %v3680_v49  ;;  %vm3649_vm0 = vcmp.ge.f32.partialorder %v5078_v12, 0.0  ;;  %vm3651_vm1 = vcmp.ge.f32.partialorder %v5094_v41, 0.0  ;;  %v3683_v7 = vmul.f32 0.02, %v5094_v41 }
 0x3be   :  { %v3682_v0 = vmul.f32 0.02, %v5079_v61  ;;  %vm3650_vm2 = vcmp.ge.f32.partialorder %v5079_v61, 0.0  ;;  %vm3652_vm3 = vcmp.ge.f32.partialorder %v5095_v21, 0.0  ;;  %v3684_v53 = vmul.f32 0.02, %v5095_v21 }
 0x3bf   :  { %v3685_v10 = vmul.f32 0.02, %v5080_v19  ;;  %v5096_v51 = vadd.f32 %v3620_v23, %v6455_v37  ;;  %v5081_v31 = vadd.f32 %v3403_v33, %v6458_v38  ;;  %v3730_v4 = vpack.c.bf16 %v3710_v34, %v3706_v9 }
 0x3c0   :  { %v3732_v52 = vpack.c.bf16 %v3712_v43, %v3708_v26  ;;  %vm3653_vm4 = vcmp.ge.f32.partialorder %v5080_v19, 0.0  ;;  %v5097_v15 = vadd.f32 %v3622_v55, %v6461_v30  ;;  %v3729_v20 = vpack.c.bf16 %v3709_v11, %v3705_v16 }
 0x3c1   :  { %v3711_v28 = vsel %vm3647_vm13, %v5092_v25, %v3679_v18  ;;  %v3687_v29 = vmul.f32 0.02, %v5096_v51  ;;  %vm3654_vm5 = vcmp.ge.f32.partialorder %v5081_v31, 0.0  ;;  %v3686_v3 = vmul.f32 0.02, %v5081_v31  ;;  %4041 = vmatprep.mubr.bf16.mxu0 %v3730_v4 }
 0x3c2   :  { %4106 = vmatprep.mubr.bf16.mxu1 %v3732_v52  ;;  %v3707_v37 = vsel %vm3643_vm10, %v6489_v42, %v6496_v59  ;;  %vm3655_vm6 = vcmp.ge.f32.partialorder %v5096_v51, 0.0  ;;  %vm3656_vm7 = vcmp.ge.f32.partialorder %v5097_v15, 0.0  ;;  %v3688_v38 = vmul.f32 0.02, %v5097_v15  ;;  %4042 = vmatmul.mubr.bf16.gmra.mrb[72].mxu0 %v3729_v20 }
 0x3c3   :  { %v3731_v58 = vpack.c.bf16 %v3711_v28, %v3707_v37  ;;  %v3714_v30 = vsel %vm3650_vm2, %v5079_v61, %v3682_v0  ;;  %v3718_v44 = vsel %vm3654_vm5, %v5081_v31, %v3686_v3  ;;  %v3713_v63 = vsel %vm3649_vm0, %v5078_v12, %v3681_v50 }
 0x3c4   :  { %v3717_v36 = vsel %vm3653_vm4, %v5080_v19, %v3685_v10  ;;  %v3734_v60 = vpack.c.bf16 %v3718_v44, %v3714_v30  ;;  %v3716_v22 = vsel %vm3652_vm3, %v5095_v21, %v3684_v53  ;;  %v3720_v57 = vsel %vm3656_vm7, %v5097_v15, %v3688_v38 }
 0x3c5   :  { %4107 = vmatmul.mubr.bf16.gmra.mrb[72].mxu1 %v3731_v58  ;;  %v3733_v40 = vpack.c.bf16 %v3717_v36, %v3713_v63  ;;  %v3736_v8 = vpack.c.bf16 %v3720_v57, %v3716_v22  ;;  %v3715_v42 = vsel %vm3651_vm1, %v5094_v41, %v3683_v7  ;;  %v3719_v59 = vsel %vm3655_vm6, %v5096_v51, %v3687_v29 }
 0x3c6   :  { %4049 = vmatprep.mubr.bf16.mxu0 %v3734_v60  ;;  %v3735_v56 = vpack.c.bf16 %v3719_v59, %v3715_v42 }
 0x3c7   :  { %4114 = vmatprep.mubr.bf16.mxu1 %v3736_v8 }
 0x3ca   :  { %4050 = vmatmul.mubr.bf16.gmra.mrb[76].mxu0 %v3733_v40 }
 0x3cd   :  { %4115 = vmatmul.mubr.bf16.gmra.mrb[76].mxu1 %v3735_v56 }
 0x483   :  { %v4918_v24 = vpop.f32.mrb[64].mxu0 }
 0x484   :  { %v4958_v54 = vpop.f32.mrb[64].mxu1  ;;  %v4919_v1 = vpop.f32.mrb[65].mxu0 }
 0x485   :  { %v4920_v25 = vadd.f32 %v4919_v1, %v4918_v24  ;;  %v4959_v39 = vpop.f32.mrb[65].mxu1  ;;  %v4921_v48 = vpop.f32.mrb[66].mxu0 }
 0x486   :  { %v4960_v27 = vadd.f32 %v4959_v39, %v4958_v54  ;;  %v4961_v17 = vpop.f32.mrb[66].mxu1  ;;  %v4922_v2 = vpop.f32.mrb[67].mxu0 }
 0x487   :  { %v4028_v46 = vadd.f32 %v4920_v25, %v6533_v62  ;;  %v4923_v5 = vadd.f32 %v4922_v2, %v4921_v48  ;;  %v4962_v45 = vpop.f32.mrb[67].mxu1 }
 0x488   :  { %v4963_v6 = vadd.f32 %v4962_v45, %v4961_v17 }
 0x489   :  { %v4093_v9 = vadd.f32 %v4960_v27, %v4028_v46  ;;  %v4031_v47 = vadd.f32 %v4923_v5, %v6533_v62 }
 0x48b   :  { %v4096_v49 = vadd.f32 %v4963_v6, %v4031_v47  ;;  %v4924_v18 = vpop.f32.mrb[68].mxu0  ;;  %vm4123_vm8 = vcmp.ge.f32.partialorder %v4093_v9, 0.0  ;;  %v4131_v12 = vmul.f32 0.02, %v4093_v9 }
 0x48c   :  { %v4925_v35 = vpop.f32.mrb[69].mxu0 }
 0x48d   :  { %v4964_v32 = vpop.f32.mrb[68].mxu1  ;;  %v4926_v26 = vadd.f32 %v4925_v35, %v4924_v18  ;;  %v4927_v41 = vpop.f32.mrb[70].mxu0  ;;  %v6537_v61 = vsel %vm4123_vm8, %v4093_v9, %v4131_v12  ;;  %vm4124_vm9 = vcmp.ge.f32.partialorder %v4096_v49, 0.0  ;;  %v4132_v14 = vmul.f32 0.02, %v4096_v49 }
 0x48e   :  { %v4965_v16 = vpop.f32.mrb[69].mxu1  ;;  %v4928_v11 = vpop.f32.mrb[71].mxu0  ;;  %4147 = vadd.xlane.f32.xlu0 %v6537_v61  ;;  %v4171_v10 = vmul.f32 %v6537_v61, %v6537_v61 }
 0x48f   :  { %v4966_v13 = vadd.f32 %v4965_v16, %v4964_v32  ;;  %v4967_v34 = vpop.f32.mrb[70].mxu1  ;;  %v4036_v50 = vadd.f32 %v4926_v26, %v6533_v62  ;;  %v4929_v21 = vadd.f32 %v4928_v11, %v4927_v41  ;;  %v6541_v23 = vsel %vm4124_vm9, %v4096_v49, %v4132_v14  ;;  %v5755_v11 = vld [vmem:[%s6647_s5 + $0x10] sm:$0xff]  }
 0x490   :  { %v4968_v19 = vpop.f32.mrb[71].mxu1  ;;  %v4172_v43 = vmul.f32 %v6541_v23, %v6541_v23 }
 0x491   :  { %v4969_v33 = vadd.f32 %v4968_v19, %v4967_v34  ;;  %v4101_v7 = vadd.f32 %v4966_v13, %v4036_v50  ;;  %v4039_v0 = vadd.f32 %v4929_v21, %v6533_v62  ;;  %v5754_v13 = vld [vmem:[%s6647_s5 + $0x8] sm:$0xff]   ;;  %v5756_v50 = vld [vmem:[%s6647_s5 + $0x18] sm:$0xff]   ;;  %v5757_v21 = vld [vmem:[%s6647_s5 + $0x20] sm:$0xff]  }
 0x492   :  { %4181 = vadd.xlane.f32.xlu1 %v4172_v43  ;;  %4149 = vadd.xlane.f32.xlu0 %v6541_v23  ;;  %v5758_v19 = vld [vmem:[%s6647_s5 + $0x28] sm:$0xff]   ;;  %v5760_v43 = vld [vmem:[%s6647_s5 + $0x38] sm:$0xff]  }
 0x493   :  { %v4104_v53 = vadd.f32 %v4969_v33, %v4039_v0  ;;  %v4133_v55 = vmul.f32 0.02, %v4101_v7  ;;  %vm4125_vm11 = vcmp.ge.f32.partialorder %v4101_v7, 0.0  ;;  %v5759_v33 = vld [vmem:[%s6647_s5 + $0x30] sm:$0xff]  }
 0x495   :  { %v4930_v51 = vpop.f32.mrb[72].mxu0  ;;  %vm4126_vm10 = vcmp.ge.f32.partialorder %v4104_v53, 0.0  ;;  %v4134_v31 = vmul.f32 0.02, %v4104_v53  ;;  %v6553_v44 = vsel %vm4125_vm11, %v4101_v7, %v4133_v55 }
 0x496   :  { %v4931_v4 = vpop.f32.mrb[73].mxu0  ;;  %4179 = vadd.xlane.f32.xlu0 %v4171_v10  ;;  %v4173_v40 = vmul.f32 %v6553_v44, %v6553_v44 }
 0x497   :  { %v4932_v15 = vadd.f32 %v4931_v4, %v4930_v51  ;;  %v4933_v20 = vpop.f32.mrb[74].mxu0  ;;  %v6549_v28 = vsel %vm4126_vm10, %v4104_v53, %v4134_v31 }
 0x498   :  { %v4970_v52 = vpop.f32.mrb[72].mxu1  ;;  %v4934_v3 = vpop.f32.mrb[75].mxu0  ;;  %4153 = vadd.xlane.f32.xlu1 %v6549_v28  ;;  %v4174_v36 = vmul.f32 %v6549_v28, %v6549_v28 }
 0x499   :  { %v4971_v29 = vpop.f32.mrb[73].mxu1  ;;  %v4044_v37 = vadd.f32 %v4932_v15, %v6533_v62  ;;  %v4935_v30 = vadd.f32 %v4934_v3, %v4933_v20 }
 0x49a   :  { %v4972_v38 = vadd.f32 %v4971_v29, %v4970_v52  ;;  %v4973_v58 = vpop.f32.mrb[74].mxu1  ;;  %4151 = vadd.xlane.f32.xlu0 %v6553_v44 }
 0x49b   :  { %v4974_v63 = vpop.f32.mrb[75].mxu1  ;;  %v4047_v22 = vadd.f32 %v4935_v30, %v6533_v62 }
 0x49c   :  { %v4109_v60 = vadd.f32 %v4972_v38, %v4044_v37  ;;  %v4975_v57 = vadd.f32 %v4974_v63, %v4973_v58  ;;  %4185 = vadd.xlane.f32.xlu1 %v4174_v36 }
 0x49d   :  { %v4936_v42 = vpop.f32.mrb[76].mxu0 }
 0x49e   :  { %v4112_v8 = vadd.f32 %v4975_v57, %v4047_v22  ;;  %vm4127_vm12 = vcmp.ge.f32.partialorder %v4109_v60, 0.0  ;;  %v4135_v59 = vmul.f32 0.02, %v4109_v60  ;;  %v4937_v56 = vpop.f32.mrb[77].mxu0  ;;  %4183 = vadd.xlane.f32.xlu0 %v4173_v40 }
 0x49f   :  { %v4938_v54 = vadd.f32 %v4937_v56, %v4936_v42  ;;  %v4939_v1 = vpop.f32.mrb[78].mxu0 }
 0x4a0   :  { %v4976_v24 = vpop.f32.mrb[76].mxu1  ;;  %v6561_v25 = vsel %vm4127_vm12, %v4109_v60, %v4135_v59  ;;  %v4136_v39 = vmul.f32 0.02, %v4112_v8  ;;  %v4940_v27 = vpop.f32.mrb[79].mxu0  ;;  %vm4128_vm13 = vcmp.ge.f32.partialorder %v4112_v8, 0.0 }
 0x4a1   :  { %v4977_v48 = vpop.f32.mrb[77].mxu1  ;;  %4155 = vadd.xlane.f32.xlu1 %v6561_v25  ;;  %v4175_v17 = vmul.f32 %v6561_v25, %v6561_v25  ;;  %v4052_v2 = vadd.f32 %v4938_v54, %v6533_v62  ;;  %v4941_v45 = vadd.f32 %v4940_v27, %v4939_v1 }
 0x4a2   :  { %v4978_v46 = vadd.f32 %v4977_v48, %v4976_v24  ;;  %v4979_v5 = vpop.f32.mrb[78].mxu1  ;;  %v6568_v18 = vsel %vm4128_vm13, %v4112_v8, %v4136_v39 }
 0x4a3   :  { %v4980_v6 = vpop.f32.mrb[79].mxu1  ;;  %4187 = vadd.xlane.f32.xlu0 %v4175_v17  ;;  %v4055_v47 = vadd.f32 %v4941_v45, %v6533_v62  ;;  %v4176_v35 = vmul.f32 %v6568_v18, %v6568_v18  ;;  %v5753_v62 = vld [vmem:[%s6647_s5] sm:$0xff]  }
 0x4a4   :  { %v4117_v9 = vadd.f32 %v4978_v46, %v4052_v2  ;;  %v4981_v49 = vadd.f32 %v4980_v6, %v4979_v5  ;;  %4994 = vmatprep.subr.bf16.mxu0 %v5753_v62  ;;  %5018 = vmatprep.subr.bf16.mxu1 %v5753_v62 }
 0x4a5   :  { %4157 = vadd.xlane.f32.xlu1 %v6568_v18  ;;  %4995 = vmatpush3.bf16.msra.mxu0 %v5753_v62 }
 0x4a6   :  { %v4120_v12 = vadd.f32 %v4981_v49, %v4055_v47  ;;  %vm4129_vm14 = vcmp.ge.f32.partialorder %v4117_v9, 0.0  ;;  %v4137_v32 = vmul.f32 0.02, %v4117_v9  ;;  %5026 = vmatpush3.bf16.msra.mxu1 %v5753_v62  ;;  %4996 = vmatprep.subr.bf16.mxu0 %v5754_v13 }
 0x4a7   :  { %5019 = vmatprep.subr.bf16.mxu1 %v5754_v13 }
 0x4a8   :  { %v6573_v26 = vsel %vm4129_vm14, %v4117_v9, %v4137_v32  ;;  %v4138_v16 = vmul.f32 0.02, %v4120_v12  ;;  %vm4130_vm15 = vcmp.ge.f32.partialorder %v4120_v12, 0.0 }
 0x4a9   :  { %4159 = vadd.xlane.f32.xlu0 %v6573_v26  ;;  %4189 = vadd.xlane.f32.xlu1 %v4176_v35  ;;  %v4177_v41 = vmul.f32 %v6573_v26, %v6573_v26 }
 0x4aa   :  { %v6581_v14 = vsel %vm4130_vm15, %v4120_v12, %v4138_v16  ;;  %4997 = vmatpush3.bf16.msra.mxu0 %v5754_v13  ;;  %5027 = vmatpush3.bf16.msra.mxu1 %v5754_v13 }
 0x4ab   :  { %v4178_v34 = vmul.f32 %v6581_v14, %v6581_v14  ;;  %4998 = vmatprep.subr.bf16.mxu0 %v5755_v11  ;;  %5020 = vmatprep.subr.bf16.mxu1 %v5755_v11 }
 0x4ad   :  { %4191 = vadd.xlane.f32.xlu0 %v4177_v41  ;;  %4161 = vadd.xlane.f32.xlu1 %v6581_v14 }
 0x4ae   :  { %4999 = vmatpush3.bf16.msra.mxu0 %v5755_v11  ;;  %5028 = vmatpush3.bf16.msra.mxu1 %v5755_v11 }
 0x4af   :  { %5000 = vmatprep.subr.bf16.mxu0 %v5756_v50  ;;  %5021 = vmatprep.subr.bf16.mxu1 %v5756_v50 }
 0x4b1   :  { %4193 = vadd.xlane.f32.xlu1 %v4178_v34 }
 0x4b2   :  { %5001 = vmatpush3.bf16.msra.mxu0 %v5756_v50  ;;  %5029 = vmatpush3.bf16.msra.mxu1 %v5756_v50 }
 0x4b3   :  { %5002 = vmatprep.subr.bf16.mxu0 %v5757_v21  ;;  %5022 = vmatprep.subr.bf16.mxu1 %v5757_v21 }
 0x4b6   :  { %5003 = vmatpush3.bf16.msra.mxu0 %v5757_v21  ;;  %5030 = vmatpush3.bf16.msra.mxu1 %v5757_v21 }
 0x4b7   :  { %5004 = vmatprep.subr.bf16.mxu0 %v5758_v19  ;;  %5023 = vmatprep.subr.bf16.mxu1 %v5758_v19 }
 0x4ba   :  { %5005 = vmatpush3.bf16.msra.mxu0 %v5758_v19  ;;  %5031 = vmatpush3.bf16.msra.mxu1 %v5758_v19 }
 0x4bb   :  { %5006 = vmatprep.subr.bf16.mxu0 %v5759_v33  ;;  %5024 = vmatprep.subr.bf16.mxu1 %v5759_v33 }
 0x4be   :  { %5007 = vmatpush3.bf16.msra.mxu0 %v5759_v33  ;;  %5032 = vmatpush3.bf16.msra.mxu1 %v5759_v33 }
 0x4bf   :  { %5008 = vmatprep.subr.bf16.mxu0 %v5760_v43  ;;  %5025 = vmatprep.subr.bf16.mxu1 %v5760_v43 }
 0x4c2   :  { %5009 = vmatpush3.bf16.msra.mxu0 %v5760_v43  ;;  %5033 = vmatpush3.bf16.msra.mxu1 %v5760_v43 }
 0x51b   :  { %v4148_v7 = vpop.xlane.xlu0 %4147 }
 0x51c   :  { %v4163_v10 = vmul.f32 0.025, %v4148_v7 }
 0x51e   :  { %v4203_v52 = vmul.f32 %v4163_v10, %v4163_v10  ;;  %v4219_v5 = vsub.f32 %v6537_v61, %v4163_v10 }
 0x51f   :  { %v4182_v0 = vpop.xlane.xlu1 %4181  ;;  %v4150_v53 = vpop.xlane.xlu0 %4149 }
 0x520   :  { %v4164_v51 = vmul.f32 0.025, %v4150_v53  ;;  %v4196_v31 = vmul.f32 0.025, %v4182_v0 }
 0x522   :  { %v4204_v55 = vmul.f32 %v4164_v51, %v4164_v51  ;;  %v4220_v45 = vsub.f32 %v6541_v23, %v4164_v51 }
 0x523   :  { %v4180_v4 = vpop.xlane.xlu0 %4179 }
 0x524   :  { %v4212_v15 = vsub.f32 %v4196_v31, %v4204_v55  ;;  %v4195_v20 = vmul.f32 0.025, %v4180_v4 }
 0x525   :  { %v4154_v29 = vpop.xlane.xlu1 %4153 }
 0x526   :  { %v4228_v3 = vadd.f32 1e-05, %v4212_v15  ;;  %v4211_v37 = vsub.f32 %v4195_v20, %v4203_v52  ;;  %v4166_v38 = vmul.f32 0.025, %v4154_v29 }
 0x527   :  { %v4152_v58 = vpop.xlane.xlu0 %4151 }
 0x528   :  { %5761 = vrsqrt.f32 %v4228_v3  ;;  %v4227_v30 = vadd.f32 1e-05, %v4211_v37  ;;  %v4165_v63 = vmul.f32 0.025, %v4152_v58  ;;  %v4206_v60 = vmul.f32 %v4166_v38, %v4166_v38 }
 0x529   :  { %v4186_v36 = vpop.xlane.xlu1 %4185  ;;  %v4222_v43 = vsub.f32 %v6549_v28, %v4166_v38 }
 0x52a   :  { %5763 = vrsqrt.f32 %v4227_v30  ;;  %v4198_v22 = vmul.f32 0.025, %v4186_v36  ;;  %v4205_v40 = vmul.f32 %v4165_v63, %v4165_v63  ;;  %v4221_v7 = vsub.f32 %v6553_v44, %v4165_v63 }
 0x52b   :  { %v4184_v57 = vpop.xlane.xlu0 %4183 }
 0x52c   :  { %v4214_v8 = vsub.f32 %v4198_v22, %v4206_v60  ;;  %v4197_v42 = vmul.f32 0.025, %v4184_v57 }
 0x52e   :  { %v4156_v59 = vpop.xlane.xlu1 %4155  ;;  %v4230_v56 = vadd.f32 1e-05, %v4214_v8  ;;  %v4213_v24 = vsub.f32 %v4197_v42, %v4205_v40 }
 0x52f   :  { %v4167_v54 = vmul.f32 0.025, %v4156_v59 }
 0x530   :  { %v4188_v1 = vpop.xlane.xlu0 %4187  ;;  %5765 = vrsqrt.f32 %v4230_v56  ;;  %v4229_v39 = vadd.f32 1e-05, %v4213_v24 }
 0x531   :  { %v4207_v48 = vmul.f32 %v4167_v54, %v4167_v54  ;;  %v4199_v27 = vmul.f32 0.025, %v4188_v1  ;;  %v4223_v28 = vsub.f32 %v6561_v25, %v4167_v54  ;;  %v90_v25 = vld [vmem:[%s6648_s6 + $0x4] ss:$0 sm:$0xff] }
 0x532   :  { %v4158_v17 = vpop.xlane.xlu1 %4157  ;;  %v5762_v2 = vpop.eup %5761  ;;  %5767 = vrsqrt.f32 %v4229_v39 }
 0x533   :  { %v4168_v46 = vmul.f32 0.025, %v4158_v17  ;;  %v4215_v6 = vsub.f32 %v4199_v27, %v4207_v48  ;;  %v4244_v47 = vmul.f32 %v5762_v2, %v4220_v45 }
 0x534   :  { %v5764_v9 = vpop.eup %5763 }
 0x535   :  { %v4231_v49 = vadd.f32 1e-05, %v4215_v6  ;;  %v4243_v35 = vmul.f32 %v5764_v9, %v4219_v5  ;;  %v4208_v16 = vmul.f32 %v4168_v46, %v4168_v46  ;;  %v4224_v44 = vsub.f32 %v6568_v18, %v4168_v46 }
 0x536   :  { %v4160_v12 = vpop.xlane.xlu0 %4159  ;;  %v4190_v32 = vpop.xlane.xlu1 %4189 }
 0x537   :  { %v4169_v62 = vmul.f32 0.025, %v4160_v12  ;;  %v4200_v41 = vmul.f32 0.025, %v4190_v32  ;;  %v4251_v13 = vpack.c.bf16 %v4244_v47, %v4243_v35  ;;  %5769 = vrsqrt.f32 %v4231_v49 }
 0x539   :  { %v4216_v34 = vsub.f32 %v4200_v41, %v4208_v16  ;;  %5010 = vmatprep.mubr.bf16.mxu0 %v4251_v13  ;;  %v4209_v61 = vmul.f32 %v4169_v62, %v4169_v62  ;;  %v4225_v36 = vsub.f32 %v6573_v26, %v4169_v62 }
 0x53a   :  { %v4192_v11 = vpop.xlane.xlu0 %4191  ;;  %v4162_v50 = vpop.xlane.xlu1 %4161 }
 0x53b   :  { %v5766_v21 = vpop.eup %5765  ;;  %v4232_v19 = vadd.f32 1e-05, %v4216_v34  ;;  %v4201_v23 = vmul.f32 0.025, %v4192_v11  ;;  %v4170_v33 = vmul.f32 0.025, %v4162_v50 }
 0x53c   :  { %v5768_v0 = vpop.eup %5767  ;;  %v4246_v31 = vmul.f32 %v5766_v21, %v4222_v43 }
 0x53d   :  { %5771 = vrsqrt.f32 %v4232_v19  ;;  %v4217_v53 = vsub.f32 %v4201_v23, %v4209_v61  ;;  %v4245_v51 = vmul.f32 %v5768_v0, %v4221_v7  ;;  %v4210_v4 = vmul.f32 %v4170_v33, %v4170_v33 }
 0x53e   :  { %v4194_v10 = vpop.xlane.xlu1 %4193  ;;  %v4226_v60 = vsub.f32 %v6581_v14, %v4170_v33 }
 0x53f   :  { %v4233_v55 = vadd.f32 1e-05, %v4217_v53  ;;  %v4202_v52 = vmul.f32 0.025, %v4194_v10  ;;  %v4252_v15 = vpack.c.bf16 %v4246_v31, %v4245_v51 }
 0x541   :  { %v4218_v20 = vsub.f32 %v4202_v52, %v4210_v4  ;;  %5011 = vmatmul.mubr.bf16.vlgmr.msra.gmra.mrb[80].mxu0 %v4252_v15  ;;  %5773 = vrsqrt.f32 %v4233_v55  ;;  %v5770_v3 = vpop.eup %5769 }
 0x542   :  { %v4247_v38 = vmul.f32 %v5770_v3, %v4223_v28 }
 0x543   :  { %v4234_v29 = vadd.f32 1e-05, %v4218_v20 }
 0x545   :  { %5775 = vrsqrt.f32 %v4234_v29 }
 0x547   :  { %v5772_v37 = vpop.eup %5771 }
 0x548   :  { %v4248_v58 = vmul.f32 %v5772_v37, %v4224_v44 }
 0x54a   :  { %v4253_v30 = vpack.c.bf16 %v4248_v58, %v4247_v38 }
 0x54b   :  { %v5774_v63 = vpop.eup %5773 }
 0x54c   :  { %5014 = vmatprep.mubr.bf16.mxu1 %v4253_v30  ;;  %v4249_v57 = vmul.f32 %v5774_v63, %v4225_v36 }
 0x54f   :  { %v5776_v22 = vpop.eup %5775 }
 0x550   :  { %v4250_v40 = vmul.f32 %v5776_v22, %v4226_v60 }
 0x552   :  { %v4254_v8 = vpack.c.bf16 %v4250_v40, %v4249_v57 }
 0x554   :  { %5015 = vmatmul.mubr.bf16.vlgmr.msra.gmra.mrb[80].mxu1 %v4254_v8 }
 0x614   :  { %v5012_v18 = vpop.f32.mrb[80].mxu0 }
 0x615   :  { %v4362_v42 = vadd.f32 %v5012_v18, %v90_v25  ;;  %v4353_v59 = vpop.f32.mrb[81].mxu0 }
 0x616   :  { %v4354_v56 = vadd.f32 %v4353_v59, %v90_v25  ;;  %v5013_v24 = vpop.f32.mrb[82].mxu0 }
 0x617   :  { %vm4386_vm0 = vcmp.ge.f32.partialorder %v4362_v42, 0.0  ;;  %v4394_v54 = vmul.f32 2.0, %v4362_v42  ;;  %v4365_v1 = vadd.f32 %v5013_v24, %v90_v25  ;;  %v4356_v26 = vpop.f32.mrb[83].mxu0 }
 0x618   :  { %vm4384_vm1 = vcmp.ge.f32.partialorder %v4354_v56, 0.0  ;;  %v4392_v14 = vmul.f32 2.0, %v4354_v56  ;;  %v4357_v39 = vadd.f32 %v4356_v26, %v90_v25 }
 0x619   :  { %v4402_v48 = vsel %vm4386_vm0, %v4362_v42, %v4394_v54  ;;  %vm4387_vm2 = vcmp.ge.f32.partialorder %v4365_v1, 0.0  ;;  %v4395_v27 = vmul.f32 2.0, %v4365_v1 }
 0x61a   :  { %4410 = vst [vmem:[%s6649_s7 + $0x10] sm:$0xff] %v4402_v48  ;;  %v4400_v17 = vsel %vm4384_vm1, %v4354_v56, %v4392_v14  ;;  %vm4385_vm3 = vcmp.ge.f32.partialorder %v4357_v39, 0.0  ;;  %v4393_v2 = vmul.f32 2.0, %v4357_v39 }
 0x61b   :  { %4408 = vst [vmem:[%s6649_s7] sm:$0xff] %v4400_v17  ;;  %v4403_v46 = vsel %vm4387_vm2, %v4365_v1, %v4395_v27 }
 0x61c   :  { %4411 = vst [vmem:[%s6649_s7 + $0x18] sm:$0xff] %v4403_v46  ;;  %v4401_v5 = vsel %vm4385_vm3, %v4357_v39, %v4393_v2 }
 0x61d   :  { %4409 = vst [vmem:[%s6649_s7 + $0x8] sm:$0xff] %v4401_v5 }
 0x627   :  { %v5016_v45 = vpop.f32.mrb[80].mxu1 }
 0x628   :  { %v4378_v6 = vadd.f32 %v5016_v45, %v90_v25  ;;  %v4369_v9 = vpop.f32.mrb[81].mxu1 }
 0x629   :  { %v4370_v47 = vadd.f32 %v4369_v9, %v90_v25  ;;  %v5017_v49 = vpop.f32.mrb[82].mxu1 }
 0x62a   :  { %vm4390_vm4 = vcmp.ge.f32.partialorder %v4378_v6, 0.0  ;;  %v4398_v12 = vmul.f32 2.0, %v4378_v6  ;;  %v4381_v32 = vadd.f32 %v5017_v49, %v90_v25  ;;  %v4372_v35 = vpop.f32.mrb[83].mxu1 }
 0x62b   :  { %vm4388_vm5 = vcmp.ge.f32.partialorder %v4370_v47, 0.0  ;;  %v4396_v16 = vmul.f32 2.0, %v4370_v47  ;;  %v4373_v62 = vadd.f32 %v4372_v35, %v90_v25 }
 0x62c   :  { %v4406_v41 = vsel %vm4390_vm4, %v4378_v6, %v4398_v12  ;;  %vm4391_vm6 = vcmp.ge.f32.partialorder %v4381_v32, 0.0  ;;  %v4399_v13 = vmul.f32 2.0, %v4381_v32 }
 0x62d   :  { %4414 = vst [vmem:[%s6649_s7 + $0x30] sm:$0xff] %v4406_v41  ;;  %v4404_v34 = vsel %vm4388_vm5, %v4370_v47, %v4396_v16  ;;  %vm4389_vm7 = vcmp.ge.f32.partialorder %v4373_v62, 0.0  ;;  %v4397_v11 = vmul.f32 2.0, %v4373_v62 }
 0x62e   :  { %4412 = vst [vmem:[%s6649_s7 + $0x20] sm:$0xff] %v4404_v34  ;;  %v4407_v50 = vsel %vm4391_vm6, %v4381_v32, %v4399_v13 }
 0x62f   :  { %4415 = vst [vmem:[%s6649_s7 + $0x38] sm:$0xff] %v4407_v50  ;;  %v4405_v21 = vsel %vm4389_vm7, %v4373_v62, %v4397_v11 }
 0x630   :  { %4413 = vst [vmem:[%s6649_s7 + $0x28] sm:$0xff] %v4405_v21 }
 0x631   :  { %4420 = vsyncpa [#allocation3], 1 }
 0x632   :  { %4421 = vsyncpa [#allocation5], 1 }
 0x633   :  { %4422 = vsyncpa [#allocation8], 1 }

</bundles_post_ra>
